<compile_context>
chip_gen: v7x
topology: tpu7x:2x2x1
jax: 0.10.0
libtpu: 0.0.40
codegen_flags: <defaults>
</compile_context>

<pallas_src>
import jax
import jax.numpy as jnp
from jax.experimental import pallas as pl


# ----------------------------------------------------------------------------
# Fused Conv3x3 (single matmul) + bias + ReLU + MaxPool2d(2) kernel
# ----------------------------------------------------------------------------
def conv_relu_pool_kernel(col_ref, w_ref, b_ref, o_ref):
    # col_ref: (4*Mo, 9*Cin)  im2col rows ordered (window_pos, N, Ho, Wo)
    # w_ref  : (9*Cin, Cout)
    # b_ref  : (1, Cout)
    # o_ref  : (Mo, Cout)     pooled output, rows ordered (N, Ho, Wo)
    mo = o_ref.shape[0]
    # Single MXU contraction over K = 9*Cin (no 9-tap accumulate loop).
    y = jnp.dot(col_ref[...], w_ref[...], preferred_element_type=jnp.float32)
    y = jnp.maximum(y + b_ref[...], 0.0)                       # bias + ReLU
    # 2x2 max-pool: max over the 4 window-position blocks (static slices).
    p = jnp.maximum(jnp.maximum(y[0 * mo:1 * mo], y[1 * mo:2 * mo]),
                    jnp.maximum(y[2 * mo:3 * mo], y[3 * mo:4 * mo]))
    o_ref[...] = p.astype(o_ref.dtype)


def _im2col_pool_order(x_nhwc):
    """(N,H,W,C) -> (4*N*Ho*Wo, 9*C) im2col, rows grouped by 2x2-window pos."""
    N, H, W, C = x_nhwc.shape
    Ho, Wo = H // 2, W // 2
    xp = jnp.pad(x_nhwc, ((0, 0), (1, 1), (1, 1), (0, 0)))
    taps = [xp[:, dy:dy + H, dx:dx + W, :] for dy in range(3) for dx in range(3)]
    col = jnp.concatenate(taps, axis=-1)                        # (N, H, W, 9C)
    col = col.reshape(N, Ho, 2, Wo, 2, 9 * C)
    col = col.transpose(2, 4, 0, 1, 3, 5)                       # (2,2,N,Ho,Wo,9C)
    return col.reshape(4 * N * Ho * Wo, 9 * C)


def conv_relu_pool(x_nhwc, w_hwio, b):
    N, H, W, Cin = x_nhwc.shape
    Cout = w_hwio.shape[-1]
    Ho, Wo = H // 2, W // 2
    Mo = N * Ho * Wo
    col = _im2col_pool_order(x_nhwc)                            # (4*Mo, 9*Cin)
    w2d = w_hwio.reshape(9 * Cin, Cout)                         # K-folded weight
    out = pl.pallas_call(
        conv_relu_pool_kernel,
        out_shape=jax.ShapeDtypeStruct((Mo, Cout), jnp.float32),
    )(col, w2d, b.reshape(1, Cout))
    return out.reshape(N, Ho, Wo, Cout)


# ----------------------------------------------------------------------------
# Classifier: Flatten + Linear as one batched matmul kernel
# ----------------------------------------------------------------------------
def linear_kernel(x_ref, w_ref, b_ref, o_ref):
    # x_ref: (N, F); w_ref: (F, n_classes); b_ref: (1, n_classes)
    o_ref[...] = (jnp.dot(x_ref[...], w_ref[...],
                          preferred_element_type=jnp.float32)
                  + b_ref[...]).astype(o_ref.dtype)


def classifier(x_nhwc, w_chw, b):
    # PyTorch's nn.Flatten runs on NCHW; permute the (C*H*W, n_cls) weight rows
    # to HWC order once so the NHWC activation flattens directly (equivalent).
    N, H, W, C = x_nhwc.shape
    n_cls = w_chw.shape[-1]
    w_hwc = (w_chw.reshape(C, H, W, n_cls)
             .transpose(1, 2, 0, 3)
             .reshape(C * H * W, n_cls))
    x2d = x_nhwc.reshape(N, H * W * C)
    return pl.pallas_call(
        linear_kernel,
        out_shape=jax.ShapeDtypeStruct((N, n_cls), jnp.float32),
    )(x2d, w_hwc, b.reshape(1, n_cls))


# ----------------------------------------------------------------------------
# Parameter init (deterministic, in-script) and forward pass
# ----------------------------------------------------------------------------
def init_params(key, n_classes):
    def conv_p(k, cin, cout):
        k1, k2 = jax.random.split(k)
        s = 1.0 / jnp.sqrt(9.0 * cin)
        w = s * jax.random.normal(k1, (3, 3, cin, cout), jnp.float32)   # HWIO
        b = s * jax.random.normal(k2, (cout,), jnp.float32)
        return (w, b)

    k1, k2, k3, k4 = jax.random.split(key, 4)
    params = {
        "conv1": conv_p(k1, 3, 16),
        "conv2": conv_p(k2, 16, 32),
        "conv3": conv_p(k3, 32, 64),
    }
    in_features = 64 * 4 * 4                                    # cifar10 config
    kf1, kf2 = jax.random.split(k4)
    s = 1.0 / jnp.sqrt(float(in_features))
    # fc_w rows are in PyTorch CHW-flatten order (as nn.Linear would see them).
    params["fc_w"] = s * jax.random.normal(kf1, (in_features, n_classes),
                                           jnp.float32)
    params["fc_b"] = s * jax.random.normal(kf2, (n_classes,), jnp.float32)
    return params


def smallcnn_forward(x_nchw, params):
    x = jnp.transpose(x_nchw, (0, 2, 3, 1))                     # NCHW -> NHWC
    x = conv_relu_pool(x, *params["conv1"])                     # (N,16,16,16)
    x = conv_relu_pool(x, *params["conv2"])                     # (N, 8, 8,32)
    x = conv_relu_pool(x, *params["conv3"])                     # (N, 4, 4,64)
    return classifier(x, params["fc_w"], params["fc_b"])        # (N, n_classes)


if __name__ == "__main__":
    n_classes = 10
    key = jax.random.PRNGKey(0)
    kx, kp = jax.random.split(key)
    x = jax.random.normal(kx, (2, 3, 32, 32), jnp.float32)      # NCHW like PyTorch
    params = init_params(kp, n_classes)

    fwd = jax.jit(smallcnn_forward)
    logits = fwd(x, params)
    jax.block_until_ready(logits)

    assert logits.shape == (2, n_classes)
    assert bool(jnp.all(jnp.isfinite(logits)))
    print("KERNEL_OK")
</pallas_src>

<mosaic_0001>
module attributes {stable_mosaic.version = 11 : i64} {
  func.func @conv_relu_pool_kernel(%arg0: memref<2048x27xf32, #tpu.memory_space<vmem>>, %arg1: memref<27x16xf32, #tpu.memory_space<vmem>>, %arg2: memref<1x16xf32, #tpu.memory_space<vmem>>, %arg3: memref<512x16xf32, #tpu.memory_space<vmem>>) attributes {dimension_semantics = [], scalar_prefetch = 0 : i64, scratch_operands = 0 : i64, tpu.core_type = #tpu.core_type<tc>} {
    %c0 = arith.constant 0 : index
    %c0_0 = arith.constant 0 : index
    %0 = vector.load %arg0[%c0, %c0_0] : memref<2048x27xf32, #tpu.memory_space<vmem>>, vector<2048x27xf32>
    %c0_1 = arith.constant 0 : index
    %c0_2 = arith.constant 0 : index
    %1 = vector.load %arg1[%c0_1, %c0_2] : memref<27x16xf32, #tpu.memory_space<vmem>>, vector<27x16xf32>
    %cst = arith.constant dense<0.000000e+00> : vector<2048x16xf32>
    %2 = tpu.matmul %0, %1, %cst {dimension_numbers = #tpu.dot_dimension_numbers<[1], [0], [0], [1], [0, 0, 1, 1], [], []>} : vector<2048x27xf32>, vector<27x16xf32>, vector<2048x16xf32> -> vector<2048x16xf32>
    %c0_3 = arith.constant 0 : index
    %c0_4 = arith.constant 0 : index
    %3 = vector.load %arg2[%c0_3, %c0_4] : memref<1x16xf32, #tpu.memory_space<vmem>>, vector<1x16xf32>
    %4 = vector.broadcast %3 : vector<1x16xf32> to vector<2048x16xf32>
    %5 = arith.addf %2, %4 : vector<2048x16xf32>
    %cst_5 = arith.constant 0.000000e+00 : f32
    %6 = vector.broadcast %cst_5 : f32 to vector<2048x16xf32>
    %7 = arith.maximumf %5, %6 : vector<2048x16xf32>
    %8 = vector.extract_strided_slice %7 {offsets = [0, 0], sizes = [512, 16], strides = [1, 1]} : vector<2048x16xf32> to vector<512x16xf32>
    %9 = vector.extract_strided_slice %7 {offsets = [512, 0], sizes = [512, 16], strides = [1, 1]} : vector<2048x16xf32> to vector<512x16xf32>
    %10 = arith.maximumf %8, %9 : vector<512x16xf32>
    %11 = vector.extract_strided_slice %7 {offsets = [1024, 0], sizes = [512, 16], strides = [1, 1]} : vector<2048x16xf32> to vector<512x16xf32>
    %12 = vector.extract_strided_slice %7 {offsets = [1536, 0], sizes = [512, 16], strides = [1, 1]} : vector<2048x16xf32> to vector<512x16xf32>
    %13 = arith.maximumf %11, %12 : vector<512x16xf32>
    %14 = arith.maximumf %10, %13 : vector<512x16xf32>
    %c0_6 = arith.constant 0 : index
    %c0_7 = arith.constant 0 : index
    %15 = vector.load %arg3[%c0_6, %c0_7] : memref<512x16xf32, #tpu.memory_space<vmem>>, vector<512x16xf32>
    tpu.vector_store %arg3[%c0_6, %c0_7], %14 {strides = array<i32>} : memref<512x16xf32, #tpu.memory_space<vmem>>, vector<512x16xf32>,
    return
  }
}

module attributes {stable_mosaic.version = 11 : i64} {
  func.func @conv_relu_pool_kernel(%arg0: memref<512x144xf32, #tpu.memory_space<vmem>>, %arg1: memref<144x32xf32, #tpu.memory_space<vmem>>, %arg2: memref<1x32xf32, #tpu.memory_space<vmem>>, %arg3: memref<128x32xf32, #tpu.memory_space<vmem>>) attributes {dimension_semantics = [], scalar_prefetch = 0 : i64, scratch_operands = 0 : i64, tpu.core_type = #tpu.core_type<tc>} {
    %c0 = arith.constant 0 : index
    %c0_0 = arith.constant 0 : index
    %0 = vector.load %arg0[%c0, %c0_0] : memref<512x144xf32, #tpu.memory_space<vmem>>, vector<512x144xf32>
    %c0_1 = arith.constant 0 : index
    %c0_2 = arith.constant 0 : index
    %1 = vector.load %arg1[%c0_1, %c0_2] : memref<144x32xf32, #tpu.memory_space<vmem>>, vector<144x32xf32>
    %cst = arith.constant dense<0.000000e+00> : vector<512x32xf32>
    %2 = tpu.matmul %0, %1, %cst {dimension_numbers = #tpu.dot_dimension_numbers<[1], [0], [0], [1], [0, 0, 1, 1], [], []>} : vector<512x144xf32>, vector<144x32xf32>, vector<512x32xf32> -> vector<512x32xf32>
    %c0_3 = arith.constant 0 : index
    %c0_4 = arith.constant 0 : index
    %3 = vector.load %arg2[%c0_3, %c0_4] : memref<1x32xf32, #tpu.memory_space<vmem>>, vector<1x32xf32>
    %4 = vector.broadcast %3 : vector<1x32xf32> to vector<512x32xf32>
    %5 = arith.addf %2, %4 : vector<512x32xf32>
    %cst_5 = arith.constant 0.000000e+00 : f32
    %6 = vector.broadcast %cst_5 : f32 to vector<512x32xf32>
    %7 = arith.maximumf %5, %6 : vector<512x32xf32>
    %8 = vector.extract_strided_slice %7 {offsets = [0, 0], sizes = [128, 32], strides = [1, 1]} : vector<512x32xf32> to vector<128x32xf32>
    %9 = vector.extract_strided_slice %7 {offsets = [128, 0], sizes = [128, 32], strides = [1, 1]} : vector<512x32xf32> to vector<128x32xf32>
    %10 = arith.maximumf %8, %9 : vector<128x32xf32>
    %11 = vector.extract_strided_slice %7 {offsets = [256, 0], sizes = [128, 32], strides = [1, 1]} : vector<512x32xf32> to vector<128x32xf32>
    %12 = vector.extract_strided_slice %7 {offsets = [384, 0], sizes = [128, 32], strides = [1, 1]} : vector<512x32xf32> to vector<128x32xf32>
    %13 = arith.maximumf %11, %12 : vector<128x32xf32>
    %14 = arith.maximumf %10, %13 : vector<128x32xf32>
    %c0_6 = arith.constant 0 : index
    %c0_7 = arith.constant 0 : index
    %15 = vector.load %arg3[%c0_6, %c0_7] : memref<128x32xf32, #tpu.memory_space<vmem>>, vector<128x32xf32>
    tpu.vector_store %arg3[%c0_6, %c0_7], %14 {strides = array<i32>} : memref<128x32xf32, #tpu.memory_space<vmem>>, vector<128x32xf32>,
    return
  }
}

module attributes {stable_mosaic.version = 11 : i64} {
  func.func @conv_relu_pool_kernel(%arg0: memref<128x288xf32, #tpu.memory_space<vmem>>, %arg1: memref<288x64xf32, #tpu.memory_space<vmem>>, %arg2: memref<1x64xf32, #tpu.memory_space<vmem>>, %arg3: memref<32x64xf32, #tpu.memory_space<vmem>>) attributes {dimension_semantics = [], scalar_prefetch = 0 : i64, scratch_operands = 0 : i64, tpu.core_type = #tpu.core_type<tc>} {
    %c0 = arith.constant 0 : index
    %c0_0 = arith.constant 0 : index
    %0 = vector.load %arg0[%c0, %c0_0] : memref<128x288xf32, #tpu.memory_space<vmem>>, vector<128x288xf32>
    %c0_1 = arith.constant 0 : index
    %c0_2 = arith.constant 0 : index
    %1 = vector.load %arg1[%c0_1, %c0_2] : memref<288x64xf32, #tpu.memory_space<vmem>>, vector<288x64xf32>
    %cst = arith.constant dense<0.000000e+00> : vector<128x64xf32>
    %2 = tpu.matmul %0, %1, %cst {dimension_numbers = #tpu.dot_dimension_numbers<[1], [0], [0], [1], [0, 0, 1, 1], [], []>} : vector<128x288xf32>, vector<288x64xf32>, vector<128x64xf32> -> vector<128x64xf32>
    %c0_3 = arith.constant 0 : index
    %c0_4 = arith.constant 0 : index
    %3 = vector.load %arg2[%c0_3, %c0_4] : memref<1x64xf32, #tpu.memory_space<vmem>>, vector<1x64xf32>
    %4 = vector.broadcast %3 : vector<1x64xf32> to vector<128x64xf32>
    %5 = arith.addf %2, %4 : vector<128x64xf32>
    %cst_5 = arith.constant 0.000000e+00 : f32
    %6 = vector.broadcast %cst_5 : f32 to vector<128x64xf32>
    %7 = arith.maximumf %5, %6 : vector<128x64xf32>
    %8 = vector.extract_strided_slice %7 {offsets = [0, 0], sizes = [32, 64], strides = [1, 1]} : vector<128x64xf32> to vector<32x64xf32>
    %9 = vector.extract_strided_slice %7 {offsets = [32, 0], sizes = [32, 64], strides = [1, 1]} : vector<128x64xf32> to vector<32x64xf32>
    %10 = arith.maximumf %8, %9 : vector<32x64xf32>
    %11 = vector.extract_strided_slice %7 {offsets = [64, 0], sizes = [32, 64], strides = [1, 1]} : vector<128x64xf32> to vector<32x64xf32>
    %12 = vector.extract_strided_slice %7 {offsets = [96, 0], sizes = [32, 64], strides = [1, 1]} : vector<128x64xf32> to vector<32x64xf32>
    %13 = arith.maximumf %11, %12 : vector<32x64xf32>
    %14 = arith.maximumf %10, %13 : vector<32x64xf32>
    %c0_6 = arith.constant 0 : index
    %c0_7 = arith.constant 0 : index
    %15 = vector.load %arg3[%c0_6, %c0_7] : memref<32x64xf32, #tpu.memory_space<vmem>>, vector<32x64xf32>
    tpu.vector_store %arg3[%c0_6, %c0_7], %14 {strides = array<i32>} : memref<32x64xf32, #tpu.memory_space<vmem>>, vector<32x64xf32>,
    return
  }
}

module attributes {stable_mosaic.version = 11 : i64} {
  func.func @linear_kernel(%arg0: memref<2x1024xf32, #tpu.memory_space<vmem>>, %arg1: memref<1024x10xf32, #tpu.memory_space<vmem>>, %arg2: memref<1x10xf32, #tpu.memory_space<vmem>>, %arg3: memref<2x10xf32, #tpu.memory_space<vmem>>) attributes {dimension_semantics = [], scalar_prefetch = 0 : i64, scratch_operands = 0 : i64, tpu.core_type = #tpu.core_type<tc>} {
    %c0 = arith.constant 0 : index
    %c0_0 = arith.constant 0 : index
    %0 = vector.load %arg0[%c0, %c0_0] : memref<2x1024xf32, #tpu.memory_space<vmem>>, vector<2x1024xf32>
    %c0_1 = arith.constant 0 : index
    %c0_2 = arith.constant 0 : index
    %1 = vector.load %arg1[%c0_1, %c0_2] : memref<1024x10xf32, #tpu.memory_space<vmem>>, vector<1024x10xf32>
    %cst = arith.constant dense<0.000000e+00> : vector<2x10xf32>
    %2 = tpu.matmul %0, %1, %cst {dimension_numbers = #tpu.dot_dimension_numbers<[1], [0], [0], [1], [0, 0, 1, 1], [], []>} : vector<2x1024xf32>, vector<1024x10xf32>, vector<2x10xf32> -> vector<2x10xf32>
    %c0_3 = arith.constant 0 : index
    %c0_4 = arith.constant 0 : index
    %3 = vector.load %arg2[%c0_3, %c0_4] : memref<1x10xf32, #tpu.memory_space<vmem>>, vector<1x10xf32>
    %4 = vector.broadcast %3 : vector<1x10xf32> to vector<2x10xf32>
    %5 = arith.addf %2, %4 : vector<2x10xf32>
    %c0_5 = arith.constant 0 : index
    %c0_6 = arith.constant 0 : index
    %6 = vector.load %arg3[%c0_5, %c0_6] : memref<2x10xf32, #tpu.memory_space<vmem>>, vector<2x10xf32>
    tpu.vector_store %arg3[%c0_5, %c0_6], %5 {strides = array<i32>} : memref<2x10xf32, #tpu.memory_space<vmem>>, vector<2x10xf32>,
    return
  }
}

</mosaic_0001>

<bundles_post_ra>
// kernel: smallcnn_forward.4
= control target key start
LH: loop header
LB: loop body
LE: loop exit
PB: predicated region body
PF: predicated region fallthrough
CT: control target
= control target key end

     0   :  { %vm1050_vm0 = vcmask 1042432   ;;  %vm281_vm1 = vcmask 220160   ;;  %vm3842_vm2 = vmmov 1   ;;  %vm2847_vm4 = vcmask 130048   ;;  %s6431_s1 = inlined_call_operand.vmem [shape: f32[27,16], index: 1, kind: input, shape index: {}]   ;;  %s6432_s0 = inlined_call_operand.vmem [shape: f32[2048,27], index: 0, kind: input, shape index: {}]   ;;  %s6433_s2 = inlined_call_operand.vmem [shape: f32[1,16], index: 2, kind: input, shape index: {}]   ;;  %s6434_s3 = inlined_call_operand.vmem [shape: f32[512,16], index: 3, kind: output, shape index: {}]  }
   0x1   :  { %v270_v0 = vld [vmem:[%s6431_s1] sm:$0xff]  ;;  %v271_v1 = vld [vmem:[%s6431_s1 + $0x8] sm:$0xff]  ;;  %v272_v2 = vld [vmem:[%s6431_s1 + $0x10] sm:$0xff] }
   0x2   :  { %v3826_v3 = vpack.c.bf16 %v271_v1, %v270_v0  ;;  %v273_v4 = vld [vmem:[%s6431_s1 + $0x18] sm:$0x7]  ;;  %v14_v5 = vld [vmem:[%s6432_s0] sm:$0xff]  ;;  %vm3831_vm3 = vmpackc.low %vm1050_vm0, %vm3842_vm2 }
   0x3   :  { %v3830_v6 = vpack.c.bf16 %v273_v4, %v272_v2  ;;  %3442 = vmatprep.mubr.msk.f32.mxu0 %vm281_vm1, %v14_v5  ;;  %v142_v7 = vld [vmem:[%s6432_s0 + $0x400] sm:$0xff]  ;;  %v15_v8 = vld [vmem:[%s6432_s0 + $0x8] sm:$0xff]  ;;  %v16_v10 = vld [vmem:[%s6432_s0 + $0x10] sm:$0xff] }
   0x4   :  { %3827 = vmatprep.subr.bf16.mxu0 %v3826_v3  ;;  %3836 = vmatprep.subr.bf16.mxu1 %v3826_v3  ;;  %v143_v9 = vld [vmem:[%s6432_s0 + $0x408] sm:$0xff]  ;;  %v144_v11 = vld [vmem:[%s6432_s0 + $0x410] sm:$0xff]  ;;  %v17_v12 = vld [vmem:[%s6432_s0 + $0x18] sm:$0xff] }
   0x5   :  { %3829 = vmatpush3.bf16.msra.mxu0 %v3826_v3  ;;  %3838 = vmatpush3.bf16.msra.mxu1 %v3826_v3  ;;  %v145_v13 = vld [vmem:[%s6432_s0 + $0x418] sm:$0xff]  ;;  %v18_v14 = vld [vmem:[%s6432_s0 + $0x20] sm:$0xff]  ;;  %v19_v16 = vld [vmem:[%s6432_s0 + $0x28] sm:$0xff] }
   0x6   :  { %3832 = vmatprep.subr.msk.bf16.mxu0 %vm3831_vm3, %v3830_v6  ;;  %3837 = vmatprep.subr.msk.bf16.mxu1 %vm3831_vm3, %v3830_v6  ;;  %v146_v15 = vld [vmem:[%s6432_s0 + $0x420] sm:$0xff]  ;;  %v147_v17 = vld [vmem:[%s6432_s0 + $0x428] sm:$0xff]  ;;  %v20_v18 = vld [vmem:[%s6432_s0 + $0x30] sm:$0xff] }
   0x7   :  { %3634 = vmatprep.mubr.msk.f32.mxu1 %vm281_vm1, %v142_v7  ;;  %v148_v19 = vld [vmem:[%s6432_s0 + $0x430] sm:$0xff]  ;;  %v21_v20 = vld [vmem:[%s6432_s0 + $0x38] sm:$0xff]  ;;  %v22_v22 = vld [vmem:[%s6432_s0 + $0x40] sm:$0xff] }
   0x8   :  { %v149_v21 = vld [vmem:[%s6432_s0 + $0x438] sm:$0xff]  ;;  %v150_v23 = vld [vmem:[%s6432_s0 + $0x440] sm:$0xff]  ;;  %v23_v24 = vld [vmem:[%s6432_s0 + $0x48] sm:$0xff] }
   0x9   :  { %3835 = vmatpush3.bf16.msk.msra.mxu0 %vm3831_vm3, %v3830_v6  ;;  %3839 = vmatpush3.bf16.msk.msra.mxu1 %vm3831_vm3, %v3830_v6  ;;  %v151_v25 = vld [vmem:[%s6432_s0 + $0x448] sm:$0xff]  ;;  %v24_v26 = vld [vmem:[%s6432_s0 + $0x50] sm:$0xff]  ;;  %v25_v28 = vld [vmem:[%s6432_s0 + $0x58] sm:$0xff] }
   0xa   :  { %v152_v27 = vld [vmem:[%s6432_s0 + $0x450] sm:$0xff]  ;;  %v153_v29 = vld [vmem:[%s6432_s0 + $0x458] sm:$0xff]  ;;  %v26_v30 = vld [vmem:[%s6432_s0 + $0x60] sm:$0xff] }
   0xb   :  { %v154_v31 = vld [vmem:[%s6432_s0 + $0x460] sm:$0xff]  ;;  %v27_v32 = vld [vmem:[%s6432_s0 + $0x68] sm:$0xff]  ;;  %v28_v34 = vld [vmem:[%s6432_s0 + $0x70] sm:$0xff] }
   0xc   :  { %3443 = vmatmul.mubr.msk.f32.vlgmr.msra.gmra.mrb[0].mxu0 %vm281_vm1, %v15_v8  ;;  %3635 = vmatmul.mubr.msk.f32.vlgmr.msra.gmra.mrb[0].mxu1 %vm281_vm1, %v143_v9  ;;  %v155_v33 = vld [vmem:[%s6432_s0 + $0x468] sm:$0xff]  ;;  %v156_v35 = vld [vmem:[%s6432_s0 + $0x470] sm:$0xff]  ;;  %v29_v36 = vld [vmem:[%s6432_s0 + $0x78] sm:$0xff] }
   0xd   :  { %3445 = vmatprep.mubr.msk.f32.mxu0 %vm281_vm1, %v16_v10  ;;  %3637 = vmatprep.mubr.msk.f32.mxu1 %vm281_vm1, %v144_v11  ;;  %v157_v37 = vld [vmem:[%s6432_s0 + $0x478] sm:$0xff]  ;;  %v30_v38 = vld [vmem:[%s6432_s0 + $0x80] sm:$0xff]  ;;  %v31_v40 = vld [vmem:[%s6432_s0 + $0x88] sm:$0xff] }
   0xe   :  { %v158_v39 = vld [vmem:[%s6432_s0 + $0x480] sm:$0xff]  ;;  %v159_v41 = vld [vmem:[%s6432_s0 + $0x488] sm:$0xff]  ;;  %v32_v42 = vld [vmem:[%s6432_s0 + $0x90] sm:$0xff] }
   0xf   :  { %v160_v43 = vld [vmem:[%s6432_s0 + $0x490] sm:$0xff]  ;;  %v33_v44 = vld [vmem:[%s6432_s0 + $0x98] sm:$0xff]  ;;  %v34_v46 = vld [vmem:[%s6432_s0 + $0xa0] sm:$0xff] }
  0x10   :  { %3446 = vmatmul.mubr.msk.f32.gmra.mrb[2].mxu0 %vm281_vm1, %v17_v12  ;;  %3638 = vmatmul.mubr.msk.f32.gmra.mrb[2].mxu1 %vm281_vm1, %v145_v13  ;;  %v161_v45 = vld [vmem:[%s6432_s0 + $0x498] sm:$0xff]  ;;  %v162_v47 = vld [vmem:[%s6432_s0 + $0x4a0] sm:$0xff]  ;;  %v35_v48 = vld [vmem:[%s6432_s0 + $0xa8] sm:$0xff] }
  0x11   :  { %3448 = vmatprep.mubr.msk.f32.mxu0 %vm281_vm1, %v18_v14  ;;  %3640 = vmatprep.mubr.msk.f32.mxu1 %vm281_vm1, %v146_v15  ;;  %v163_v49 = vld [vmem:[%s6432_s0 + $0x4a8] sm:$0xff]  ;;  %v36_v50 = vld [vmem:[%s6432_s0 + $0xb0] sm:$0xff]  ;;  %v37_v52 = vld [vmem:[%s6432_s0 + $0xb8] sm:$0xff] }
  0x12   :  { %v164_v51 = vld [vmem:[%s6432_s0 + $0x4b0] sm:$0xff]  ;;  %v165_v53 = vld [vmem:[%s6432_s0 + $0x4b8] sm:$0xff]  ;;  %v38_v54 = vld [vmem:[%s6432_s0 + $0xc0] sm:$0xff] }
  0x13   :  { %v166_v55 = vld [vmem:[%s6432_s0 + $0x4c0] sm:$0xff]  ;;  %v39_v56 = vld [vmem:[%s6432_s0 + $0xc8] sm:$0xff]  ;;  %v40_v58 = vld [vmem:[%s6432_s0 + $0xd0] sm:$0xff] }
  0x14   :  { %3449 = vmatmul.mubr.msk.f32.gmra.mrb[4].mxu0 %vm281_vm1, %v19_v16  ;;  %3641 = vmatmul.mubr.msk.f32.gmra.mrb[4].mxu1 %vm281_vm1, %v147_v17  ;;  %v167_v57 = vld [vmem:[%s6432_s0 + $0x4c8] sm:$0xff]  ;;  %v168_v59 = vld [vmem:[%s6432_s0 + $0x4d0] sm:$0xff]  ;;  %v41_v60 = vld [vmem:[%s6432_s0 + $0xd8] sm:$0xff] }
  0x15   :  { %3451 = vmatprep.mubr.msk.f32.mxu0 %vm281_vm1, %v20_v18  ;;  %3643 = vmatprep.mubr.msk.f32.mxu1 %vm281_vm1, %v148_v19  ;;  %v169_v61 = vld [vmem:[%s6432_s0 + $0x4d8] sm:$0xff]  ;;  %v42_v62 = vld [vmem:[%s6432_s0 + $0xe0] sm:$0xff]  ;;  %v43_v0 = vld [vmem:[%s6432_s0 + $0xe8] sm:$0xff] }
  0x16   :  { %v170_v63 = vld [vmem:[%s6432_s0 + $0x4e0] sm:$0xff]  ;;  %v171_v1 = vld [vmem:[%s6432_s0 + $0x4e8] sm:$0xff]  ;;  %v44_v2 = vld [vmem:[%s6432_s0 + $0xf0] sm:$0xff] }
  0x17   :  { %v172_v3 = vld [vmem:[%s6432_s0 + $0x4f0] sm:$0xff]  ;;  %v45_v4 = vld [vmem:[%s6432_s0 + $0xf8] sm:$0xff]  ;;  %v46_v6 = vld [vmem:[%s6432_s0 + $0x100] sm:$0xff] }
  0x18   :  { %3452 = vmatmul.mubr.msk.f32.gmra.mrb[6].mxu0 %vm281_vm1, %v21_v20  ;;  %3644 = vmatmul.mubr.msk.f32.gmra.mrb[6].mxu1 %vm281_vm1, %v149_v21  ;;  %v173_v5 = vld [vmem:[%s6432_s0 + $0x4f8] sm:$0xff]  ;;  %v174_v7 = vld [vmem:[%s6432_s0 + $0x500] sm:$0xff]  ;;  %v47_v8 = vld [vmem:[%s6432_s0 + $0x108] sm:$0xff] }
  0x19   :  { %3454 = vmatprep.mubr.msk.f32.mxu0 %vm281_vm1, %v22_v22  ;;  %3646 = vmatprep.mubr.msk.f32.mxu1 %vm281_vm1, %v150_v23  ;;  %v175_v9 = vld [vmem:[%s6432_s0 + $0x508] sm:$0xff]  ;;  %v48_v10 = vld [vmem:[%s6432_s0 + $0x110] sm:$0xff]  ;;  %v49_v12 = vld [vmem:[%s6432_s0 + $0x118] sm:$0xff] }
  0x1a   :  { %v176_v11 = vld [vmem:[%s6432_s0 + $0x510] sm:$0xff]  ;;  %v177_v13 = vld [vmem:[%s6432_s0 + $0x518] sm:$0xff]  ;;  %v50_v14 = vld [vmem:[%s6432_s0 + $0x120] sm:$0xff] }
  0x1b   :  { %v178_v15 = vld [vmem:[%s6432_s0 + $0x520] sm:$0xff]  ;;  %v51_v16 = vld [vmem:[%s6432_s0 + $0x128] sm:$0xff]  ;;  %v52_v18 = vld [vmem:[%s6432_s0 + $0x130] sm:$0xff] }
  0x1c   :  { %3455 = vmatmul.mubr.msk.f32.gmra.mrb[8].mxu0 %vm281_vm1, %v23_v24  ;;  %3647 = vmatmul.mubr.msk.f32.gmra.mrb[8].mxu1 %vm281_vm1, %v151_v25  ;;  %v179_v17 = vld [vmem:[%s6432_s0 + $0x528] sm:$0xff]  ;;  %v180_v19 = vld [vmem:[%s6432_s0 + $0x530] sm:$0xff]  ;;  %v53_v20 = vld [vmem:[%s6432_s0 + $0x138] sm:$0xff] }
  0x1d   :  { %3457 = vmatprep.mubr.msk.f32.mxu0 %vm281_vm1, %v24_v26  ;;  %3649 = vmatprep.mubr.msk.f32.mxu1 %vm281_vm1, %v152_v27  ;;  %v181_v21 = vld [vmem:[%s6432_s0 + $0x538] sm:$0xff]  ;;  %v54_v22 = vld [vmem:[%s6432_s0 + $0x140] sm:$0xff]  ;;  %v55_v24 = vld [vmem:[%s6432_s0 + $0x148] sm:$0xff] }
  0x1e   :  { %v182_v23 = vld [vmem:[%s6432_s0 + $0x540] sm:$0xff]  ;;  %v183_v25 = vld [vmem:[%s6432_s0 + $0x548] sm:$0xff]  ;;  %v56_v26 = vld [vmem:[%s6432_s0 + $0x150] sm:$0xff] }
  0x1f   :  { %v184_v27 = vld [vmem:[%s6432_s0 + $0x550] sm:$0xff] }
  0x20   :  { %3458 = vmatmul.mubr.msk.f32.gmra.mrb[10].mxu0 %vm281_vm1, %v25_v28  ;;  %3650 = vmatmul.mubr.msk.f32.gmra.mrb[10].mxu1 %vm281_vm1, %v153_v29  ;;  %v57_v28 = vld [vmem:[%s6432_s0 + $0x158] sm:$0xff] }
  0x21   :  { %3460 = vmatprep.mubr.msk.f32.mxu0 %vm281_vm1, %v26_v30  ;;  %3652 = vmatprep.mubr.msk.f32.mxu1 %vm281_vm1, %v154_v31  ;;  %v185_v29 = vld [vmem:[%s6432_s0 + $0x558] sm:$0xff]  ;;  %v58_v30 = vld [vmem:[%s6432_s0 + $0x160] sm:$0xff] }
  0x22   :  { %v186_v31 = vld [vmem:[%s6432_s0 + $0x560] sm:$0xff] }
  0x24   :  { %3461 = vmatmul.mubr.msk.f32.gmra.mrb[12].mxu0 %vm281_vm1, %v27_v32  ;;  %3653 = vmatmul.mubr.msk.f32.gmra.mrb[12].mxu1 %vm281_vm1, %v155_v33  ;;  %v59_v32 = vld [vmem:[%s6432_s0 + $0x168] sm:$0xff] }
  0x25   :  { %3463 = vmatprep.mubr.msk.f32.mxu0 %vm281_vm1, %v28_v34  ;;  %3655 = vmatprep.mubr.msk.f32.mxu1 %vm281_vm1, %v156_v35  ;;  %v187_v33 = vld [vmem:[%s6432_s0 + $0x568] sm:$0xff]  ;;  %v60_v34 = vld [vmem:[%s6432_s0 + $0x170] sm:$0xff] }
  0x26   :  { %v188_v35 = vld [vmem:[%s6432_s0 + $0x570] sm:$0xff] }
  0x28   :  { %3464 = vmatmul.mubr.msk.f32.gmra.mrb[14].mxu0 %vm281_vm1, %v29_v36  ;;  %3656 = vmatmul.mubr.msk.f32.gmra.mrb[14].mxu1 %vm281_vm1, %v157_v37  ;;  %v61_v36 = vld [vmem:[%s6432_s0 + $0x178] sm:$0xff] }
  0x29   :  { %3466 = vmatprep.mubr.msk.f32.mxu0 %vm281_vm1, %v30_v38  ;;  %3658 = vmatprep.mubr.msk.f32.mxu1 %vm281_vm1, %v158_v39  ;;  %v189_v37 = vld [vmem:[%s6432_s0 + $0x578] sm:$0xff]  ;;  %v62_v38 = vld [vmem:[%s6432_s0 + $0x180] sm:$0xff] }
  0x2a   :  { %v190_v39 = vld [vmem:[%s6432_s0 + $0x580] sm:$0xff] }
  0x2c   :  { %3467 = vmatmul.mubr.msk.f32.gmra.mrb[16].mxu0 %vm281_vm1, %v31_v40  ;;  %3659 = vmatmul.mubr.msk.f32.gmra.mrb[16].mxu1 %vm281_vm1, %v159_v41  ;;  %v63_v40 = vld [vmem:[%s6432_s0 + $0x188] sm:$0xff] }
  0x2d   :  { %3469 = vmatprep.mubr.msk.f32.mxu0 %vm281_vm1, %v32_v42  ;;  %3661 = vmatprep.mubr.msk.f32.mxu1 %vm281_vm1, %v160_v43  ;;  %v191_v41 = vld [vmem:[%s6432_s0 + $0x588] sm:$0xff]  ;;  %v64_v42 = vld [vmem:[%s6432_s0 + $0x190] sm:$0xff] }
  0x2e   :  { %v192_v43 = vld [vmem:[%s6432_s0 + $0x590] sm:$0xff] }
  0x30   :  { %3470 = vmatmul.mubr.msk.f32.gmra.mrb[18].mxu0 %vm281_vm1, %v33_v44  ;;  %3662 = vmatmul.mubr.msk.f32.gmra.mrb[18].mxu1 %vm281_vm1, %v161_v45  ;;  %v65_v44 = vld [vmem:[%s6432_s0 + $0x198] sm:$0xff] }
  0x31   :  { %3472 = vmatprep.mubr.msk.f32.mxu0 %vm281_vm1, %v34_v46  ;;  %3664 = vmatprep.mubr.msk.f32.mxu1 %vm281_vm1, %v162_v47  ;;  %v193_v45 = vld [vmem:[%s6432_s0 + $0x598] sm:$0xff]  ;;  %v66_v46 = vld [vmem:[%s6432_s0 + $0x1a0] sm:$0xff] }
  0x32   :  { %v194_v47 = vld [vmem:[%s6432_s0 + $0x5a0] sm:$0xff] }
  0x34   :  { %3473 = vmatmul.mubr.msk.f32.gmra.mrb[20].mxu0 %vm281_vm1, %v35_v48  ;;  %3665 = vmatmul.mubr.msk.f32.gmra.mrb[20].mxu1 %vm281_vm1, %v163_v49  ;;  %v67_v48 = vld [vmem:[%s6432_s0 + $0x1a8] sm:$0xff] }
  0x35   :  { %3475 = vmatprep.mubr.msk.f32.mxu0 %vm281_vm1, %v36_v50  ;;  %3667 = vmatprep.mubr.msk.f32.mxu1 %vm281_vm1, %v164_v51  ;;  %v195_v49 = vld [vmem:[%s6432_s0 + $0x5a8] sm:$0xff]  ;;  %v68_v50 = vld [vmem:[%s6432_s0 + $0x1b0] sm:$0xff] }
  0x36   :  { %v196_v51 = vld [vmem:[%s6432_s0 + $0x5b0] sm:$0xff] }
  0x38   :  { %3476 = vmatmul.mubr.msk.f32.gmra.mrb[22].mxu0 %vm281_vm1, %v37_v52  ;;  %3668 = vmatmul.mubr.msk.f32.gmra.mrb[22].mxu1 %vm281_vm1, %v165_v53  ;;  %v69_v52 = vld [vmem:[%s6432_s0 + $0x1b8] sm:$0xff] }
  0x39   :  { %3478 = vmatprep.mubr.msk.f32.mxu0 %vm281_vm1, %v38_v54  ;;  %3670 = vmatprep.mubr.msk.f32.mxu1 %vm281_vm1, %v166_v55  ;;  %v197_v53 = vld [vmem:[%s6432_s0 + $0x5b8] sm:$0xff]  ;;  %v70_v54 = vld [vmem:[%s6432_s0 + $0x1c0] sm:$0xff] }
  0x3a   :  { %v198_v55 = vld [vmem:[%s6432_s0 + $0x5c0] sm:$0xff] }
  0x3c   :  { %3479 = vmatmul.mubr.msk.f32.gmra.mrb[24].mxu0 %vm281_vm1, %v39_v56  ;;  %3671 = vmatmul.mubr.msk.f32.gmra.mrb[24].mxu1 %vm281_vm1, %v167_v57  ;;  %v71_v56 = vld [vmem:[%s6432_s0 + $0x1c8] sm:$0xff] }
  0x3d   :  { %3481 = vmatprep.mubr.msk.f32.mxu0 %vm281_vm1, %v40_v58  ;;  %3673 = vmatprep.mubr.msk.f32.mxu1 %vm281_vm1, %v168_v59  ;;  %v199_v57 = vld [vmem:[%s6432_s0 + $0x5c8] sm:$0xff]  ;;  %v72_v58 = vld [vmem:[%s6432_s0 + $0x1d0] sm:$0xff] }
  0x3e   :  { %v200_v59 = vld [vmem:[%s6432_s0 + $0x5d0] sm:$0xff] }
  0x40   :  { %3482 = vmatmul.mubr.msk.f32.gmra.mrb[26].mxu0 %vm281_vm1, %v41_v60  ;;  %3674 = vmatmul.mubr.msk.f32.gmra.mrb[26].mxu1 %vm281_vm1, %v169_v61  ;;  %v73_v60 = vld [vmem:[%s6432_s0 + $0x1d8] sm:$0xff] }
  0x41   :  { %3484 = vmatprep.mubr.msk.f32.mxu0 %vm281_vm1, %v42_v62  ;;  %3676 = vmatprep.mubr.msk.f32.mxu1 %vm281_vm1, %v170_v63  ;;  %v201_v61 = vld [vmem:[%s6432_s0 + $0x5d8] sm:$0xff]  ;;  %v74_v62 = vld [vmem:[%s6432_s0 + $0x1e0] sm:$0xff] }
  0x42   :  { %v202_v63 = vld [vmem:[%s6432_s0 + $0x5e0] sm:$0xff] }
  0x44   :  { %3485 = vmatmul.mubr.msk.f32.gmra.mrb[28].mxu0 %vm281_vm1, %v43_v0  ;;  %3677 = vmatmul.mubr.msk.f32.gmra.mrb[28].mxu1 %vm281_vm1, %v171_v1  ;;  %v75_v0 = vld [vmem:[%s6432_s0 + $0x1e8] sm:$0xff] }
  0x45   :  { %3487 = vmatprep.mubr.msk.f32.mxu0 %vm281_vm1, %v44_v2  ;;  %3679 = vmatprep.mubr.msk.f32.mxu1 %vm281_vm1, %v172_v3  ;;  %v203_v1 = vld [vmem:[%s6432_s0 + $0x5e8] sm:$0xff]  ;;  %v76_v2 = vld [vmem:[%s6432_s0 + $0x1f0] sm:$0xff] }
  0x46   :  { %v204_v3 = vld [vmem:[%s6432_s0 + $0x5f0] sm:$0xff] }
  0x48   :  { %3488 = vmatmul.mubr.msk.f32.gmra.mrb[30].mxu0 %vm281_vm1, %v45_v4  ;;  %3680 = vmatmul.mubr.msk.f32.gmra.mrb[30].mxu1 %vm281_vm1, %v173_v5  ;;  %v77_v4 = vld [vmem:[%s6432_s0 + $0x1f8] sm:$0xff] }
  0x49   :  { %3490 = vmatprep.mubr.msk.f32.mxu0 %vm281_vm1, %v46_v6  ;;  %3682 = vmatprep.mubr.msk.f32.mxu1 %vm281_vm1, %v174_v7  ;;  %v205_v5 = vld [vmem:[%s6432_s0 + $0x5f8] sm:$0xff]  ;;  %v78_v6 = vld [vmem:[%s6432_s0 + $0x200] sm:$0xff] }
  0x4a   :  { %v206_v7 = vld [vmem:[%s6432_s0 + $0x600] sm:$0xff] }
  0x4c   :  { %3491 = vmatmul.mubr.msk.f32.gmra.mrb[32].mxu0 %vm281_vm1, %v47_v8  ;;  %3683 = vmatmul.mubr.msk.f32.gmra.mrb[32].mxu1 %vm281_vm1, %v175_v9  ;;  %v79_v8 = vld [vmem:[%s6432_s0 + $0x208] sm:$0xff] }
  0x4d   :  { %3493 = vmatprep.mubr.msk.f32.mxu0 %vm281_vm1, %v48_v10  ;;  %3685 = vmatprep.mubr.msk.f32.mxu1 %vm281_vm1, %v176_v11  ;;  %v207_v9 = vld [vmem:[%s6432_s0 + $0x608] sm:$0xff]  ;;  %v80_v10 = vld [vmem:[%s6432_s0 + $0x210] sm:$0xff] }
  0x4e   :  { %v208_v11 = vld [vmem:[%s6432_s0 + $0x610] sm:$0xff] }
  0x50   :  { %3494 = vmatmul.mubr.msk.f32.gmra.mrb[34].mxu0 %vm281_vm1, %v49_v12  ;;  %3686 = vmatmul.mubr.msk.f32.gmra.mrb[34].mxu1 %vm281_vm1, %v177_v13  ;;  %v81_v12 = vld [vmem:[%s6432_s0 + $0x218] sm:$0xff] }
  0x51   :  { %3496 = vmatprep.mubr.msk.f32.mxu0 %vm281_vm1, %v50_v14  ;;  %3688 = vmatprep.mubr.msk.f32.mxu1 %vm281_vm1, %v178_v15  ;;  %v209_v13 = vld [vmem:[%s6432_s0 + $0x618] sm:$0xff]  ;;  %v82_v14 = vld [vmem:[%s6432_s0 + $0x220] sm:$0xff] }
  0x52   :  { %v210_v15 = vld [vmem:[%s6432_s0 + $0x620] sm:$0xff] }
  0x54   :  { %3497 = vmatmul.mubr.msk.f32.gmra.mrb[36].mxu0 %vm281_vm1, %v51_v16  ;;  %3689 = vmatmul.mubr.msk.f32.gmra.mrb[36].mxu1 %vm281_vm1, %v179_v17  ;;  %v83_v16 = vld [vmem:[%s6432_s0 + $0x228] sm:$0xff] }
  0x55   :  { %3499 = vmatprep.mubr.msk.f32.mxu0 %vm281_vm1, %v52_v18  ;;  %3691 = vmatprep.mubr.msk.f32.mxu1 %vm281_vm1, %v180_v19  ;;  %v211_v17 = vld [vmem:[%s6432_s0 + $0x628] sm:$0xff]  ;;  %v84_v18 = vld [vmem:[%s6432_s0 + $0x230] sm:$0xff] }
  0x56   :  { %v212_v19 = vld [vmem:[%s6432_s0 + $0x630] sm:$0xff] }
  0x58   :  { %3500 = vmatmul.mubr.msk.f32.gmra.mrb[38].mxu0 %vm281_vm1, %v53_v20  ;;  %3692 = vmatmul.mubr.msk.f32.gmra.mrb[38].mxu1 %vm281_vm1, %v181_v21  ;;  %v85_v20 = vld [vmem:[%s6432_s0 + $0x238] sm:$0xff] }
  0x59   :  { %3502 = vmatprep.mubr.msk.f32.mxu0 %vm281_vm1, %v54_v22  ;;  %3694 = vmatprep.mubr.msk.f32.mxu1 %vm281_vm1, %v182_v23  ;;  %v213_v21 = vld [vmem:[%s6432_s0 + $0x638] sm:$0xff]  ;;  %v86_v22 = vld [vmem:[%s6432_s0 + $0x240] sm:$0xff] }
  0x5a   :  { %v214_v23 = vld [vmem:[%s6432_s0 + $0x640] sm:$0xff] }
  0x5c   :  { %3503 = vmatmul.mubr.msk.f32.gmra.mrb[40].mxu0 %vm281_vm1, %v55_v24  ;;  %3695 = vmatmul.mubr.msk.f32.gmra.mrb[40].mxu1 %vm281_vm1, %v183_v25  ;;  %v87_v24 = vld [vmem:[%s6432_s0 + $0x248] sm:$0xff] }
  0x5d   :  { %3505 = vmatprep.mubr.msk.f32.mxu0 %vm281_vm1, %v56_v26  ;;  %3697 = vmatprep.mubr.msk.f32.mxu1 %vm281_vm1, %v184_v27  ;;  %v215_v25 = vld [vmem:[%s6432_s0 + $0x648] sm:$0xff]  ;;  %v88_v26 = vld [vmem:[%s6432_s0 + $0x250] sm:$0xff] }
  0x5e   :  { %v216_v27 = vld [vmem:[%s6432_s0 + $0x650] sm:$0xff] }
  0x60   :  { %3506 = vmatmul.mubr.msk.f32.gmra.mrb[42].mxu0 %vm281_vm1, %v57_v28  ;;  %3698 = vmatmul.mubr.msk.f32.gmra.mrb[42].mxu1 %vm281_vm1, %v185_v29  ;;  %v89_v28 = vld [vmem:[%s6432_s0 + $0x258] sm:$0xff] }
  0x61   :  { %3508 = vmatprep.mubr.msk.f32.mxu0 %vm281_vm1, %v58_v30  ;;  %3700 = vmatprep.mubr.msk.f32.mxu1 %vm281_vm1, %v186_v31  ;;  %v217_v29 = vld [vmem:[%s6432_s0 + $0x658] sm:$0xff]  ;;  %v90_v30 = vld [vmem:[%s6432_s0 + $0x260] sm:$0xff] }
  0x62   :  { %v218_v31 = vld [vmem:[%s6432_s0 + $0x660] sm:$0xff] }
  0x64   :  { %3509 = vmatmul.mubr.msk.f32.gmra.mrb[44].mxu0 %vm281_vm1, %v59_v32  ;;  %3701 = vmatmul.mubr.msk.f32.gmra.mrb[44].mxu1 %vm281_vm1, %v187_v33  ;;  %v91_v32 = vld [vmem:[%s6432_s0 + $0x268] sm:$0xff] }
  0x65   :  { %3511 = vmatprep.mubr.msk.f32.mxu0 %vm281_vm1, %v60_v34  ;;  %3703 = vmatprep.mubr.msk.f32.mxu1 %vm281_vm1, %v188_v35  ;;  %v219_v33 = vld [vmem:[%s6432_s0 + $0x668] sm:$0xff]  ;;  %v92_v34 = vld [vmem:[%s6432_s0 + $0x270] sm:$0xff] }
  0x66   :  { %v220_v35 = vld [vmem:[%s6432_s0 + $0x670] sm:$0xff] }
  0x68   :  { %3512 = vmatmul.mubr.msk.f32.gmra.mrb[46].mxu0 %vm281_vm1, %v61_v36  ;;  %3704 = vmatmul.mubr.msk.f32.gmra.mrb[46].mxu1 %vm281_vm1, %v189_v37  ;;  %v93_v36 = vld [vmem:[%s6432_s0 + $0x278] sm:$0xff] }
  0x69   :  { %3514 = vmatprep.mubr.msk.f32.mxu0 %vm281_vm1, %v62_v38  ;;  %3706 = vmatprep.mubr.msk.f32.mxu1 %vm281_vm1, %v190_v39  ;;  %v221_v37 = vld [vmem:[%s6432_s0 + $0x678] sm:$0xff]  ;;  %v94_v38 = vld [vmem:[%s6432_s0 + $0x280] sm:$0xff] }
  0x6a   :  { %v222_v39 = vld [vmem:[%s6432_s0 + $0x680] sm:$0xff] }
  0x6c   :  { %3515 = vmatmul.mubr.msk.f32.gmra.mrb[48].mxu0 %vm281_vm1, %v63_v40  ;;  %3707 = vmatmul.mubr.msk.f32.gmra.mrb[48].mxu1 %vm281_vm1, %v191_v41  ;;  %v95_v40 = vld [vmem:[%s6432_s0 + $0x288] sm:$0xff] }
  0x6d   :  { %3517 = vmatprep.mubr.msk.f32.mxu0 %vm281_vm1, %v64_v42  ;;  %3709 = vmatprep.mubr.msk.f32.mxu1 %vm281_vm1, %v192_v43  ;;  %v223_v41 = vld [vmem:[%s6432_s0 + $0x688] sm:$0xff]  ;;  %v96_v42 = vld [vmem:[%s6432_s0 + $0x290] sm:$0xff] }
  0x6e   :  { %v224_v43 = vld [vmem:[%s6432_s0 + $0x690] sm:$0xff] }
  0x70   :  { %3518 = vmatmul.mubr.msk.f32.gmra.mrb[50].mxu0 %vm281_vm1, %v65_v44  ;;  %3710 = vmatmul.mubr.msk.f32.gmra.mrb[50].mxu1 %vm281_vm1, %v193_v45  ;;  %v97_v44 = vld [vmem:[%s6432_s0 + $0x298] sm:$0xff] }
  0x71   :  { %3520 = vmatprep.mubr.msk.f32.mxu0 %vm281_vm1, %v66_v46  ;;  %3712 = vmatprep.mubr.msk.f32.mxu1 %vm281_vm1, %v194_v47  ;;  %v225_v45 = vld [vmem:[%s6432_s0 + $0x698] sm:$0xff]  ;;  %v98_v46 = vld [vmem:[%s6432_s0 + $0x2a0] sm:$0xff] }
  0x72   :  { %v226_v47 = vld [vmem:[%s6432_s0 + $0x6a0] sm:$0xff] }
  0x74   :  { %3521 = vmatmul.mubr.msk.f32.gmra.mrb[52].mxu0 %vm281_vm1, %v67_v48  ;;  %3713 = vmatmul.mubr.msk.f32.gmra.mrb[52].mxu1 %vm281_vm1, %v195_v49  ;;  %v99_v48 = vld [vmem:[%s6432_s0 + $0x2a8] sm:$0xff] }
  0x75   :  { %3523 = vmatprep.mubr.msk.f32.mxu0 %vm281_vm1, %v68_v50  ;;  %3715 = vmatprep.mubr.msk.f32.mxu1 %vm281_vm1, %v196_v51  ;;  %v227_v49 = vld [vmem:[%s6432_s0 + $0x6a8] sm:$0xff]  ;;  %v100_v50 = vld [vmem:[%s6432_s0 + $0x2b0] sm:$0xff] }
  0x76   :  { %v228_v51 = vld [vmem:[%s6432_s0 + $0x6b0] sm:$0xff] }
  0x78   :  { %3524 = vmatmul.mubr.msk.f32.gmra.mrb[54].mxu0 %vm281_vm1, %v69_v52  ;;  %3716 = vmatmul.mubr.msk.f32.gmra.mrb[54].mxu1 %vm281_vm1, %v197_v53  ;;  %v101_v52 = vld [vmem:[%s6432_s0 + $0x2b8] sm:$0xff] }
  0x79   :  { %3526 = vmatprep.mubr.msk.f32.mxu0 %vm281_vm1, %v70_v54  ;;  %3718 = vmatprep.mubr.msk.f32.mxu1 %vm281_vm1, %v198_v55  ;;  %v229_v53 = vld [vmem:[%s6432_s0 + $0x6b8] sm:$0xff]  ;;  %v102_v54 = vld [vmem:[%s6432_s0 + $0x2c0] sm:$0xff] }
  0x7a   :  { %v230_v55 = vld [vmem:[%s6432_s0 + $0x6c0] sm:$0xff] }
  0x7c   :  { %3527 = vmatmul.mubr.msk.f32.gmra.mrb[56].mxu0 %vm281_vm1, %v71_v56  ;;  %3719 = vmatmul.mubr.msk.f32.gmra.mrb[56].mxu1 %vm281_vm1, %v199_v57  ;;  %v103_v56 = vld [vmem:[%s6432_s0 + $0x2c8] sm:$0xff] }
  0x7d   :  { %3529 = vmatprep.mubr.msk.f32.mxu0 %vm281_vm1, %v72_v58  ;;  %3721 = vmatprep.mubr.msk.f32.mxu1 %vm281_vm1, %v200_v59  ;;  %v231_v57 = vld [vmem:[%s6432_s0 + $0x6c8] sm:$0xff]  ;;  %v104_v58 = vld [vmem:[%s6432_s0 + $0x2d0] sm:$0xff] }
  0x7e   :  { %v232_v59 = vld [vmem:[%s6432_s0 + $0x6d0] sm:$0xff] }
  0x80   :  { %3530 = vmatmul.mubr.msk.f32.gmra.mrb[58].mxu0 %vm281_vm1, %v73_v60  ;;  %3722 = vmatmul.mubr.msk.f32.gmra.mrb[58].mxu1 %vm281_vm1, %v201_v61  ;;  %v105_v60 = vld [vmem:[%s6432_s0 + $0x2d8] sm:$0xff] }
  0x81   :  { %3532 = vmatprep.mubr.msk.f32.mxu0 %vm281_vm1, %v74_v62  ;;  %3724 = vmatprep.mubr.msk.f32.mxu1 %vm281_vm1, %v202_v63  ;;  %v233_v61 = vld [vmem:[%s6432_s0 + $0x6d8] sm:$0xff]  ;;  %v106_v62 = vld [vmem:[%s6432_s0 + $0x2e0] sm:$0xff] }
  0x82   :  { %v234_v63 = vld [vmem:[%s6432_s0 + $0x6e0] sm:$0xff] }
  0x84   :  { %3533 = vmatmul.mubr.msk.f32.gmra.mrb[60].mxu0 %vm281_vm1, %v75_v0  ;;  %3725 = vmatmul.mubr.msk.f32.gmra.mrb[60].mxu1 %vm281_vm1, %v203_v1  ;;  %v107_v0 = vld [vmem:[%s6432_s0 + $0x2e8] sm:$0xff] }
  0x85   :  { %3535 = vmatprep.mubr.msk.f32.mxu0 %vm281_vm1, %v76_v2  ;;  %3727 = vmatprep.mubr.msk.f32.mxu1 %vm281_vm1, %v204_v3  ;;  %v235_v1 = vld [vmem:[%s6432_s0 + $0x6e8] sm:$0xff]  ;;  %v108_v2 = vld [vmem:[%s6432_s0 + $0x2f0] sm:$0xff] }
  0x86   :  { %v236_v3 = vld [vmem:[%s6432_s0 + $0x6f0] sm:$0xff] }
  0x88   :  { %3536 = vmatmul.mubr.msk.f32.gmra.mrb[62].mxu0 %vm281_vm1, %v77_v4  ;;  %3728 = vmatmul.mubr.msk.f32.gmra.mrb[62].mxu1 %vm281_vm1, %v205_v5  ;;  %v109_v4 = vld [vmem:[%s6432_s0 + $0x2f8] sm:$0xff] }
  0x89   :  { %3538 = vmatprep.mubr.msk.f32.mxu0 %vm281_vm1, %v78_v6  ;;  %3730 = vmatprep.mubr.msk.f32.mxu1 %vm281_vm1, %v206_v7  ;;  %v237_v5 = vld [vmem:[%s6432_s0 + $0x6f8] sm:$0xff]  ;;  %v110_v6 = vld [vmem:[%s6432_s0 + $0x300] sm:$0xff] }
  0x8a   :  { %v238_v7 = vld [vmem:[%s6432_s0 + $0x700] sm:$0xff] }
  0x8c   :  { %3539 = vmatmul.mubr.msk.f32.gmra.mrb[64].mxu0 %vm281_vm1, %v79_v8  ;;  %3731 = vmatmul.mubr.msk.f32.gmra.mrb[64].mxu1 %vm281_vm1, %v207_v9  ;;  %v111_v8 = vld [vmem:[%s6432_s0 + $0x308] sm:$0xff] }
  0x8d   :  { %3541 = vmatprep.mubr.msk.f32.mxu0 %vm281_vm1, %v80_v10  ;;  %3733 = vmatprep.mubr.msk.f32.mxu1 %vm281_vm1, %v208_v11  ;;  %v239_v9 = vld [vmem:[%s6432_s0 + $0x708] sm:$0xff]  ;;  %v112_v10 = vld [vmem:[%s6432_s0 + $0x310] sm:$0xff] }
  0x8e   :  { %v240_v11 = vld [vmem:[%s6432_s0 + $0x710] sm:$0xff] }
  0x90   :  { %3542 = vmatmul.mubr.msk.f32.gmra.mrb[66].mxu0 %vm281_vm1, %v81_v12  ;;  %3734 = vmatmul.mubr.msk.f32.gmra.mrb[66].mxu1 %vm281_vm1, %v209_v13  ;;  %v113_v12 = vld [vmem:[%s6432_s0 + $0x318] sm:$0xff] }
  0x91   :  { %3544 = vmatprep.mubr.msk.f32.mxu0 %vm281_vm1, %v82_v14  ;;  %3736 = vmatprep.mubr.msk.f32.mxu1 %vm281_vm1, %v210_v15  ;;  %v241_v13 = vld [vmem:[%s6432_s0 + $0x718] sm:$0xff]  ;;  %v114_v14 = vld [vmem:[%s6432_s0 + $0x320] sm:$0xff] }
  0x92   :  { %v242_v15 = vld [vmem:[%s6432_s0 + $0x720] sm:$0xff] }
  0x94   :  { %3545 = vmatmul.mubr.msk.f32.gmra.mrb[68].mxu0 %vm281_vm1, %v83_v16  ;;  %3737 = vmatmul.mubr.msk.f32.gmra.mrb[68].mxu1 %vm281_vm1, %v211_v17  ;;  %v115_v16 = vld [vmem:[%s6432_s0 + $0x328] sm:$0xff] }
  0x95   :  { %3547 = vmatprep.mubr.msk.f32.mxu0 %vm281_vm1, %v84_v18  ;;  %3739 = vmatprep.mubr.msk.f32.mxu1 %vm281_vm1, %v212_v19  ;;  %v243_v17 = vld [vmem:[%s6432_s0 + $0x728] sm:$0xff]  ;;  %v116_v18 = vld [vmem:[%s6432_s0 + $0x330] sm:$0xff] }
  0x96   :  { %v244_v19 = vld [vmem:[%s6432_s0 + $0x730] sm:$0xff] }
  0x98   :  { %3548 = vmatmul.mubr.msk.f32.gmra.mrb[70].mxu0 %vm281_vm1, %v85_v20  ;;  %3740 = vmatmul.mubr.msk.f32.gmra.mrb[70].mxu1 %vm281_vm1, %v213_v21  ;;  %v117_v20 = vld [vmem:[%s6432_s0 + $0x338] sm:$0xff] }
  0x99   :  { %3550 = vmatprep.mubr.msk.f32.mxu0 %vm281_vm1, %v86_v22  ;;  %3742 = vmatprep.mubr.msk.f32.mxu1 %vm281_vm1, %v214_v23  ;;  %v245_v21 = vld [vmem:[%s6432_s0 + $0x738] sm:$0xff]  ;;  %v118_v22 = vld [vmem:[%s6432_s0 + $0x340] sm:$0xff] }
  0x9a   :  { %v246_v23 = vld [vmem:[%s6432_s0 + $0x740] sm:$0xff] }
  0x9c   :  { %3551 = vmatmul.mubr.msk.f32.gmra.mrb[72].mxu0 %vm281_vm1, %v87_v24  ;;  %3743 = vmatmul.mubr.msk.f32.gmra.mrb[72].mxu1 %vm281_vm1, %v215_v25  ;;  %v119_v24 = vld [vmem:[%s6432_s0 + $0x348] sm:$0xff] }
  0x9d   :  { %3553 = vmatprep.mubr.msk.f32.mxu0 %vm281_vm1, %v88_v26  ;;  %3745 = vmatprep.mubr.msk.f32.mxu1 %vm281_vm1, %v216_v27  ;;  %v247_v25 = vld [vmem:[%s6432_s0 + $0x748] sm:$0xff]  ;;  %v120_v26 = vld [vmem:[%s6432_s0 + $0x350] sm:$0xff] }
  0x9e   :  { %v248_v27 = vld [vmem:[%s6432_s0 + $0x750] sm:$0xff] }
  0xa0   :  { %3554 = vmatmul.mubr.msk.f32.gmra.mrb[74].mxu0 %vm281_vm1, %v89_v28  ;;  %3746 = vmatmul.mubr.msk.f32.gmra.mrb[74].mxu1 %vm281_vm1, %v217_v29  ;;  %v121_v28 = vld [vmem:[%s6432_s0 + $0x358] sm:$0xff] }
  0xa1   :  { %3556 = vmatprep.mubr.msk.f32.mxu0 %vm281_vm1, %v90_v30  ;;  %3748 = vmatprep.mubr.msk.f32.mxu1 %vm281_vm1, %v218_v31  ;;  %v249_v29 = vld [vmem:[%s6432_s0 + $0x758] sm:$0xff]  ;;  %v122_v30 = vld [vmem:[%s6432_s0 + $0x360] sm:$0xff] }
  0xa2   :  { %v250_v31 = vld [vmem:[%s6432_s0 + $0x760] sm:$0xff] }
  0xa4   :  { %3557 = vmatmul.mubr.msk.f32.gmra.mrb[76].mxu0 %vm281_vm1, %v91_v32  ;;  %3749 = vmatmul.mubr.msk.f32.gmra.mrb[76].mxu1 %vm281_vm1, %v219_v33 }
  0xa5   :  { %3559 = vmatprep.mubr.msk.f32.mxu0 %vm281_vm1, %v92_v34  ;;  %3751 = vmatprep.mubr.msk.f32.mxu1 %vm281_vm1, %v220_v35 }
  0xa8   :  { %3560 = vmatmul.mubr.msk.f32.gmra.mrb[78].mxu0 %vm281_vm1, %v93_v36  ;;  %3752 = vmatmul.mubr.msk.f32.gmra.mrb[78].mxu1 %vm281_vm1, %v221_v37  ;;  %v123_v36 = vld [vmem:[%s6432_s0 + $0x368] sm:$0xff] }
  0xa9   :  { %3562 = vmatprep.mubr.msk.f32.mxu0 %vm281_vm1, %v94_v38  ;;  %3754 = vmatprep.mubr.msk.f32.mxu1 %vm281_vm1, %v222_v39  ;;  %v251_v37 = vld [vmem:[%s6432_s0 + $0x768] sm:$0xff]  ;;  %v124_v38 = vld [vmem:[%s6432_s0 + $0x370] sm:$0xff] }
  0xaa   :  { %v252_v39 = vld [vmem:[%s6432_s0 + $0x770] sm:$0xff] }
  0xac   :  { %3563 = vmatmul.mubr.msk.f32.gmra.mrb[80].mxu0 %vm281_vm1, %v95_v40  ;;  %3755 = vmatmul.mubr.msk.f32.gmra.mrb[80].mxu1 %vm281_vm1, %v223_v41 }
  0xad   :  { %3565 = vmatprep.mubr.msk.f32.mxu0 %vm281_vm1, %v96_v42  ;;  %3757 = vmatprep.mubr.msk.f32.mxu1 %vm281_vm1, %v224_v43 }
  0xb0   :  { %3566 = vmatmul.mubr.msk.f32.gmra.mrb[82].mxu0 %vm281_vm1, %v97_v44  ;;  %3758 = vmatmul.mubr.msk.f32.gmra.mrb[82].mxu1 %vm281_vm1, %v225_v45  ;;  %v125_v44 = vld [vmem:[%s6432_s0 + $0x378] sm:$0xff] }
  0xb1   :  { %3568 = vmatprep.mubr.msk.f32.mxu0 %vm281_vm1, %v98_v46  ;;  %3760 = vmatprep.mubr.msk.f32.mxu1 %vm281_vm1, %v226_v47  ;;  %v253_v45 = vld [vmem:[%s6432_s0 + $0x778] sm:$0xff]  ;;  %v126_v46 = vld [vmem:[%s6432_s0 + $0x380] sm:$0xff] }
  0xb2   :  { %v254_v47 = vld [vmem:[%s6432_s0 + $0x780] sm:$0xff] }
  0xb4   :  { %3569 = vmatmul.mubr.msk.f32.gmra.mrb[84].mxu0 %vm281_vm1, %v99_v48  ;;  %3761 = vmatmul.mubr.msk.f32.gmra.mrb[84].mxu1 %vm281_vm1, %v227_v49 }
  0xb5   :  { %3571 = vmatprep.mubr.msk.f32.mxu0 %vm281_vm1, %v100_v50  ;;  %3763 = vmatprep.mubr.msk.f32.mxu1 %vm281_vm1, %v228_v51 }
  0xb8   :  { %3572 = vmatmul.mubr.msk.f32.gmra.mrb[86].mxu0 %vm281_vm1, %v101_v52  ;;  %3764 = vmatmul.mubr.msk.f32.gmra.mrb[86].mxu1 %vm281_vm1, %v229_v53  ;;  %v127_v52 = vld [vmem:[%s6432_s0 + $0x388] sm:$0xff] }
  0xb9   :  { %3574 = vmatprep.mubr.msk.f32.mxu0 %vm281_vm1, %v102_v54  ;;  %3766 = vmatprep.mubr.msk.f32.mxu1 %vm281_vm1, %v230_v55  ;;  %v255_v53 = vld [vmem:[%s6432_s0 + $0x788] sm:$0xff]  ;;  %v128_v54 = vld [vmem:[%s6432_s0 + $0x390] sm:$0xff] }
  0xba   :  { %v256_v55 = vld [vmem:[%s6432_s0 + $0x790] sm:$0xff] }
  0xbc   :  { %3575 = vmatmul.mubr.msk.f32.gmra.mrb[88].mxu0 %vm281_vm1, %v103_v56  ;;  %3767 = vmatmul.mubr.msk.f32.gmra.mrb[88].mxu1 %vm281_vm1, %v231_v57 }
  0xbd   :  { %3577 = vmatprep.mubr.msk.f32.mxu0 %vm281_vm1, %v104_v58  ;;  %3769 = vmatprep.mubr.msk.f32.mxu1 %vm281_vm1, %v232_v59 }
  0xc0   :  { %3578 = vmatmul.mubr.msk.f32.gmra.mrb[90].mxu0 %vm281_vm1, %v105_v60  ;;  %3770 = vmatmul.mubr.msk.f32.gmra.mrb[90].mxu1 %vm281_vm1, %v233_v61  ;;  %v129_v60 = vld [vmem:[%s6432_s0 + $0x398] sm:$0xff] }
  0xc1   :  { %3580 = vmatprep.mubr.msk.f32.mxu0 %vm281_vm1, %v106_v62  ;;  %3772 = vmatprep.mubr.msk.f32.mxu1 %vm281_vm1, %v234_v63  ;;  %v257_v61 = vld [vmem:[%s6432_s0 + $0x798] sm:$0xff]  ;;  %v130_v62 = vld [vmem:[%s6432_s0 + $0x3a0] sm:$0xff] }
  0xc2   :  { %v258_v63 = vld [vmem:[%s6432_s0 + $0x7a0] sm:$0xff] }
  0xc4   :  { %3581 = vmatmul.mubr.msk.f32.gmra.mrb[92].mxu0 %vm281_vm1, %v107_v0  ;;  %3773 = vmatmul.mubr.msk.f32.gmra.mrb[92].mxu1 %vm281_vm1, %v235_v1 }
  0xc5   :  { %3583 = vmatprep.mubr.msk.f32.mxu0 %vm281_vm1, %v108_v2  ;;  %3775 = vmatprep.mubr.msk.f32.mxu1 %vm281_vm1, %v236_v3 }
  0xc8   :  { %3584 = vmatmul.mubr.msk.f32.gmra.mrb[94].mxu0 %vm281_vm1, %v109_v4  ;;  %3776 = vmatmul.mubr.msk.f32.gmra.mrb[94].mxu1 %vm281_vm1, %v237_v5  ;;  %v131_v4 = vld [vmem:[%s6432_s0 + $0x3a8] sm:$0xff] }
  0xc9   :  { %3586 = vmatprep.mubr.msk.f32.mxu0 %vm281_vm1, %v110_v6  ;;  %3778 = vmatprep.mubr.msk.f32.mxu1 %vm281_vm1, %v238_v7  ;;  %v259_v5 = vld [vmem:[%s6432_s0 + $0x7a8] sm:$0xff]  ;;  %v132_v6 = vld [vmem:[%s6432_s0 + $0x3b0] sm:$0xff] }
  0xca   :  { %v260_v7 = vld [vmem:[%s6432_s0 + $0x7b0] sm:$0xff] }
  0xcc   :  { %3587 = vmatmul.mubr.msk.f32.gmra.mrb[96].mxu0 %vm281_vm1, %v111_v8  ;;  %3779 = vmatmul.mubr.msk.f32.gmra.mrb[96].mxu1 %vm281_vm1, %v239_v9 }
  0xcd   :  { %3589 = vmatprep.mubr.msk.f32.mxu0 %vm281_vm1, %v112_v10  ;;  %3781 = vmatprep.mubr.msk.f32.mxu1 %vm281_vm1, %v240_v11 }
  0xd0   :  { %3590 = vmatmul.mubr.msk.f32.gmra.mrb[98].mxu0 %vm281_vm1, %v113_v12  ;;  %3782 = vmatmul.mubr.msk.f32.gmra.mrb[98].mxu1 %vm281_vm1, %v241_v13  ;;  %v133_v12 = vld [vmem:[%s6432_s0 + $0x3b8] sm:$0xff] }
  0xd1   :  { %3592 = vmatprep.mubr.msk.f32.mxu0 %vm281_vm1, %v114_v14  ;;  %3784 = vmatprep.mubr.msk.f32.mxu1 %vm281_vm1, %v242_v15  ;;  %v261_v13 = vld [vmem:[%s6432_s0 + $0x7b8] sm:$0xff]  ;;  %v134_v14 = vld [vmem:[%s6432_s0 + $0x3c0] sm:$0xff] }
  0xd2   :  { %v262_v15 = vld [vmem:[%s6432_s0 + $0x7c0] sm:$0xff] }
  0xd4   :  { %3593 = vmatmul.mubr.msk.f32.gmra.mrb[100].mxu0 %vm281_vm1, %v115_v16  ;;  %3785 = vmatmul.mubr.msk.f32.gmra.mrb[100].mxu1 %vm281_vm1, %v243_v17 }
  0xd5   :  { %3595 = vmatprep.mubr.msk.f32.mxu0 %vm281_vm1, %v116_v18  ;;  %3787 = vmatprep.mubr.msk.f32.mxu1 %vm281_vm1, %v244_v19 }
  0xd8   :  { %3596 = vmatmul.mubr.msk.f32.gmra.mrb[102].mxu0 %vm281_vm1, %v117_v20  ;;  %3788 = vmatmul.mubr.msk.f32.gmra.mrb[102].mxu1 %vm281_vm1, %v245_v21  ;;  %v135_v20 = vld [vmem:[%s6432_s0 + $0x3c8] sm:$0xff] }
  0xd9   :  { %3598 = vmatprep.mubr.msk.f32.mxu0 %vm281_vm1, %v118_v22  ;;  %3790 = vmatprep.mubr.msk.f32.mxu1 %vm281_vm1, %v246_v23  ;;  %v263_v21 = vld [vmem:[%s6432_s0 + $0x7c8] sm:$0xff]  ;;  %v136_v22 = vld [vmem:[%s6432_s0 + $0x3d0] sm:$0xff] }
  0xda   :  { %v264_v23 = vld [vmem:[%s6432_s0 + $0x7d0] sm:$0xff] }
  0xdc   :  { %3599 = vmatmul.mubr.msk.f32.gmra.mrb[104].mxu0 %vm281_vm1, %v119_v24  ;;  %3791 = vmatmul.mubr.msk.f32.gmra.mrb[104].mxu1 %vm281_vm1, %v247_v25 }
  0xdd   :  { %3601 = vmatprep.mubr.msk.f32.mxu0 %vm281_vm1, %v120_v26  ;;  %3793 = vmatprep.mubr.msk.f32.mxu1 %vm281_vm1, %v248_v27 }
  0xdf   :  { %v4743_v32 = vpop.f32.mrb[0].mxu0  ;;  %v4745_v33 = vpop.f32.mrb[0].mxu1 }
  0xe0   :  { %v4747_v34 = vpop.f32.mrb[1].mxu0  ;;  %3602 = vmatmul.mubr.msk.f32.gmra.mrb[106].mxu0 %vm281_vm1, %v121_v28  ;;  %v4750_v35 = vpop.f32.mrb[1].mxu1  ;;  %3794 = vmatmul.mubr.msk.f32.gmra.mrb[106].mxu1 %vm281_vm1, %v249_v29  ;;  %v137_v28 = vld [vmem:[%s6432_s0 + $0x3d8] sm:$0xff] }
  0xe1   :  { %3604 = vmatprep.mubr.msk.f32.mxu0 %vm281_vm1, %v122_v30  ;;  %3796 = vmatprep.mubr.msk.f32.mxu1 %vm281_vm1, %v250_v31  ;;  %v265_v29 = vld [vmem:[%s6432_s0 + $0x7d8] sm:$0xff]  ;;  %v138_v30 = vld [vmem:[%s6432_s0 + $0x3e0] sm:$0xff] }
  0xe2   :  { %v266_v31 = vld [vmem:[%s6432_s0 + $0x7e0] sm:$0xff] }
  0xe3   :  { %v4767_v40 = vpop.f32.mrb[2].mxu0  ;;  %v4769_v41 = vpop.f32.mrb[2].mxu1 }
  0xe4   :  { %v4771_v42 = vpop.f32.mrb[3].mxu0  ;;  %3605 = vmatmul.mubr.msk.f32.gmra.mrb[108].mxu0 %vm281_vm1, %v123_v36  ;;  %v4774_v43 = vpop.f32.mrb[3].mxu1  ;;  %3797 = vmatmul.mubr.msk.f32.gmra.mrb[108].mxu1 %vm281_vm1, %v251_v37 }
  0xe5   :  { %3607 = vmatprep.mubr.msk.f32.mxu0 %vm281_vm1, %v124_v38  ;;  %3799 = vmatprep.mubr.msk.f32.mxu1 %vm281_vm1, %v252_v39 }
  0xe7   :  { %v4791_v48 = vpop.f32.mrb[4].mxu0  ;;  %v4793_v49 = vpop.f32.mrb[4].mxu1 }
  0xe8   :  { %v4795_v50 = vpop.f32.mrb[5].mxu0  ;;  %3608 = vmatmul.mubr.msk.f32.gmra.mrb[110].mxu0 %vm281_vm1, %v125_v44  ;;  %v4798_v51 = vpop.f32.mrb[5].mxu1  ;;  %3800 = vmatmul.mubr.msk.f32.gmra.mrb[110].mxu1 %vm281_vm1, %v253_v45  ;;  %v139_v44 = vld [vmem:[%s6432_s0 + $0x3e8] sm:$0xff] }
  0xe9   :  { %3610 = vmatprep.mubr.msk.f32.mxu0 %vm281_vm1, %v126_v46  ;;  %3802 = vmatprep.mubr.msk.f32.mxu1 %vm281_vm1, %v254_v47  ;;  %v267_v45 = vld [vmem:[%s6432_s0 + $0x7e8] sm:$0xff]  ;;  %v140_v46 = vld [vmem:[%s6432_s0 + $0x3f0] sm:$0xff] }
  0xea   :  { %v268_v47 = vld [vmem:[%s6432_s0 + $0x7f0] sm:$0xff] }
  0xeb   :  { %v4815_v56 = vpop.f32.mrb[6].mxu0  ;;  %v4817_v57 = vpop.f32.mrb[6].mxu1 }
  0xec   :  { %v4819_v58 = vpop.f32.mrb[7].mxu0  ;;  %3611 = vmatmul.mubr.msk.f32.gmra.mrb[112].mxu0 %vm281_vm1, %v127_v52  ;;  %v4822_v59 = vpop.f32.mrb[7].mxu1  ;;  %3803 = vmatmul.mubr.msk.f32.gmra.mrb[112].mxu1 %vm281_vm1, %v255_v53 }
  0xed   :  { %3613 = vmatprep.mubr.msk.f32.mxu0 %vm281_vm1, %v128_v54  ;;  %3805 = vmatprep.mubr.msk.f32.mxu1 %vm281_vm1, %v256_v55 }
  0xef   :  { %v4839_v0 = vpop.f32.mrb[8].mxu0  ;;  %v4841_v1 = vpop.f32.mrb[8].mxu1 }
  0xf0   :  { %v4843_v2 = vpop.f32.mrb[9].mxu0  ;;  %3614 = vmatmul.mubr.msk.f32.gmra.mrb[114].mxu0 %vm281_vm1, %v129_v60  ;;  %v4846_v3 = vpop.f32.mrb[9].mxu1  ;;  %3806 = vmatmul.mubr.msk.f32.gmra.mrb[114].mxu1 %vm281_vm1, %v257_v61  ;;  %v141_v60 = vld [vmem:[%s6432_s0 + $0x3f8] sm:$0xff] }
  0xf1   :  { %3616 = vmatprep.mubr.msk.f32.mxu0 %vm281_vm1, %v130_v62  ;;  %3808 = vmatprep.mubr.msk.f32.mxu1 %vm281_vm1, %v258_v63  ;;  %v269_v61 = vld [vmem:[%s6432_s0 + $0x7f8] sm:$0xff] }
  0xf3   :  { %v4863_v8 = vpop.f32.mrb[10].mxu0  ;;  %v4865_v9 = vpop.f32.mrb[10].mxu1 }
  0xf4   :  { %v4867_v10 = vpop.f32.mrb[11].mxu0  ;;  %3617 = vmatmul.mubr.msk.f32.gmra.mrb[116].mxu0 %vm281_vm1, %v131_v4  ;;  %v4870_v11 = vpop.f32.mrb[11].mxu1  ;;  %3809 = vmatmul.mubr.msk.f32.gmra.mrb[116].mxu1 %vm281_vm1, %v259_v5 }
  0xf5   :  { %3619 = vmatprep.mubr.msk.f32.mxu0 %vm281_vm1, %v132_v6  ;;  %3811 = vmatprep.mubr.msk.f32.mxu1 %vm281_vm1, %v260_v7 }
  0xf7   :  { %v4887_v16 = vpop.f32.mrb[12].mxu0  ;;  %v4889_v17 = vpop.f32.mrb[12].mxu1 }
  0xf8   :  { %v4891_v18 = vpop.f32.mrb[13].mxu0  ;;  %3620 = vmatmul.mubr.msk.f32.gmra.mrb[118].mxu0 %vm281_vm1, %v133_v12  ;;  %v4894_v19 = vpop.f32.mrb[13].mxu1  ;;  %3812 = vmatmul.mubr.msk.f32.gmra.mrb[118].mxu1 %vm281_vm1, %v261_v13 }
  0xf9   :  { %3622 = vmatprep.mubr.msk.f32.mxu0 %vm281_vm1, %v134_v14  ;;  %3814 = vmatprep.mubr.msk.f32.mxu1 %vm281_vm1, %v262_v15 }
  0xfb   :  { %v4911_v24 = vpop.f32.mrb[14].mxu0  ;;  %v4913_v25 = vpop.f32.mrb[14].mxu1 }
  0xfc   :  { %v4915_v26 = vpop.f32.mrb[15].mxu0  ;;  %3623 = vmatmul.mubr.msk.f32.gmra.mrb[120].mxu0 %vm281_vm1, %v135_v20  ;;  %v4918_v27 = vpop.f32.mrb[15].mxu1  ;;  %3815 = vmatmul.mubr.msk.f32.gmra.mrb[120].mxu1 %vm281_vm1, %v263_v21 }
  0xfd   :  { %3625 = vmatprep.mubr.msk.f32.mxu0 %vm281_vm1, %v136_v22  ;;  %3817 = vmatprep.mubr.msk.f32.mxu1 %vm281_vm1, %v264_v23 }
  0xff   :  { %v4935_v36 = vpop.f32.mrb[16].mxu0  ;;  %v4937_v37 = vpop.f32.mrb[16].mxu1 }
 0x100   :  { %v4939_v38 = vpop.f32.mrb[17].mxu0  ;;  %3626 = vmatmul.mubr.msk.f32.gmra.mrb[122].mxu0 %vm281_vm1, %v137_v28  ;;  %v4942_v39 = vpop.f32.mrb[17].mxu1  ;;  %3818 = vmatmul.mubr.msk.f32.gmra.mrb[122].mxu1 %vm281_vm1, %v265_v29 }
 0x101   :  { %3628 = vmatprep.mubr.msk.f32.mxu0 %vm281_vm1, %v138_v30  ;;  %3820 = vmatprep.mubr.msk.f32.mxu1 %vm281_vm1, %v266_v31 }
 0x103   :  { %v4959_v52 = vpop.f32.mrb[18].mxu0  ;;  %v4961_v53 = vpop.f32.mrb[18].mxu1 }
 0x104   :  { %v4963_v54 = vpop.f32.mrb[19].mxu0  ;;  %3629 = vmatmul.mubr.msk.f32.gmra.mrb[124].mxu0 %vm281_vm1, %v139_v44  ;;  %v4966_v55 = vpop.f32.mrb[19].mxu1  ;;  %3821 = vmatmul.mubr.msk.f32.gmra.mrb[124].mxu1 %vm281_vm1, %v267_v45 }
 0x105   :  { %3631 = vmatprep.mubr.msk.f32.mxu0 %vm281_vm1, %v140_v46  ;;  %3823 = vmatprep.mubr.msk.f32.mxu1 %vm281_vm1, %v268_v47 }
 0x107   :  { %v4977_v62 = vpop.f32.mrb[20].mxu0  ;;  %v4979_v63 = vpop.f32.mrb[20].mxu1 }
 0x108   :  { %v4981_v4 = vpop.f32.mrb[21].mxu0  ;;  %3632 = vmatmul.mubr.msk.f32.gmra.mrb[126].mxu0 %vm281_vm1, %v141_v60  ;;  %v4984_v5 = vpop.f32.mrb[21].mxu1  ;;  %3824 = vmatmul.mubr.msk.f32.gmra.mrb[126].mxu1 %vm281_vm1, %v269_v61 }
 0x10b   :  { %v4987_v6 = vpop.f32.mrb[22].mxu0  ;;  %v4989_v7 = vpop.f32.mrb[22].mxu1 }
 0x10c   :  { %v4991_v12 = vpop.f32.mrb[23].mxu0  ;;  %v4993_v13 = vpop.f32.mrb[23].mxu1 }
 0x10f   :  { %v4995_v14 = vpop.f32.mrb[24].mxu0  ;;  %v4997_v15 = vpop.f32.mrb[24].mxu1 }
 0x110   :  { %v4999_v20 = vpop.f32.mrb[25].mxu0  ;;  %v5001_v21 = vpop.f32.mrb[25].mxu1 }
 0x113   :  { %v5003_v22 = vpop.f32.mrb[26].mxu0  ;;  %v5005_v23 = vpop.f32.mrb[26].mxu1 }
 0x114   :  { %6502 = vst [vmem:[#allocation2_spill] sm:$0xff] %v5005_v23  ;;  %v5007_v28 = vpop.f32.mrb[27].mxu0  ;;  %v5009_v29 = vpop.f32.mrb[27].mxu1 }
 0x115   :  { %6503 = vst [vmem:[#allocation3_spill] sm:$0xff] %v5007_v28  ;;  %6504 = vst [vmem:[#allocation4_spill] sm:$0xff] %v5009_v29 }
 0x117   :  { %v5011_v30 = vpop.f32.mrb[28].mxu0  ;;  %v5013_v31 = vpop.f32.mrb[28].mxu1 }
 0x118   :  { %6505 = vst [vmem:[#allocation5_spill] sm:$0xff] %v5011_v30  ;;  %6506 = vst [vmem:[#allocation6_spill] sm:$0xff] %v5013_v31  ;;  %v5015_v44 = vpop.f32.mrb[29].mxu0  ;;  %v5017_v45 = vpop.f32.mrb[29].mxu1 }
 0x119   :  { %6507 = vst [vmem:[#allocation7_spill] sm:$0xff] %v5015_v44  ;;  %6508 = vst [vmem:[#allocation8_spill] sm:$0xff] %v5017_v45 }
 0x11b   :  { %v5019_v46 = vpop.f32.mrb[30].mxu0  ;;  %v5021_v47 = vpop.f32.mrb[30].mxu1 }
 0x11c   :  { %6509 = vst [vmem:[#allocation9_spill] sm:$0xff] %v5019_v46  ;;  %6510 = vst [vmem:[#allocation10_spill] sm:$0xff] %v5021_v47  ;;  %v5023_v60 = vpop.f32.mrb[31].mxu0  ;;  %v5025_v61 = vpop.f32.mrb[31].mxu1 }
 0x11d   :  { %6511 = vst [vmem:[#allocation11_spill] sm:$0xff] %v5023_v60  ;;  %6512 = vst [vmem:[#allocation12_spill] sm:$0xff] %v5025_v61 }
 0x11f   :  { %v5027_v23 = vpop.f32.mrb[32].mxu0  ;;  %v5029_v28 = vpop.f32.mrb[32].mxu1 }
 0x120   :  { %6513 = vst [vmem:[#allocation13_spill] sm:$0xff] %v5027_v23  ;;  %6514 = vst [vmem:[#allocation14_spill] sm:$0xff] %v5029_v28  ;;  %v5031_v29 = vpop.f32.mrb[33].mxu0  ;;  %v5033_v30 = vpop.f32.mrb[33].mxu1 }
 0x121   :  { %6515 = vst [vmem:[#allocation15_spill] sm:$0xff] %v5031_v29  ;;  %6516 = vst [vmem:[#allocation16_spill] sm:$0xff] %v5033_v30 }
 0x123   :  { %v5035_v31 = vpop.f32.mrb[34].mxu0  ;;  %v5037_v44 = vpop.f32.mrb[34].mxu1 }
 0x124   :  { %6517 = vst [vmem:[#allocation17_spill] sm:$0xff] %v5035_v31  ;;  %v5039_v45 = vpop.f32.mrb[35].mxu0  ;;  %v5041_v46 = vpop.f32.mrb[35].mxu1 }
 0x125   :  { %6518 = vst [vmem:[#allocation18_spill] sm:$0xff] %v5041_v46  ;;  %v5062_v46 = vld [vmem:[%s6433_s2] ss:$0 sm:$0xff] }
 0x127   :  { %v5043_v47 = vpop.f32.mrb[36].mxu0  ;;  %v5045_v60 = vpop.f32.mrb[36].mxu1 }
 0x128   :  { %6519 = vst [vmem:[#allocation19_spill] sm:$0xff] %v5043_v47  ;;  %6520 = vst [vmem:[#allocation20_spill] sm:$0xff] %v5045_v60  ;;  %v5047_v61 = vpop.f32.mrb[37].mxu0  ;;  %v5049_v23 = vpop.f32.mrb[37].mxu1 }
 0x129   :  { %6521 = vst [vmem:[#allocation21_spill] sm:$0xff] %v5047_v61  ;;  %6522 = vst [vmem:[#allocation22_spill] sm:$0xff] %v5049_v23  ;;  %v5070_v23 = vadd.f32 %v4743_v32, %v5062_v46  ;;  %v5090_v32 = vadd.f32 %v4767_v40, %v5062_v46  ;;  %v5110_v40 = vadd.f32 %v4793_v49, %v5062_v46 }
 0x12b   :  { %v5051_v28 = vpop.f32.mrb[38].mxu0  ;;  %v5053_v29 = vpop.f32.mrb[38].mxu1  ;;  %6534 = vst [vmem:[#allocation34_spill] sm:$0xff] %v5110_v40  ;;  %v5230_v40 = vadd.f32 %v4911_v24, %v5062_v46 }
 0x12c   :  { %6523 = vst [vmem:[#allocation23_spill] sm:$0xff] %v5051_v28  ;;  %6524 = vst [vmem:[#allocation24_spill] sm:$0xff] %v5053_v29  ;;  %v5055_v30 = vpop.f32.mrb[39].mxu0  ;;  %v5057_v31 = vpop.f32.mrb[39].mxu1  ;;  %v5074_v29 = vadd.f32 %v4745_v33, %v5062_v46  ;;  %v5082_v28 = vadd.f32 %v5062_v46, %v4747_v34  ;;  %v5094_v33 = vadd.f32 %v4769_v41, %v5062_v46 }
 0x12d   :  { %6525 = vst [vmem:[#allocation25_spill] sm:$0xff] %v5055_v30  ;;  %6526 = vst [vmem:[#allocation26_spill] sm:$0xff] %v5057_v31  ;;  %v5102_v34 = vadd.f32 %v5062_v46, %v4774_v43  ;;  %v5120_v43 = vadd.f32 %v5062_v46, %v4795_v50  ;;  %v5138_v50 = vadd.f32 %v4817_v57, %v5062_v46 }
 0x12e   :  { %6529 = vst [vmem:[#allocation29_spill] sm:$0xff] %v5074_v29  ;;  %6532 = vst [vmem:[#allocation32_spill] sm:$0xff] %v5082_v28  ;;  %v5144_v29 = vadd.f32 %v5062_v46, %v4819_v58  ;;  %v5190_v57 = vadd.f32 %v4865_v9, %v5062_v46  ;;  %v5202_v58 = vadd.f32 %v4887_v16, %v5062_v46 }
 0x12f   :  { %v5064_v47 = vpop.f32.mrb[40].mxu0  ;;  %v5066_v60 = vpop.f32.mrb[40].mxu1  ;;  %6538 = vst [vmem:[#allocation38_spill] sm:$0xff] %v5138_v50  ;;  %v5220_v16 = vadd.f32 %v5062_v46, %v4894_v19  ;;  %v5262_v50 = vadd.f32 %v4937_v37, %v5062_v46  ;;  %v5272_v19 = vadd.f32 %v5062_v46, %v4939_v38  ;;  %v5290_v38 = vadd.f32 %v5062_v46, %v4963_v54 }
 0x130   :  { %6527 = vst [vmem:[#allocation27_spill] sm:$0xff] %v5064_v47  ;;  %6528 = vst [vmem:[#allocation28_spill] sm:$0xff] %v5066_v60  ;;  %v5076_v30 = vpop.f32.mrb[41].mxu0  ;;  %v5078_v31 = vpop.f32.mrb[41].mxu1  ;;  %v5086_v47 = vadd.f32 %v5062_v46, %v4750_v35  ;;  %v5106_v35 = vadd.f32 %v4791_v48, %v5062_v46  ;;  %v5124_v48 = vadd.f32 %v5062_v46, %v4798_v51 }
 0x131   :  { %6530 = vst [vmem:[#allocation30_spill] sm:$0xff] %v5076_v30  ;;  %6531 = vst [vmem:[#allocation31_spill] sm:$0xff] %v5078_v31  ;;  %v5098_v30 = vadd.f32 %v5062_v46, %v4771_v42  ;;  %v5134_v60 = vadd.f32 %v4815_v56, %v5062_v46  ;;  %v5176_v51 = vadd.f32 %v5062_v46, %v4843_v2 }
 0x132   :  { %6533 = vst [vmem:[#allocation33_spill] sm:$0xff] %v5086_v47  ;;  %6537 = vst [vmem:[#allocation37_spill] sm:$0xff] %v5124_v48  ;;  %v5186_v48 = vadd.f32 %v4863_v8, %v5062_v46  ;;  %v5194_v2 = vadd.f32 %v5062_v46, %v4867_v10  ;;  %v5206_v8 = vadd.f32 %v4889_v17, %v5062_v46 }
 0x133   :  { %v5112_v31 = vpop.f32.mrb[42].mxu0  ;;  %v5114_v41 = vpop.f32.mrb[42].mxu1  ;;  %6539 = vst [vmem:[#allocation39_spill] sm:$0xff] %v5144_v29  ;;  %6542 = vst [vmem:[#allocation42_spill] sm:$0xff] %v5176_v51  ;;  %v5244_v29 = vadd.f32 %v5062_v46, %v4918_v27  ;;  %v5258_v27 = vadd.f32 %v4935_v36, %v5062_v46  ;;  %v5276_v36 = vadd.f32 %v5062_v46, %v4942_v39 }
 0x134   :  { %6535 = vst [vmem:[#allocation35_spill] sm:$0xff] %v5112_v31  ;;  %6536 = vst [vmem:[#allocation36_spill] sm:$0xff] %v5114_v41  ;;  %v5126_v61 = vpop.f32.mrb[43].mxu0  ;;  %v5128_v49 = vpop.f32.mrb[43].mxu1  ;;  %v5148_v31 = vadd.f32 %v5062_v46, %v4822_v59  ;;  %v5162_v59 = vadd.f32 %v4839_v0, %v5062_v46  ;;  %v5166_v41 = vadd.f32 %v4841_v1, %v5062_v46 }
 0x135   :  { %v5180_v0 = vadd.f32 %v5062_v46, %v4846_v3  ;;  %v5198_v3 = vadd.f32 %v5062_v46, %v4870_v11  ;;  %6544 = vst [vmem:[#allocation44_spill] sm:$0xff] %v5206_v8  ;;  %v5216_v11 = vadd.f32 %v5062_v46, %v4891_v18  ;;  %6545 = vst [vmem:[#allocation45_spill] sm:$0xff] %v5220_v16 }
 0x136   :  { %6540 = vst [vmem:[#allocation40_spill] sm:$0xff] %v5148_v31  ;;  %6541 = vst [vmem:[#allocation41_spill] sm:$0xff] %v5166_v41  ;;  %v5234_v18 = vadd.f32 %v4913_v25, %v5062_v46  ;;  %v5240_v41 = vadd.f32 %v5062_v46, %v4915_v26  ;;  %v5282_v16 = vadd.f32 %v4959_v52, %v5062_v46 }
 0x137   :  { %v5154_v28 = vpop.f32.mrb[44].mxu0  ;;  %v5156_v42 = vpop.f32.mrb[44].mxu1  ;;  %6543 = vst [vmem:[#allocation43_spill] sm:$0xff] %v5180_v0  ;;  %6548 = vst [vmem:[#allocation48_spill] sm:$0xff] %v5244_v29  ;;  %v5286_v25 = vadd.f32 %v4961_v53, %v5062_v46  ;;  %v5294_v39 = vadd.f32 %v5062_v46, %v4966_v55  ;;  %v5298_v26 = vadd.f32 %v4977_v62, %v5062_v46 }
 0x138   :  { %v5168_v56 = vpop.f32.mrb[45].mxu0  ;;  %v5170_v47 = vpop.f32.mrb[45].mxu1  ;;  %6546 = vst [vmem:[#allocation46_spill] sm:$0xff] %v5234_v18  ;;  %6547 = vst [vmem:[#allocation47_spill] sm:$0xff] %v5240_v41  ;;  %v5302_v52 = vadd.f32 %v4979_v63, %v5062_v46  ;;  %v5312_v55 = vadd.f32 %v5062_v46, %v4981_v4  ;;  %v5316_v62 = vadd.f32 %v5062_v46, %v4984_v5 }
 0x139   :  { %6549 = vst [vmem:[#allocation49_spill] sm:$0xff] %v5262_v50  ;;  %6550 = vst [vmem:[#allocation50_spill] sm:$0xff] %v5272_v19  ;;  %v5326_v8 = vadd.f32 %v4987_v6, %v5062_v46  ;;  %v5330_v4 = vadd.f32 %v4989_v7, %v5062_v46  ;;  %v5336_v50 = vadd.f32 %v5062_v46, %v4991_v12  ;;  %v6567_v7 = vld [vmem:[#allocation2_spill] sm:$0xff]  ;;  %v6572_v12 = vld [vmem:[#allocation5_spill] sm:$0xff] }
 0x13a   :  { %6551 = vst [vmem:[#allocation51_spill] sm:$0xff] %v5276_v36  ;;  %6552 = vst [vmem:[#allocation52_spill] sm:$0xff] %v5286_v25  ;;  %v5340_v41 = vadd.f32 %v5062_v46, %v4993_v13  ;;  %v5354_v13 = vadd.f32 %v4995_v14, %v5062_v46  ;;  %v5358_v18 = vadd.f32 %v4997_v15, %v5062_v46  ;;  %v6574_v15 = vld [vmem:[#allocation6_spill] sm:$0xff]  ;;  %v6588_v25 = vld [vmem:[#allocation11_spill] sm:$0xff] }
 0x13b   :  { %v5208_v1 = vpop.f32.mrb[46].mxu0  ;;  %v5210_v9 = vpop.f32.mrb[46].mxu1  ;;  %6553 = vst [vmem:[#allocation53_spill] sm:$0xff] %v5290_v38  ;;  %6554 = vst [vmem:[#allocation54_spill] sm:$0xff] %v5294_v39  ;;  %v5368_v5 = vadd.f32 %v5062_v46, %v4999_v20  ;;  %v5372_v14 = vadd.f32 %v5062_v46, %v5001_v21  ;;  %v6580_v39 = vld [vmem:[#allocation8_spill] sm:$0xff] }
 0x13c   :  { %v5222_v31 = vpop.f32.mrb[47].mxu0  ;;  %v5224_v17 = vpop.f32.mrb[47].mxu1  ;;  %6555 = vst [vmem:[#allocation55_spill] sm:$0xff] %v5298_v26  ;;  %6556 = vst [vmem:[#allocation56_spill] sm:$0xff] %v5302_v52  ;;  %v6569_v52 = vld [vmem:[#allocation3_spill] sm:$0xff] }
 0x13d   :  { %6557 = vst [vmem:[#allocation57_spill] sm:$0xff] %v5312_v55  ;;  %6558 = vst [vmem:[#allocation58_spill] sm:$0xff] %v5316_v62  ;;  %v5378_v62 = vadd.f32 %v5003_v22, %v5062_v46  ;;  %v5386_v20 = vadd.f32 %v5062_v46, %v6569_v52  ;;  %v5398_v22 = vadd.f32 %v6574_v15, %v5062_v46  ;;  %v6578_v26 = vld [vmem:[#allocation7_spill] sm:$0xff]  ;;  %v6584_v55 = vld [vmem:[#allocation9_spill] sm:$0xff] }
 0x13e   :  { %6559 = vst [vmem:[#allocation59_spill] sm:$0xff] %v5326_v8  ;;  %6560 = vst [vmem:[#allocation60_spill] sm:$0xff] %v5330_v4  ;;  %v5382_v8 = vadd.f32 %v6567_v7, %v5062_v46  ;;  %v6571_v4 = vld [vmem:[#allocation4_spill] sm:$0xff]  ;;  %v6586_v52 = vld [vmem:[#allocation10_spill] sm:$0xff] }
 0x13f   :  { %v5250_v51 = vpop.f32.mrb[48].mxu0  ;;  %v5252_v10 = vpop.f32.mrb[48].mxu1  ;;  %6561 = vst [vmem:[#allocation61_spill] sm:$0xff] %v5336_v50  ;;  %6562 = vst [vmem:[#allocation62_spill] sm:$0xff] %v5340_v41  ;;  %v5390_v21 = vadd.f32 %v5062_v46, %v6571_v4  ;;  %v5394_v50 = vadd.f32 %v6572_v12, %v5062_v46  ;;  %v5408_v4 = vadd.f32 %v5062_v46, %v6578_v26 }
 0x140   :  { %v5264_v24 = vpop.f32.mrb[49].mxu0  ;;  %v5266_v0 = vpop.f32.mrb[49].mxu1  ;;  %6563 = vst [vmem:[#allocation63_spill] sm:$0xff] %v5354_v13  ;;  %6564 = vst [vmem:[#allocation64_spill] sm:$0xff] %v5358_v18  ;;  %v5412_v12 = vadd.f32 %v5062_v46, %v6580_v39  ;;  %v5422_v13 = vadd.f32 %v6584_v55, %v5062_v46  ;;  %v5426_v26 = vadd.f32 %v6586_v52, %v5062_v46 }
 0x141   :  { %6565 = vst [vmem:[#allocation65_spill] sm:$0xff] %v5368_v5  ;;  %6566 = vst [vmem:[#allocation66_spill] sm:$0xff] %v5372_v14  ;;  %v5478_v52 = vadd.f32 %v5037_v44, %v5062_v46 }
 0x142   :  { %6568 = vst [vmem:[#allocation2_spill] sm:$0xff] %v5382_v8  ;;  %6570 = vst [vmem:[#allocation3_spill] sm:$0xff] %v5386_v20  ;;  %v6594_v8 = vld [vmem:[#allocation13_spill] sm:$0xff] }
 0x143   :  { %v5304_v37 = vpop.f32.mrb[50].mxu0  ;;  %v5306_v53 = vpop.f32.mrb[50].mxu1  ;;  %6573 = vst [vmem:[#allocation4_spill] sm:$0xff] %v5394_v50  ;;  %6575 = vst [vmem:[#allocation5_spill] sm:$0xff] %v5398_v22  ;;  %v6620_v50 = vld [vmem:[#allocation25_spill] sm:$0xff] }
 0x144   :  { %v5318_v29 = vpop.f32.mrb[51].mxu0  ;;  %v5320_v63 = vpop.f32.mrb[51].mxu1  ;;  %6579 = vst [vmem:[#allocation7_spill] sm:$0xff] %v5408_v4  ;;  %6581 = vst [vmem:[#allocation8_spill] sm:$0xff] %v5412_v12  ;;  %v6608_v12 = vld [vmem:[#allocation19_spill] sm:$0xff] }
 0x145   :  { %6585 = vst [vmem:[#allocation9_spill] sm:$0xff] %v5422_v13  ;;  %6587 = vst [vmem:[#allocation10_spill] sm:$0xff] %v5426_v26  ;;  %v6612_v26 = vld [vmem:[#allocation21_spill] sm:$0xff]  ;;  %v6614_v13 = vld [vmem:[#allocation22_spill] sm:$0xff] }
 0x147   :  { %v5346_v19 = vpop.f32.mrb[52].mxu0  ;;  %v5348_v54 = vpop.f32.mrb[52].mxu1 }
 0x148   :  { %v5360_v6 = vpop.f32.mrb[53].mxu0  ;;  %v5362_v36 = vpop.f32.mrb[53].mxu1 }
 0x14b   :  { %v5400_v41 = vpop.f32.mrb[54].mxu0  ;;  %v5402_v7 = vpop.f32.mrb[54].mxu1 }
 0x14c   :  { %6576 = vst [vmem:[#allocation6_spill] sm:$0xff] %v5400_v41  ;;  %6577 = vst [vmem:[#allocation67_spill] sm:$0xff] %v5402_v7  ;;  %v5414_v38 = vpop.f32.mrb[55].mxu0  ;;  %v5416_v15 = vpop.f32.mrb[55].mxu1  ;;  %v6596_v7 = vld [vmem:[#allocation14_spill] sm:$0xff] }
 0x14d   :  { %6582 = vst [vmem:[#allocation68_spill] sm:$0xff] %v5414_v38  ;;  %6583 = vst [vmem:[#allocation69_spill] sm:$0xff] %v5416_v15  ;;  %v5432_v38 = vadd.f32 %v5062_v46, %v6588_v25  ;;  %v6590_v15 = vld [vmem:[#allocation12_spill] sm:$0xff]  ;;  %v5454_v20 = vadd.f32 %v6596_v7, %v5062_v46 }
 0x14e   :  { %v5436_v41 = vadd.f32 %v5062_v46, %v6590_v15  ;;  %v5450_v15 = vadd.f32 %v6594_v8, %v5062_v46  ;;  %v6602_v25 = vld [vmem:[#allocation16_spill] sm:$0xff] }
 0x14f   :  { %6589 = vst [vmem:[#allocation11_spill] sm:$0xff] %v5432_v38  ;;  %v5442_v5 = vpop.f32.mrb[56].mxu0  ;;  %v5444_v18 = vpop.f32.mrb[56].mxu1  ;;  %6597 = vst [vmem:[#allocation14_spill] sm:$0xff] %v5454_v20  ;;  %v5468_v8 = vadd.f32 %v5062_v46, %v6602_v25  ;;  %v6609_v7 = vld [vmem:[#allocation20_spill] sm:$0xff]  ;;  %v6618_v38 = vld [vmem:[#allocation23_spill] sm:$0xff] }
 0x150   :  { %6591 = vst [vmem:[#allocation12_spill] sm:$0xff] %v5436_v41  ;;  %6592 = vst [vmem:[#allocation70_spill] sm:$0xff] %v5442_v5  ;;  %v5456_v55 = vpop.f32.mrb[57].mxu0  ;;  %v5458_v14 = vpop.f32.mrb[57].mxu1  ;;  %v6600_v5 = vld [vmem:[#allocation15_spill] sm:$0xff] }
 0x151   :  { %6593 = vst [vmem:[#allocation71_spill] sm:$0xff] %v5444_v18  ;;  %6595 = vst [vmem:[#allocation13_spill] sm:$0xff] %v5450_v15  ;;  %v5464_v39 = vadd.f32 %v5062_v46, %v6600_v5  ;;  %v5482_v5 = vadd.f32 %v5062_v46, %v5039_v45  ;;  %v6607_v18 = vld [vmem:[#allocation18_spill] sm:$0xff]  ;;  %v5518_v15 = vadd.f32 %v6618_v38, %v5062_v46  ;;  %v6619_v45 = vld [vmem:[#allocation24_spill] sm:$0xff] }
 0x152   :  { %6598 = vst [vmem:[#allocation72_spill] sm:$0xff] %v5456_v55  ;;  %6599 = vst [vmem:[#allocation73_spill] sm:$0xff] %v5458_v14  ;;  %v6604_v55 = vld [vmem:[#allocation17_spill] sm:$0xff]  ;;  %v5486_v25 = vadd.f32 %v5062_v46, %v6607_v18  ;;  %v5490_v14 = vadd.f32 %v6608_v12, %v5062_v46  ;;  %v5504_v18 = vadd.f32 %v5062_v46, %v6612_v26 }
 0x153   :  { %6601 = vst [vmem:[#allocation15_spill] sm:$0xff] %v5464_v39  ;;  %6603 = vst [vmem:[#allocation16_spill] sm:$0xff] %v5468_v8  ;;  %v5474_v4 = vadd.f32 %v6604_v55, %v5062_v46  ;;  %v5494_v55 = vadd.f32 %v6609_v7, %v5062_v46  ;;  %v5496_v41 = vpop.f32.mrb[58].mxu0  ;;  %v5498_v44 = vpop.f32.mrb[58].mxu1  ;;  %v5508_v12 = vadd.f32 %v5062_v46, %v6614_v13 }
 0x154   :  { %6605 = vst [vmem:[#allocation17_spill] sm:$0xff] %v5478_v52  ;;  %6606 = vst [vmem:[#allocation74_spill] sm:$0xff] %v5482_v5  ;;  %v5510_v22 = vpop.f32.mrb[59].mxu0  ;;  %v5512_v7 = vpop.f32.mrb[59].mxu1  ;;  %v5522_v26 = vadd.f32 %v6619_v45, %v5062_v46  ;;  %v6625_v52 = vld [vmem:[#allocation27_spill] sm:$0xff]  ;;  %v6635_v45 = vld [vmem:[#allocation36_spill] sm:$0xff] }
 0x155   :  { %6610 = vst [vmem:[#allocation18_spill] sm:$0xff] %v5496_v41  ;;  %6611 = vst [vmem:[#allocation19_spill] sm:$0xff] %v5498_v44  ;;  %v6626_v44 = vld [vmem:[#allocation28_spill] sm:$0xff] }
 0x156   :  { %6613 = vst [vmem:[#allocation20_spill] sm:$0xff] %v5504_v18  ;;  %6615 = vst [vmem:[#allocation21_spill] sm:$0xff] %v5508_v12  ;;  %v5550_v5 = vadd.f32 %v6626_v44, %v5062_v46  ;;  %v5586_v12 = vadd.f32 %v5154_v28, %v5062_v46  ;;  %v5604_v28 = vadd.f32 %v5062_v46, %v5170_v47 }
 0x157   :  { %6616 = vst [vmem:[#allocation22_spill] sm:$0xff] %v5510_v22  ;;  %6617 = vst [vmem:[#allocation75_spill] sm:$0xff] %v5512_v7  ;;  %v5528_v22 = vadd.f32 %v5062_v46, %v6620_v50  ;;  %v6621_v7 = vld [vmem:[#allocation26_spill] sm:$0xff]  ;;  %v5538_v39 = vpop.f32.mrb[60].mxu0  ;;  %v5540_v20 = vpop.f32.mrb[60].mxu1  ;;  %v6631_v50 = vld [vmem:[#allocation31_spill] sm:$0xff] }
 0x158   :  { %v5532_v41 = vadd.f32 %v5062_v46, %v6621_v7  ;;  %6623 = vst [vmem:[#allocation24_spill] sm:$0xff] %v5538_v39  ;;  %6624 = vst [vmem:[#allocation25_spill] sm:$0xff] %v5540_v20  ;;  %v5546_v7 = vadd.f32 %v6625_v52, %v5062_v46  ;;  %v5552_v38 = vpop.f32.mrb[61].mxu0  ;;  %v5554_v8 = vpop.f32.mrb[61].mxu1  ;;  %v6629_v39 = vld [vmem:[#allocation30_spill] sm:$0xff]  ;;  %v5564_v52 = vadd.f32 %v5062_v46, %v6631_v50 }
 0x159   :  { %6627 = vst [vmem:[#allocation26_spill] sm:$0xff] %v5552_v38  ;;  %6628 = vst [vmem:[#allocation27_spill] sm:$0xff] %v5554_v8  ;;  %v5560_v13 = vadd.f32 %v5062_v46, %v6629_v39  ;;  %v6633_v38 = vld [vmem:[#allocation35_spill] sm:$0xff]  ;;  %v5574_v8 = vadd.f32 %v6635_v45, %v5062_v46  ;;  %v5578_v39 = vadd.f32 %v5062_v46, %v5126_v61 }
 0x15a   :  { %6622 = vst [vmem:[#allocation23_spill] sm:$0xff] %v5532_v41  ;;  %6632 = vst [vmem:[#allocation30_spill] sm:$0xff] %v5564_v52  ;;  %v5570_v18 = vadd.f32 %v6633_v38, %v5062_v46  ;;  %v5582_v50 = vadd.f32 %v5062_v46, %v5128_v49  ;;  %v5590_v38 = vadd.f32 %v5156_v42, %v5062_v46 }
 0x15b   :  { %6630 = vst [vmem:[#allocation28_spill] sm:$0xff] %v5560_v13  ;;  %6636 = vst [vmem:[#allocation35_spill] sm:$0xff] %v5574_v8  ;;  %v5592_v44 = vpop.f32.mrb[62].mxu0  ;;  %v5594_v45 = vpop.f32.mrb[62].mxu1  ;;  %v5600_v49 = vadd.f32 %v5062_v46, %v5168_v56  ;;  %v5614_v20 = vadd.f32 %v5208_v1, %v5062_v46  ;;  %v5618_v56 = vadd.f32 %v5210_v9, %v5062_v46 }
 0x15c   :  { %6634 = vst [vmem:[#allocation31_spill] sm:$0xff] %v5570_v18  ;;  %6637 = vst [vmem:[#allocation36_spill] sm:$0xff] %v5578_v39  ;;  %v5606_v41 = vpop.f32.mrb[63].mxu0  ;;  %v5608_v42 = vpop.f32.mrb[63].mxu1 }
 0x15d   :  { %6638 = vst [vmem:[#allocation76_spill] sm:$0xff] %v5582_v50  ;;  %6639 = vst [vmem:[#allocation77_spill] sm:$0xff] %v5586_v12  ;;  %v6656_v50 = vld [vmem:[#allocation33_spill] sm:$0xff] }
 0x15e   :  { %6640 = vst [vmem:[#allocation78_spill] sm:$0xff] %v5590_v38  ;;  %6641 = vst [vmem:[#allocation79_spill] sm:$0xff] %v5592_v44  ;;  %v6652_v38 = vld [vmem:[#allocation29_spill] sm:$0xff] }
 0x15f   :  { %6642 = vst [vmem:[#allocation80_spill] sm:$0xff] %v5594_v45  ;;  %6643 = vst [vmem:[#allocation81_spill] sm:$0xff] %v5600_v49  ;;  %v5628_v45 = vadd.f32 %v5062_v46, %v5224_v17  ;;  %v3540_v52 = vpop.f32.mrb[64].mxu0  ;;  %v3732_v47 = vpop.f32.mrb[64].mxu1 }
 0x160   :  { %6644 = vst [vmem:[#allocation82_spill] sm:$0xff] %v5604_v28  ;;  %6645 = vst [vmem:[#allocation83_spill] sm:$0xff] %v5606_v41  ;;  %v2086_v18 = vadd.f32 %v3732_v47, %v5062_v46  ;;  %v1440_v17 = vpop.f32.mrb[65].mxu0  ;;  %v2080_v13 = vpop.f32.mrb[65].mxu1  ;;  %v5650_v47 = vadd.f32 %v5252_v10, %v5062_v46  ;;  %v6654_v28 = vld [vmem:[#allocation32_spill] sm:$0xff] }
 0x161   :  { %6646 = vst [vmem:[#allocation84_spill] sm:$0xff] %v5608_v42  ;;  %6647 = vst [vmem:[#allocation85_spill] sm:$0xff] %v5614_v20  ;;  %v5624_v42 = vadd.f32 %v5062_v46, %v5222_v31  ;;  %v1446_v31 = vadd.f32 %v3540_v52, %v5062_v46  ;;  %v1441_v9 = vadd.f32 %v5062_v46, %v1440_v17  ;;  %v6655_v12 = vmax.f32 %v6654_v28, 0.0 }
 0x162   :  { %6648 = vst [vmem:[#allocation86_spill] sm:$0xff] %v5618_v56  ;;  %6650 = vst [vmem:[#allocation88_spill] sm:$0xff] %v5628_v45  ;;  %v2081_v41 = vadd.f32 %v5062_v46, %v2080_v13  ;;  %v2592_v8 = vmax.f32 %v2086_v18, 0.0  ;;  %v5646_v52 = vadd.f32 %v5250_v51, %v5062_v46  ;;  %v6651_v13 = vmax.f32 %v5070_v23, 0.0 }
 0x163   :  { %6649 = vst [vmem:[#allocation87_spill] sm:$0xff] %v5624_v42  ;;  %v2464_v49 = vmax.f32 %v1446_v31, 0.0  ;;  %v2463_v1 = vmax.f32 %v1441_v9, 0.0  ;;  %v3543_v56 = vpop.f32.mrb[66].mxu0  ;;  %v3735_v17 = vpop.f32.mrb[66].mxu1  ;;  %v6653_v42 = vmax.f32 %v6652_v38, 0.0  ;;  %v5666_v38 = vadd.f32 %v5062_v46, %v5264_v24 }
 0x164   :  { %v2591_v44 = vmax.f32 %v2081_v41, 0.0  ;;  %v1456_v18 = vadd.f32 %v3543_v56, %v5062_v46  ;;  %v2096_v31 = vadd.f32 %v3735_v17, %v5062_v46  ;;  %v1450_v51 = vpop.f32.mrb[67].mxu0  ;;  %v2090_v45 = vpop.f32.mrb[67].mxu1  ;;  %v6657_v9 = vmax.f32 %v6656_v50, 0.0 }
 0x165   :  { %v2656_v20 = vmax.f32 %v6651_v13, %v2464_v49  ;;  %v2720_v61 = vmax.f32 %v6653_v42, %v2592_v8  ;;  %v2655_v10 = vmax.f32 %v6655_v12, %v2463_v1  ;;  %v1451_v39 = vadd.f32 %v5062_v46, %v1450_v51 }
 0x166   :  { %v2719_v41 = vmax.f32 %v6657_v9, %v2591_v44  ;;  %v2091_v23 = vadd.f32 %v5062_v46, %v2090_v45  ;;  %v2466_v49 = vmax.f32 %v1456_v18, 0.0  ;;  %v2594_v42 = vmax.f32 %v2096_v31, 0.0 }
 0x167   :  { %v2784_v8 = vmax.f32 %v2656_v20, %v2720_v61  ;;  %v5670_v56 = vadd.f32 %v5062_v46, %v5266_v0  ;;  %v2465_v12 = vmax.f32 %v1451_v39, 0.0  ;;  %v3546_v50 = vpop.f32.mrb[68].mxu0  ;;  %v3738_v44 = vpop.f32.mrb[68].mxu1  ;;  %v6658_v24 = vmax.f32 %v5090_v32, 0.0 }
 0x168   :  { %v2783_v28 = vmax.f32 %v2655_v10, %v2719_v41  ;;  %v2593_v1 = vmax.f32 %v2091_v23, 0.0  ;;  %v6659_v20 = vmax.f32 %v5094_v33, 0.0  ;;  %v1466_v17 = vadd.f32 %v3546_v50, %v5062_v46  ;;  %v1460_v13 = vpop.f32.mrb[69].mxu0  ;;  %v2100_v39 = vpop.f32.mrb[69].mxu1 }
 0x169   :  { %2849 = vst.msk [vmem:[%s6434_s3 + $0x8] sm:$0xff] %vm2847_vm4, %v2784_v8  ;;  %v2658_v45 = vmax.f32 %v6658_v24, %v2466_v49  ;;  %v2106_v0 = vadd.f32 %v3738_v44, %v5062_v46  ;;  %v6660_v18 = vmax.f32 %v5098_v30, 0.0  ;;  %v6661_v32 = vmax.f32 %v5102_v34, 0.0 }
 0x16a   :  { %v2722_v61 = vmax.f32 %v6659_v20, %v2594_v42  ;;  %2848 = vst.msk [vmem:[%s6434_s3] sm:$0xff] %vm2847_vm4, %v2783_v28  ;;  %v1461_v33 = vadd.f32 %v5062_v46, %v1460_v13  ;;  %v2101_v10 = vadd.f32 %v5062_v46, %v2100_v39  ;;  %v2448_v9 = vmax.f32 %v5646_v52, 0.0 }
 0x16b   :  { %v2657_v31 = vmax.f32 %v6660_v18, %v2465_v12  ;;  %v2721_v51 = vmax.f32 %v6661_v32, %v2593_v1  ;;  %v2468_v23 = vmax.f32 %v1466_v17, 0.0  ;;  %v2596_v8 = vmax.f32 %v2106_v0, 0.0  ;;  %v3549_v44 = vpop.f32.mrb[70].mxu0  ;;  %v3741_v30 = vpop.f32.mrb[70].mxu1  ;;  %v6663_v1 = vld [vmem:[#allocation34_spill] sm:$0xff]  ;;  %v6666_v18 = vld [vmem:[#allocation37_spill] sm:$0xff] }
 0x16c   :  { %v2786_v41 = vmax.f32 %v2658_v45, %v2722_v61  ;;  %v2576_v49 = vmax.f32 %v5650_v47, 0.0  ;;  %v2467_v50 = vmax.f32 %v1461_v33, 0.0  ;;  %v2595_v28 = vmax.f32 %v2101_v10, 0.0  ;;  %v1470_v17 = vpop.f32.mrb[71].mxu0  ;;  %v2110_v0 = vpop.f32.mrb[71].mxu1 }
 0x16d   :  { %v2785_v42 = vmax.f32 %v2657_v31, %v2721_v51  ;;  %v6662_v34 = vmax.f32 %v5106_v35, 0.0  ;;  %v6664_v24 = vmax.f32 %v6663_v1, 0.0  ;;  %v1476_v20 = vadd.f32 %v3549_v44, %v5062_v46  ;;  %v6669_v1 = vld [vmem:[#allocation38_spill] sm:$0xff] }
 0x16e   :  { %2851 = vst.msk [vmem:[%s6434_s3 + $0x18] sm:$0xff] %vm2847_vm4, %v2786_v41  ;;  %v2116_v61 = vadd.f32 %v3741_v30, %v5062_v46  ;;  %v6665_v13 = vmax.f32 %v5120_v43, 0.0  ;;  %v6667_v35 = vmax.f32 %v6666_v18, 0.0  ;;  %v1471_v32 = vadd.f32 %v5062_v46, %v1470_v17  ;;  %v6673_v18 = vld [vmem:[#allocation40_spill] sm:$0xff] }
 0x16f   :  { %v2660_v12 = vmax.f32 %v6662_v34, %v2468_v23  ;;  %v2724_v45 = vmax.f32 %v6664_v24, %v2596_v8  ;;  %2850 = vst.msk [vmem:[%s6434_s3 + $0x10] sm:$0xff] %vm2847_vm4, %v2785_v42  ;;  %v2111_v51 = vadd.f32 %v5062_v46, %v2110_v0  ;;  %v2447_v33 = vmax.f32 %v5666_v38, 0.0  ;;  %v3552_v34 = vpop.f32.mrb[72].mxu0  ;;  %v3744_v43 = vpop.f32.mrb[72].mxu1  ;;  %v6671_v0 = vld [vmem:[#allocation39_spill] sm:$0xff] }
 0x170   :  { %v2659_v39 = vmax.f32 %v6665_v13, %v2467_v50  ;;  %v2723_v31 = vmax.f32 %v6667_v35, %v2595_v28  ;;  %v2470_v41 = vmax.f32 %v1476_v20, 0.0  ;;  %v2598_v23 = vmax.f32 %v2116_v61, 0.0  ;;  %v1480_v61 = vpop.f32.mrb[73].mxu0  ;;  %v2120_v17 = vpop.f32.mrb[73].mxu1 }
 0x171   :  { %v2788_v10 = vmax.f32 %v2660_v12, %v2724_v45  ;;  %v2575_v8 = vmax.f32 %v5670_v56, 0.0  ;;  %v2469_v30 = vmax.f32 %v1471_v32, 0.0  ;;  %v2597_v42 = vmax.f32 %v2111_v51, 0.0 }
 0x172   :  { %v2787_v44 = vmax.f32 %v2659_v39, %v2723_v31  ;;  %v6668_v50 = vmax.f32 %v5134_v60, 0.0  ;;  %v6670_v24 = vmax.f32 %v6669_v1, 0.0  ;;  %v1486_v45 = vadd.f32 %v3552_v34, %v5062_v46 }
 0x173   :  { %2853 = vst.msk [vmem:[%s6434_s3 + $0x28] sm:$0xff] %vm2847_vm4, %v2788_v10  ;;  %v2126_v20 = vadd.f32 %v3744_v43, %v5062_v46  ;;  %v6672_v13 = vmax.f32 %v6671_v0, 0.0  ;;  %v6674_v60 = vmax.f32 %v6673_v18, 0.0  ;;  %v1481_v31 = vadd.f32 %v5062_v46, %v1480_v61 }
 0x174   :  { %v2662_v28 = vmax.f32 %v6668_v50, %v2470_v41  ;;  %v2726_v12 = vmax.f32 %v6670_v24, %v2598_v23  ;;  %2852 = vst.msk [vmem:[%s6434_s3 + $0x20] sm:$0xff] %vm2847_vm4, %v2787_v44  ;;  %v2121_v32 = vadd.f32 %v5062_v46, %v2120_v17  ;;  %v5738_v51 = vadd.f32 %v5304_v37, %v5062_v46  ;;  %v3555_v50 = vpop.f32.mrb[74].mxu0  ;;  %v6678_v17 = vld [vmem:[#allocation42_spill] sm:$0xff] }
 0x175   :  { %v2661_v39 = vmax.f32 %v6672_v13, %v2469_v30  ;;  %v2725_v35 = vmax.f32 %v6674_v60, %v2597_v42  ;;  %v2472_v41 = vmax.f32 %v1486_v45, 0.0  ;;  %v2600_v23 = vmax.f32 %v2126_v20, 0.0  ;;  %v3747_v42 = vpop.f32.mrb[74].mxu1  ;;  %v1490_v20 = vpop.f32.mrb[75].mxu0 }
 0x176   :  { %v2790_v10 = vmax.f32 %v2662_v28, %v2726_v12  ;;  %v5742_v44 = vadd.f32 %v5306_v53, %v5062_v46  ;;  %v2471_v30 = vmax.f32 %v1481_v31, 0.0  ;;  %v2599_v43 = vmax.f32 %v2121_v32, 0.0  ;;  %v6676_v28 = vld [vmem:[#allocation41_spill] sm:$0xff]  ;;  %v2130_v61 = vpop.f32.mrb[75].mxu1 }
 0x177   :  { %v2789_v34 = vmax.f32 %v2661_v39, %v2725_v35  ;;  %v6675_v37 = vmax.f32 %v5162_v59, 0.0  ;;  %v6677_v24 = vmax.f32 %v6676_v28, 0.0  ;;  %v1496_v45 = vadd.f32 %v3555_v50, %v5062_v46  ;;  %v6680_v39 = vld [vmem:[#allocation43_spill] sm:$0xff] }
 0x178   :  { %2855 = vst.msk [vmem:[%s6434_s3 + $0x38] sm:$0xff] %vm2847_vm4, %v2790_v10  ;;  %v2136_v53 = vadd.f32 %v3747_v42, %v5062_v46  ;;  %v6679_v0 = vmax.f32 %v6678_v17, 0.0  ;;  %v6681_v59 = vmax.f32 %v6680_v39, 0.0  ;;  %v1491_v60 = vadd.f32 %v5062_v46, %v1490_v20  ;;  %v3558_v42 = vpop.f32.mrb[76].mxu0 }
 0x179   :  { %v2664_v1 = vmax.f32 %v6675_v37, %v2472_v41  ;;  %v2728_v12 = vmax.f32 %v6677_v24, %v2600_v23  ;;  %2854 = vst.msk [vmem:[%s6434_s3 + $0x30] sm:$0xff] %vm2847_vm4, %v2789_v34  ;;  %v2131_v35 = vadd.f32 %v5062_v46, %v2130_v61  ;;  %v5766_v31 = vadd.f32 %v5062_v46, %v5318_v29 }
 0x17a   :  { %v2663_v13 = vmax.f32 %v6679_v0, %v2471_v30  ;;  %v2727_v18 = vmax.f32 %v6681_v59, %v2599_v43  ;;  %v2474_v10 = vmax.f32 %v1496_v45, 0.0  ;;  %v2602_v41 = vmax.f32 %v2136_v53, 0.0  ;;  %v3750_v43 = vpop.f32.mrb[76].mxu1 }
 0x17b   :  { %v2792_v32 = vmax.f32 %v2664_v1, %v2728_v12  ;;  %v5770_v23 = vadd.f32 %v5062_v46, %v5320_v63  ;;  %v2473_v30 = vmax.f32 %v1491_v60, 0.0  ;;  %v2601_v50 = vmax.f32 %v2131_v35, 0.0  ;;  %v1500_v12 = vpop.f32.mrb[77].mxu0  ;;  %v2140_v45 = vpop.f32.mrb[77].mxu1 }
 0x17c   :  { %v2791_v34 = vmax.f32 %v2663_v13, %v2727_v18  ;;  %v6682_v29 = vmax.f32 %v5186_v48, 0.0  ;;  %v6683_v1 = vmax.f32 %v5190_v57, 0.0  ;;  %v1506_v24 = vadd.f32 %v3558_v42, %v5062_v46 }
 0x17d   :  { %2857 = vst.msk [vmem:[%s6434_s3 + $0x48] sm:$0xff] %vm2847_vm4, %v2792_v32  ;;  %v2146_v63 = vadd.f32 %v3750_v43, %v5062_v46  ;;  %v6684_v53 = vmax.f32 %v5194_v2, 0.0  ;;  %v6685_v48 = vmax.f32 %v5198_v3, 0.0  ;;  %v1501_v57 = vadd.f32 %v5062_v46, %v1500_v12  ;;  %v3753_v2 = vpop.f32.mrb[78].mxu1 }
 0x17e   :  { %v2666_v37 = vmax.f32 %v6682_v29, %v2474_v10  ;;  %v2730_v28 = vmax.f32 %v6683_v1, %v2602_v41  ;;  %2856 = vst.msk [vmem:[%s6434_s3 + $0x40] sm:$0xff] %vm2847_vm4, %v2791_v34  ;;  %v2141_v17 = vadd.f32 %v5062_v46, %v2140_v45  ;;  %v2450_v0 = vmax.f32 %v5738_v51, 0.0  ;;  %v3561_v10 = vpop.f32.mrb[78].mxu0  ;;  %v6687_v34 = vld [vmem:[#allocation44_spill] sm:$0xff] }
 0x17f   :  { %v2665_v20 = vmax.f32 %v6684_v53, %v2473_v30  ;;  %v2729_v61 = vmax.f32 %v6685_v48, %v2601_v50  ;;  %v2476_v39 = vmax.f32 %v1506_v24, 0.0  ;;  %v2604_v59 = vmax.f32 %v2146_v63, 0.0  ;;  %v1510_v29 = vpop.f32.mrb[79].mxu0  ;;  %v6690_v24 = vld [vmem:[#allocation45_spill] sm:$0xff] }
 0x180   :  { %v2794_v13 = vmax.f32 %v2666_v37, %v2730_v28  ;;  %v2578_v18 = vmax.f32 %v5742_v44, 0.0  ;;  %v2475_v35 = vmax.f32 %v1501_v57, 0.0  ;;  %v2603_v32 = vmax.f32 %v2141_v17, 0.0  ;;  %v2150_v37 = vpop.f32.mrb[79].mxu1 }
 0x181   :  { %v2793_v60 = vmax.f32 %v2665_v20, %v2729_v61  ;;  %v6686_v3 = vmax.f32 %v5202_v58, 0.0  ;;  %v6688_v30 = vmax.f32 %v6687_v34, 0.0  ;;  %v1516_v42 = vadd.f32 %v3561_v10, %v5062_v46 }
 0x182   :  { %2859 = vst.msk [vmem:[%s6434_s3 + $0x58] sm:$0xff] %vm2847_vm4, %v2794_v13  ;;  %v2156_v43 = vadd.f32 %v3753_v2, %v5062_v46  ;;  %v6689_v1 = vmax.f32 %v5216_v11, 0.0  ;;  %v6691_v58 = vmax.f32 %v6690_v24, 0.0  ;;  %v1511_v12 = vadd.f32 %v5062_v46, %v1510_v29  ;;  %v3756_v11 = vpop.f32.mrb[80].mxu1  ;;  %v6697_v29 = vld [vmem:[#allocation48_spill] sm:$0xff] }
 0x183   :  { %v2668_v41 = vmax.f32 %v6686_v3, %v2476_v39  ;;  %v2732_v50 = vmax.f32 %v6688_v30, %v2604_v59  ;;  %2858 = vst.msk [vmem:[%s6434_s3 + $0x50] sm:$0xff] %vm2847_vm4, %v2793_v60  ;;  %v2151_v45 = vadd.f32 %v5062_v46, %v2150_v37  ;;  %v2449_v53 = vmax.f32 %v5766_v31, 0.0  ;;  %v3564_v59 = vpop.f32.mrb[80].mxu0  ;;  %v2160_v30 = vpop.f32.mrb[81].mxu1 }
 0x184   :  { %v2667_v28 = vmax.f32 %v6689_v1, %v2475_v35  ;;  %v2731_v63 = vmax.f32 %v6691_v58, %v2603_v32  ;;  %v2478_v48 = vmax.f32 %v1516_v42, 0.0  ;;  %v2606_v61 = vmax.f32 %v2156_v43, 0.0  ;;  %v6693_v32 = vld [vmem:[#allocation46_spill] sm:$0xff]  ;;  %v1520_v34 = vpop.f32.mrb[81].mxu0 }
 0x185   :  { %v2796_v20 = vmax.f32 %v2668_v41, %v2732_v50  ;;  %v2577_v57 = vmax.f32 %v5770_v23, 0.0  ;;  %v2477_v13 = vmax.f32 %v1511_v12, 0.0  ;;  %v2605_v39 = vmax.f32 %v2151_v45, 0.0  ;;  %v6695_v50 = vld [vmem:[#allocation47_spill] sm:$0xff] }
 0x186   :  { %v2795_v17 = vmax.f32 %v2667_v28, %v2731_v63  ;;  %v6692_v60 = vmax.f32 %v5230_v40, 0.0  ;;  %v6694_v10 = vmax.f32 %v6693_v32, 0.0  ;;  %v1526_v3 = vadd.f32 %v3564_v59, %v5062_v46  ;;  %v6700_v59 = vld [vmem:[#allocation49_spill] sm:$0xff] }
 0x187   :  { %2861 = vst.msk [vmem:[%s6434_s3 + $0x68] sm:$0xff] %vm2847_vm4, %v2796_v20  ;;  %v2166_v41 = vadd.f32 %v3756_v11, %v5062_v46  ;;  %v6696_v42 = vmax.f32 %v6695_v50, 0.0  ;;  %v6698_v40 = vmax.f32 %v6697_v29, 0.0  ;;  %v1521_v1 = vadd.f32 %v5062_v46, %v1520_v34  ;;  %v6704_v34 = vld [vmem:[#allocation51_spill] sm:$0xff] }
 0x188   :  { %v2670_v35 = vmax.f32 %v6692_v60, %v2478_v48  ;;  %v2734_v2 = vmax.f32 %v6694_v10, %v2606_v61  ;;  %2860 = vst.msk [vmem:[%s6434_s3 + $0x60] sm:$0xff] %vm2847_vm4, %v2795_v17  ;;  %v2161_v28 = vadd.f32 %v5062_v46, %v2160_v30  ;;  %v5838_v24 = vadd.f32 %v5346_v19, %v5062_v46  ;;  %v3567_v17 = vpop.f32.mrb[82].mxu0 }
 0x189   :  { %v2669_v43 = vmax.f32 %v6696_v42, %v2477_v13  ;;  %v2733_v37 = vmax.f32 %v6698_v40, %v2605_v39  ;;  %v2480_v63 = vmax.f32 %v1526_v3, 0.0  ;;  %v2608_v12 = vmax.f32 %v2166_v41, 0.0  ;;  %v3759_v13 = vpop.f32.mrb[82].mxu1  ;;  %v1530_v32 = vpop.f32.mrb[83].mxu0 }
 0x18a   :  { %v2798_v58 = vmax.f32 %v2670_v35, %v2734_v2  ;;  %v5842_v45 = vadd.f32 %v5348_v54, %v5062_v46  ;;  %v2479_v48 = vmax.f32 %v1521_v1, 0.0  ;;  %v2607_v61 = vmax.f32 %v2161_v28, 0.0  ;;  %v2170_v10 = vpop.f32.mrb[83].mxu1  ;;  %v6702_v2 = vld [vmem:[#allocation50_spill] sm:$0xff] }
 0x18b   :  { %v2797_v20 = vmax.f32 %v2669_v43, %v2733_v37  ;;  %v6699_v19 = vmax.f32 %v5258_v27, 0.0  ;;  %v6701_v11 = vmax.f32 %v6700_v59, 0.0  ;;  %v1536_v35 = vadd.f32 %v3567_v17, %v5062_v46 }
 0x18c   :  { %2863 = vst.msk [vmem:[%s6434_s3 + $0x78] sm:$0xff] %vm2847_vm4, %v2798_v58  ;;  %v2176_v54 = vadd.f32 %v3759_v13, %v5062_v46  ;;  %v6703_v3 = vmax.f32 %v6702_v2, 0.0  ;;  %v6705_v27 = vmax.f32 %v6704_v34, 0.0  ;;  %v1531_v50 = vadd.f32 %v5062_v46, %v1530_v32 }
 0x18d   :  { %v2672_v39 = vmax.f32 %v6699_v19, %v2480_v63  ;;  %v2736_v60 = vmax.f32 %v6701_v11, %v2608_v12  ;;  %2862 = vst.msk [vmem:[%s6434_s3 + $0x70] sm:$0xff] %vm2847_vm4, %v2797_v20  ;;  %v2171_v42 = vadd.f32 %v5062_v46, %v2170_v10  ;;  %v5866_v43 = vadd.f32 %v5062_v46, %v5360_v6  ;;  %v3570_v12 = vpop.f32.mrb[84].mxu0  ;;  %v3762_v20 = vpop.f32.mrb[84].mxu1  ;;  %v6709_v11 = vld [vmem:[#allocation53_spill] sm:$0xff] }
 0x18e   :  { %v2671_v41 = vmax.f32 %v6703_v3, %v2479_v48  ;;  %v2735_v30 = vmax.f32 %v6705_v27, %v2607_v61  ;;  %v2482_v40 = vmax.f32 %v1536_v35, 0.0  ;;  %v2610_v37 = vmax.f32 %v2176_v54, 0.0  ;;  %v6707_v61 = vld [vmem:[#allocation52_spill] sm:$0xff]  ;;  %v2180_v59 = vpop.f32.mrb[85].mxu1  ;;  %v6711_v54 = vld [vmem:[#allocation54_spill] sm:$0xff] }
 0x18f   :  { %v2800_v29 = vmax.f32 %v2672_v39, %v2736_v60  ;;  %v5870_v1 = vadd.f32 %v5062_v46, %v5362_v36  ;;  %v2481_v58 = vmax.f32 %v1531_v50, 0.0  ;;  %v2609_v63 = vmax.f32 %v2171_v42, 0.0  ;;  %v1540_v39 = vpop.f32.mrb[85].mxu0 }
 0x190   :  { %v2799_v28 = vmax.f32 %v2671_v41, %v2735_v30  ;;  %v6706_v6 = vmax.f32 %v5282_v16, 0.0  ;;  %v6708_v17 = vmax.f32 %v6707_v61, 0.0  ;;  %v1546_v19 = vadd.f32 %v3570_v12, %v5062_v46  ;;  %v6715_v12 = vld [vmem:[#allocation56_spill] sm:$0xff] }
 0x191   :  { %2865 = vst.msk [vmem:[%s6434_s3 + $0x88] sm:$0xff] %vm2847_vm4, %v2800_v29  ;;  %v2186_v36 = vadd.f32 %v3762_v20, %v5062_v46  ;;  %v6710_v60 = vmax.f32 %v6709_v11, 0.0  ;;  %v6712_v16 = vmax.f32 %v6711_v54, 0.0  ;;  %v1541_v10 = vadd.f32 %v5062_v46, %v1540_v39 }
 0x192   :  { %v2674_v48 = vmax.f32 %v6706_v6, %v2482_v40  ;;  %v2738_v13 = vmax.f32 %v6708_v17, %v2610_v37  ;;  %2864 = vst.msk [vmem:[%s6434_s3 + $0x80] sm:$0xff] %vm2847_vm4, %v2799_v28  ;;  %v2181_v2 = vadd.f32 %v5062_v46, %v2180_v59  ;;  %v2452_v3 = vmax.f32 %v5838_v24, 0.0  ;;  %v3573_v40 = vpop.f32.mrb[86].mxu0  ;;  %v3765_v37 = vpop.f32.mrb[86].mxu1  ;;  %v6713_v28 = vld [vmem:[#allocation55_spill] sm:$0xff]  ;;  %v6719_v59 = vld [vmem:[#allocation58_spill] sm:$0xff] }
 0x193   :  { %v2673_v35 = vmax.f32 %v6710_v60, %v2481_v58  ;;  %v2737_v32 = vmax.f32 %v6712_v16, %v2609_v63  ;;  %v2484_v34 = vmax.f32 %v1546_v19, 0.0  ;;  %v2612_v27 = vmax.f32 %v2186_v36, 0.0  ;;  %v1550_v17 = vpop.f32.mrb[87].mxu0  ;;  %v6717_v19 = vld [vmem:[#allocation57_spill] sm:$0xff] }
 0x194   :  { %v2802_v41 = vmax.f32 %v2674_v48, %v2738_v13  ;;  %v2580_v30 = vmax.f32 %v5842_v45, 0.0  ;;  %v2483_v42 = vmax.f32 %v1541_v10, 0.0  ;;  %v2611_v29 = vmax.f32 %v2181_v2, 0.0  ;;  %v2190_v13 = vpop.f32.mrb[87].mxu1 }
 0x195   :  { %v2801_v50 = vmax.f32 %v2673_v35, %v2737_v32  ;;  %v6714_v58 = vmax.f32 %v6713_v28, 0.0  ;;  %v6716_v20 = vmax.f32 %v6715_v12, 0.0  ;;  %v1556_v48 = vadd.f32 %v3573_v40, %v5062_v46  ;;  %v3576_v40 = vpop.f32.mrb[88].mxu0 }
 0x196   :  { %2867 = vst.msk [vmem:[%s6434_s3 + $0x98] sm:$0xff] %vm2847_vm4, %v2802_v41  ;;  %v2196_v61 = vadd.f32 %v3765_v37, %v5062_v46  ;;  %v6718_v36 = vmax.f32 %v6717_v19, 0.0  ;;  %v6720_v11 = vmax.f32 %v6719_v59, 0.0  ;;  %v1551_v35 = vadd.f32 %v5062_v46, %v1550_v17  ;;  %v3768_v37 = vpop.f32.mrb[88].mxu1  ;;  %v6725_v17 = vld [vmem:[#allocation61_spill] sm:$0xff] }
 0x197   :  { %v2676_v63 = vmax.f32 %v6714_v58, %v2484_v34  ;;  %v2740_v6 = vmax.f32 %v6716_v20, %v2612_v27  ;;  %2866 = vst.msk [vmem:[%s6434_s3 + $0x90] sm:$0xff] %vm2847_vm4, %v2801_v50  ;;  %v2191_v54 = vadd.f32 %v5062_v46, %v2190_v13  ;;  %v2451_v16 = vmax.f32 %v5866_v43, 0.0  ;;  %v6723_v58 = vld [vmem:[#allocation60_spill] sm:$0xff] }
 0x198   :  { %v2675_v39 = vmax.f32 %v6718_v36, %v2483_v42  ;;  %v2739_v60 = vmax.f32 %v6720_v11, %v2611_v29  ;;  %v2486_v10 = vmax.f32 %v1556_v48, 0.0  ;;  %v2614_v2 = vmax.f32 %v2196_v61, 0.0  ;;  %v6721_v42 = vld [vmem:[#allocation59_spill] sm:$0xff]  ;;  %v1560_v48 = vpop.f32.mrb[89].mxu0  ;;  %v2200_v61 = vpop.f32.mrb[89].mxu1  ;;  %v6727_v36 = vld [vmem:[#allocation62_spill] sm:$0xff] }
 0x199   :  { %v2804_v32 = vmax.f32 %v2676_v63, %v2740_v6  ;;  %v2485_v27 = vmax.f32 %v1551_v35, 0.0  ;;  %v2613_v50 = vmax.f32 %v2191_v54, 0.0  ;;  %v6722_v29 = vmax.f32 %v6721_v42, 0.0  ;;  %v6729_v35 = vld [vmem:[#allocation6_spill] sm:$0xff] }
 0x19a   :  { %v2803_v34 = vmax.f32 %v2675_v39, %v2739_v60  ;;  %v6724_v12 = vmax.f32 %v6723_v58, 0.0  ;;  %v1566_v20 = vadd.f32 %v3576_v40, %v5062_v46  ;;  %v2206_v6 = vadd.f32 %v3768_v37, %v5062_v46  ;;  %v3771_v58 = vpop.f32.mrb[90].mxu1 }
 0x19b   :  { %2869 = vst.msk [vmem:[%s6434_s3 + $0xa8] sm:$0xff] %vm2847_vm4, %v2804_v32  ;;  %v2678_v28 = vmax.f32 %v6722_v29, %v2486_v10  ;;  %v6726_v13 = vmax.f32 %v6725_v17, 0.0  ;;  %v6728_v39 = vmax.f32 %v6727_v36, 0.0  ;;  %v1561_v11 = vadd.f32 %v5062_v46, %v1560_v48  ;;  %v3579_v29 = vpop.f32.mrb[90].mxu0 }
 0x19c   :  { %v2742_v63 = vmax.f32 %v6724_v12, %v2614_v2  ;;  %2868 = vst.msk [vmem:[%s6434_s3 + $0xa0] sm:$0xff] %vm2847_vm4, %v2803_v34  ;;  %v2201_v60 = vadd.f32 %v5062_v46, %v2200_v61  ;;  %v5938_v54 = vadd.f32 %v6729_v35, %v5062_v46  ;;  %v2488_v10 = vmax.f32 %v1566_v20, 0.0  ;;  %v5943_v34 = vld [vmem:[%s6433_s2] ss:$0 sm:$0xff]  ;;  %v6731_v46 = vld [vmem:[#allocation63_spill] sm:$0xff]  ;;  %v1570_v17 = vpop.f32.mrb[91].mxu0 }
 0x19d   :  { %v2677_v19 = vmax.f32 %v6726_v13, %v2485_v27  ;;  %v2741_v59 = vmax.f32 %v6728_v39, %v2613_v50  ;;  %v2616_v2 = vmax.f32 %v2206_v6, 0.0  ;;  %v6730_v27 = vld [vmem:[#allocation67_spill] sm:$0xff]  ;;  %v2487_v37 = vmax.f32 %v1561_v11, 0.0  ;;  %v2210_v13 = vpop.f32.mrb[91].mxu1 }
 0x19e   :  { %v2806_v32 = vmax.f32 %v2678_v28, %v2742_v63  ;;  %v5947_v40 = vadd.f32 %v5943_v34, %v6730_v27  ;;  %v2615_v42 = vmax.f32 %v2201_v60, 0.0  ;;  %v6732_v28 = vmax.f32 %v6731_v46, 0.0  ;;  %v6733_v63 = vld [vmem:[#allocation64_spill] sm:$0xff]  ;;  %v6740_v46 = vld [vmem:[#allocation69_spill] sm:$0xff] }
 0x19f   :  { %v2805_v50 = vmax.f32 %v2677_v19, %v2741_v59  ;;  %v6734_v20 = vmax.f32 %v6733_v63, 0.0  ;;  %v1576_v48 = vadd.f32 %v5943_v34, %v3579_v29  ;;  %v2216_v61 = vadd.f32 %v5943_v34, %v3771_v58  ;;  %v6735_v19 = vld [vmem:[#allocation65_spill] sm:$0xff]  ;;  %v6737_v59 = vld [vmem:[#allocation66_spill] sm:$0xff] }
 0x1a0   :  { %2871 = vst.msk [vmem:[%s6434_s3 + $0xb8] sm:$0xff] %vm2847_vm4, %v2806_v32  ;;  %v2680_v12 = vmax.f32 %v6732_v28, %v2488_v10  ;;  %v6736_v36 = vmax.f32 %v6735_v19, 0.0  ;;  %v6738_v11 = vmax.f32 %v6737_v59, 0.0  ;;  %v1571_v35 = vadd.f32 %v5943_v34, %v1570_v17  ;;  %v6739_v10 = vld [vmem:[#allocation68_spill] sm:$0xff]  ;;  %v6744_v59 = vld [vmem:[#allocation3_spill] sm:$0xff] }
 0x1a1   :  { %v2744_v6 = vmax.f32 %v6734_v20, %v2616_v2  ;;  %2870 = vst.msk [vmem:[%s6434_s3 + $0xb0] sm:$0xff] %vm2847_vm4, %v2805_v50  ;;  %v2211_v32 = vadd.f32 %v5943_v34, %v2210_v13  ;;  %v5971_v2 = vadd.f32 %v5943_v34, %v6739_v10  ;;  %v2490_v29 = vmax.f32 %v1576_v48, 0.0  ;;  %v3582_v20 = vpop.f32.mrb[92].mxu0 }
 0x1a2   :  { %v2679_v39 = vmax.f32 %v6736_v36, %v2487_v37  ;;  %v2743_v60 = vmax.f32 %v6738_v11, %v2615_v42  ;;  %v2618_v58 = vmax.f32 %v2216_v61, 0.0  ;;  %v5975_v50 = vadd.f32 %v5943_v34, %v6740_v46  ;;  %v3774_v42 = vpop.f32.mrb[92].mxu1  ;;  %v1580_v36 = vpop.f32.mrb[93].mxu0 }
 0x1a3   :  { %v2808_v27 = vmax.f32 %v2680_v12, %v2744_v6  ;;  %v2489_v37 = vmax.f32 %v1571_v35, 0.0  ;;  %v2617_v63 = vmax.f32 %v2211_v32, 0.0  ;;  %v6741_v17 = vmax.f32 %v5378_v62, 0.0  ;;  %v6742_v12 = vld [vmem:[#allocation2_spill] sm:$0xff] }
 0x1a4   :  { %v2807_v28 = vmax.f32 %v2679_v39, %v2743_v60  ;;  %v6743_v6 = vmax.f32 %v6742_v12, 0.0  ;;  %v1586_v61 = vadd.f32 %v5943_v34, %v3582_v20  ;;  %v2226_v19 = vadd.f32 %v5943_v34, %v3774_v42  ;;  %v2220_v39 = vpop.f32.mrb[93].mxu1  ;;  %v3585_v12 = vpop.f32.mrb[94].mxu0 }
 0x1a5   :  { %2873 = vst.msk [vmem:[%s6434_s3 + $0xc8] sm:$0xff] %vm2847_vm4, %v2808_v27  ;;  %v2682_v13 = vmax.f32 %v6741_v17, %v2490_v29  ;;  %v6745_v11 = vmax.f32 %v6744_v59, 0.0  ;;  %v6746_v62 = vmax.f32 %v5390_v21, 0.0  ;;  %v1581_v32 = vadd.f32 %v5943_v34, %v1580_v36  ;;  %v6747_v21 = vld [vmem:[#allocation4_spill] sm:$0xff]  ;;  %v6749_v36 = vld [vmem:[#allocation5_spill] sm:$0xff] }
 0x1a6   :  { %v2746_v48 = vmax.f32 %v6743_v6, %v2618_v58  ;;  %2872 = vst.msk [vmem:[%s6434_s3 + $0xc0] sm:$0xff] %vm2847_vm4, %v2807_v28  ;;  %v2221_v10 = vadd.f32 %v5943_v34, %v2220_v39  ;;  %v2492_v58 = vmax.f32 %v1586_v61, 0.0  ;;  %v2620_v46 = vmax.f32 %v2226_v19, 0.0  ;;  %v3777_v6 = vpop.f32.mrb[94].mxu1  ;;  %v1590_v19 = vpop.f32.mrb[95].mxu0 }
 0x1a7   :  { %v2681_v60 = vmax.f32 %v6745_v11, %v2489_v37  ;;  %v2745_v35 = vmax.f32 %v6746_v62, %v2617_v63  ;;  %v2491_v17 = vmax.f32 %v1581_v32, 0.0  ;;  %v6748_v37 = vmax.f32 %v6747_v21, 0.0  ;;  %v2230_v59 = vpop.f32.mrb[95].mxu1  ;;  %v6751_v11 = vld [vmem:[#allocation7_spill] sm:$0xff]  ;;  %v3588_v20 = vpop.f32.mrb[96].mxu0 }
 0x1a8   :  { %v2810_v29 = vmax.f32 %v2682_v13, %v2746_v48  ;;  %v2619_v28 = vmax.f32 %v2221_v10, 0.0  ;;  %v6750_v39 = vmax.f32 %v6749_v36, 0.0  ;;  %v1596_v48 = vadd.f32 %v5943_v34, %v3585_v12 }
 0x1a9   :  { %v2809_v42 = vmax.f32 %v2681_v60, %v2745_v35  ;;  %v2684_v63 = vmax.f32 %v6748_v37, %v2492_v58  ;;  %v2236_v61 = vadd.f32 %v5943_v34, %v3777_v6  ;;  %v6752_v60 = vmax.f32 %v6751_v11, 0.0  ;;  %v6753_v35 = vld [vmem:[#allocation8_spill] sm:$0xff]  ;;  %v3780_v11 = vpop.f32.mrb[96].mxu1 }
 0x1aa   :  { %2875 = vst.msk [vmem:[%s6434_s3 + $0xd8] sm:$0xff] %vm2847_vm4, %v2810_v29  ;;  %v2748_v13 = vmax.f32 %v6750_v39, %v2620_v46  ;;  %v6754_v32 = vmax.f32 %v6753_v35, 0.0  ;;  %v1591_v29 = vadd.f32 %v5943_v34, %v1590_v19  ;;  %v2231_v58 = vadd.f32 %v5943_v34, %v2230_v59  ;;  %v6757_v59 = vld [vmem:[#allocation10_spill] sm:$0xff]  ;;  %v6759_v35 = vld [vmem:[#allocation11_spill] sm:$0xff]  ;;  %v6774_v46 = vld [vmem:[#allocation73_spill] sm:$0xff] }
 0x1ab   :  { %2874 = vst.msk [vmem:[%s6434_s3 + $0xd0] sm:$0xff] %vm2847_vm4, %v2809_v42  ;;  %v2683_v62 = vmax.f32 %v6752_v60, %v2491_v17  ;;  %v2494_v6 = vmax.f32 %v1596_v48, 0.0  ;;  %v2622_v21 = vmax.f32 %v2236_v61, 0.0  ;;  %v6755_v17 = vld [vmem:[#allocation9_spill] sm:$0xff]  ;;  %v6758_v60 = vmax.f32 %v6757_v59, 0.0  ;;  %v1600_v61 = vpop.f32.mrb[97].mxu0 }
 0x1ac   :  { %v2747_v10 = vmax.f32 %v6754_v32, %v2619_v28  ;;  %v2812_v12 = vmax.f32 %v2684_v63, %v2748_v13  ;;  %v2493_v39 = vmax.f32 %v1591_v29, 0.0  ;;  %v2621_v42 = vmax.f32 %v2231_v58, 0.0  ;;  %v6761_v29 = vld [vmem:[#allocation12_spill] sm:$0xff] }
 0x1ad   :  { %v6756_v28 = vmax.f32 %v6755_v17, 0.0  ;;  %v2750_v63 = vmax.f32 %v6758_v60, %v2622_v21  ;;  %v1606_v13 = vadd.f32 %v5943_v34, %v3588_v20  ;;  %v2246_v48 = vadd.f32 %v5943_v34, %v3780_v11  ;;  %v6763_v20 = vld [vmem:[#allocation70_spill] sm:$0xff]  ;;  %v6764_v60 = vld [vmem:[#allocation71_spill] sm:$0xff] }
 0x1ae   :  { %v2811_v36 = vmax.f32 %v2683_v62, %v2747_v10  ;;  %2877 = vst.msk [vmem:[%s6434_s3 + $0xe8] sm:$0xff] %vm2847_vm4, %v2812_v12  ;;  %v2240_v62 = vpop.f32.mrb[97].mxu1  ;;  %v6760_v32 = vmax.f32 %v6759_v35, 0.0  ;;  %v6762_v58 = vmax.f32 %v6761_v29, 0.0  ;;  %v6043_v11 = vadd.f32 %v5943_v34, %v6763_v20  ;;  %v3591_v29 = vpop.f32.mrb[98].mxu0 }
 0x1af   :  { %v2686_v19 = vmax.f32 %v6756_v28, %v2494_v6  ;;  %v1601_v6 = vadd.f32 %v5943_v34, %v1600_v61  ;;  %v2241_v21 = vadd.f32 %v5943_v34, %v2240_v62  ;;  %v2496_v28 = vmax.f32 %v1606_v13, 0.0  ;;  %v6765_v61 = vld [vmem:[#allocation13_spill] sm:$0xff] }
 0x1b0   :  { %2876 = vst.msk [vmem:[%s6434_s3 + $0xe0] sm:$0xff] %vm2847_vm4, %v2811_v36  ;;  %v2685_v10 = vmax.f32 %v6760_v32, %v2493_v39  ;;  %v2749_v12 = vmax.f32 %v6762_v58, %v2621_v42  ;;  %v2624_v59 = vmax.f32 %v2246_v48, 0.0  ;;  %v6047_v36 = vadd.f32 %v5943_v34, %v6764_v60  ;;  %v3783_v42 = vpop.f32.mrb[98].mxu1  ;;  %v6771_v60 = vld [vmem:[#allocation16_spill] sm:$0xff] }
 0x1b1   :  { %v2814_v17 = vmax.f32 %v2686_v19, %v2750_v63  ;;  %v2495_v39 = vmax.f32 %v1601_v6, 0.0  ;;  %v2623_v32 = vmax.f32 %v2241_v21, 0.0  ;;  %v6766_v62 = vmax.f32 %v6765_v61, 0.0  ;;  %v6767_v19 = vld [vmem:[#allocation14_spill] sm:$0xff]  ;;  %v6769_v6 = vld [vmem:[#allocation15_spill] sm:$0xff] }
 0x1b2   :  { %v2813_v35 = vmax.f32 %v2685_v10, %v2749_v12  ;;  %v6768_v63 = vmax.f32 %v6767_v19, 0.0  ;;  %v1616_v48 = vadd.f32 %v5943_v34, %v3591_v29  ;;  %v2256_v20 = vadd.f32 %v5943_v34, %v3783_v42  ;;  %v1610_v10 = vpop.f32.mrb[99].mxu0  ;;  %v2250_v12 = vpop.f32.mrb[99].mxu1  ;;  %v6773_v29 = vld [vmem:[#allocation72_spill] sm:$0xff] }
 0x1b3   :  { %2879 = vst.msk [vmem:[%s6434_s3 + $0xf8] sm:$0xff] %vm2847_vm4, %v2814_v17  ;;  %v2688_v58 = vmax.f32 %v6766_v62, %v2496_v28  ;;  %v6770_v21 = vmax.f32 %v6769_v6, 0.0  ;;  %v6772_v61 = vmax.f32 %v6771_v60, 0.0  ;;  %v1611_v62 = vadd.f32 %v5943_v34, %v1610_v10  ;;  %v3594_v60 = vpop.f32.mrb[100].mxu0 }
 0x1b4   :  { %v2752_v13 = vmax.f32 %v6768_v63, %v2624_v59  ;;  %2878 = vst.msk [vmem:[%s6434_s3 + $0xf0] sm:$0xff] %vm2847_vm4, %v2813_v35  ;;  %v2251_v59 = vadd.f32 %v5943_v34, %v2250_v12  ;;  %v6071_v42 = vadd.f32 %v5943_v34, %v6773_v29  ;;  %v2498_v63 = vmax.f32 %v1616_v48, 0.0 }
 0x1b5   :  { %v2687_v17 = vmax.f32 %v6770_v21, %v2495_v39  ;;  %v2751_v28 = vmax.f32 %v6772_v61, %v2623_v32  ;;  %v2626_v37 = vmax.f32 %v2256_v20, 0.0  ;;  %v6075_v35 = vadd.f32 %v5943_v34, %v6774_v46  ;;  %v3786_v32 = vpop.f32.mrb[100].mxu1 }
 0x1b6   :  { %v2816_v19 = vmax.f32 %v2688_v58, %v2752_v13  ;;  %v2497_v39 = vmax.f32 %v1611_v62, 0.0  ;;  %v2625_v21 = vmax.f32 %v2251_v59, 0.0  ;;  %v6775_v10 = vmax.f32 %v5474_v4, 0.0  ;;  %v6776_v58 = vld [vmem:[#allocation17_spill] sm:$0xff]  ;;  %v2260_v61 = vpop.f32.mrb[101].mxu1 }
 0x1b7   :  { %v2815_v6 = vmax.f32 %v2687_v17, %v2751_v28  ;;  %v6777_v13 = vmax.f32 %v6776_v58, 0.0  ;;  %v1626_v20 = vadd.f32 %v5943_v34, %v3594_v60  ;;  %v2266_v46 = vadd.f32 %v5943_v34, %v3786_v32  ;;  %v1620_v17 = vpop.f32.mrb[101].mxu0  ;;  %v6778_v28 = vld [vmem:[#allocation74_spill] sm:$0xff] }
 0x1b8   :  { %2881 = vst.msk [vmem:[%s6434_s3 + $0x108] sm:$0xff] %vm2847_vm4, %v2816_v19  ;;  %v2690_v12 = vmax.f32 %v6775_v10, %v2498_v63  ;;  %v6779_v62 = vmax.f32 %v6778_v28, 0.0  ;;  %v6780_v4 = vmax.f32 %v5486_v25, 0.0  ;;  %v1621_v19 = vadd.f32 %v5943_v34, %v1620_v17  ;;  %v3597_v41 = vpop.f32.mrb[102].mxu0  ;;  %v3789_v28 = vpop.f32.mrb[102].mxu1 }
 0x1b9   :  { %v2754_v48 = vmax.f32 %v6777_v13, %v2626_v37  ;;  %2880 = vst.msk [vmem:[%s6434_s3 + $0x100] sm:$0xff] %vm2847_vm4, %v2815_v6  ;;  %v2261_v37 = vadd.f32 %v5943_v34, %v2260_v61  ;;  %v2456_v63 = vmax.f32 %v6043_v11, 0.0  ;;  %v2500_v32 = vmax.f32 %v1626_v20, 0.0  ;;  %v2270_v17 = vpop.f32.mrb[103].mxu1  ;;  %v6783_v61 = vld [vmem:[#allocation20_spill] sm:$0xff] }
 0x1ba   :  { %v2689_v59 = vmax.f32 %v6779_v62, %v2497_v39  ;;  %v2753_v29 = vmax.f32 %v6780_v4, %v2625_v21  ;;  %v2628_v10 = vmax.f32 %v2266_v46, 0.0  ;;  %v2584_v58 = vmax.f32 %v6047_v36, 0.0  ;;  %v1630_v46 = vpop.f32.mrb[103].mxu0  ;;  %v6785_v4 = vld [vmem:[#allocation21_spill] sm:$0xff] }
 0x1bb   :  { %v2818_v60 = vmax.f32 %v2690_v12, %v2754_v48  ;;  %v2499_v27 = vmax.f32 %v1621_v19, 0.0  ;;  %v2627_v6 = vmax.f32 %v2261_v37, 0.0  ;;  %v6781_v25 = vmax.f32 %v5490_v14, 0.0 }
 0x1bc   :  { %v2817_v13 = vmax.f32 %v2689_v59, %v2753_v29  ;;  %v6782_v21 = vmax.f32 %v5494_v55, 0.0  ;;  %v1636_v48 = vadd.f32 %v5943_v34, %v3597_v41  ;;  %v2276_v20 = vadd.f32 %v5943_v34, %v3789_v28 }
 0x1bd   :  { %2883 = vst.msk [vmem:[%s6434_s3 + $0x118] sm:$0xff] %vm2847_vm4, %v2818_v60  ;;  %v2692_v39 = vmax.f32 %v6781_v25, %v2500_v32  ;;  %v6784_v62 = vmax.f32 %v6783_v61, 0.0  ;;  %v6786_v14 = vmax.f32 %v6785_v4, 0.0  ;;  %v1631_v55 = vadd.f32 %v5943_v34, %v1630_v46  ;;  %v3792_v61 = vpop.f32.mrb[104].mxu1  ;;  %v6790_v4 = vld [vmem:[#allocation23_spill] sm:$0xff] }
 0x1be   :  { %v2756_v12 = vmax.f32 %v6782_v21, %v2628_v10  ;;  %2882 = vst.msk [vmem:[%s6434_s3 + $0x110] sm:$0xff] %vm2847_vm4, %v2817_v13  ;;  %v2271_v19 = vadd.f32 %v5943_v34, %v2270_v17  ;;  %v2455_v41 = vmax.f32 %v6071_v42, 0.0  ;;  %v2502_v60 = vmax.f32 %v1636_v48, 0.0  ;;  %v3600_v21 = vpop.f32.mrb[104].mxu0  ;;  %v2280_v17 = vpop.f32.mrb[105].mxu1 }
 0x1bf   :  { %v2691_v59 = vmax.f32 %v6784_v62, %v2499_v27  ;;  %v2755_v29 = vmax.f32 %v6786_v14, %v2627_v6  ;;  %v2630_v32 = vmax.f32 %v2276_v20, 0.0  ;;  %v2501_v25 = vmax.f32 %v1631_v55, 0.0  ;;  %v1640_v20 = vpop.f32.mrb[105].mxu0  ;;  %v6792_v55 = vld [vmem:[#allocation18_spill] sm:$0xff] }
 0x1c0   :  { %v2820_v37 = vmax.f32 %v2692_v39, %v2756_v12  ;;  %v2629_v13 = vmax.f32 %v2271_v19, 0.0  ;;  %v6787_v27 = vmax.f32 %v5518_v15, 0.0  ;;  %v6788_v46 = vmax.f32 %v5522_v26, 0.0 }
 0x1c1   :  { %v2819_v28 = vmax.f32 %v2691_v59, %v2755_v29  ;;  %v1646_v12 = vadd.f32 %v5943_v34, %v3600_v21  ;;  %v2286_v48 = vadd.f32 %v5943_v34, %v3792_v61  ;;  %v6789_v62 = vmax.f32 %v5528_v22, 0.0  ;;  %v6793_v21 = vld [vmem:[#allocation19_spill] sm:$0xff] }
 0x1c2   :  { %2885 = vst.msk [vmem:[%s6434_s3 + $0x128] sm:$0xff] %vm2847_vm4, %v2820_v37  ;;  %v2694_v6 = vmax.f32 %v6787_v27, %v2502_v60  ;;  %v2758_v39 = vmax.f32 %v6788_v46, %v2630_v32  ;;  %v6791_v15 = vmax.f32 %v6790_v4, 0.0  ;;  %v1641_v26 = vadd.f32 %v5943_v34, %v1640_v20  ;;  %v3603_v27 = vpop.f32.mrb[106].mxu0 }
 0x1c3   :  { %2884 = vst.msk [vmem:[%s6434_s3 + $0x120] sm:$0xff] %vm2847_vm4, %v2819_v28  ;;  %v2693_v59 = vmax.f32 %v6789_v62, %v2501_v25  ;;  %v2281_v29 = vadd.f32 %v5943_v34, %v2280_v17  ;;  %v6143_v19 = vadd.f32 %v5943_v34, %v6792_v55  ;;  %v2504_v60 = vmax.f32 %v1646_v12, 0.0  ;;  %v1650_v17 = vpop.f32.mrb[107].mxu0  ;;  %v6800_v55 = vld [vmem:[#allocation22_spill] sm:$0xff] }
 0x1c4   :  { %v2757_v14 = vmax.f32 %v6791_v15, %v2629_v13  ;;  %v2822_v37 = vmax.f32 %v2694_v6, %v2758_v39  ;;  %v2632_v32 = vmax.f32 %v2286_v48, 0.0  ;;  %v6147_v28 = vadd.f32 %v5943_v34, %v6793_v21  ;;  %v3795_v13 = vpop.f32.mrb[106].mxu1 }
 0x1c5   :  { %v2503_v25 = vmax.f32 %v1641_v26, 0.0  ;;  %v2631_v61 = vmax.f32 %v2281_v29, 0.0  ;;  %v6794_v46 = vmax.f32 %v5546_v7, 0.0  ;;  %v6795_v6 = vmax.f32 %v5550_v5, 0.0  ;;  %v2290_v62 = vpop.f32.mrb[107].mxu1 }
 0x1c6   :  { %v2821_v22 = vmax.f32 %v2693_v59, %v2757_v14  ;;  %2887 = vst.msk [vmem:[%s6434_s3 + $0x138] sm:$0xff] %vm2847_vm4, %v2822_v37  ;;  %v1656_v12 = vadd.f32 %v5943_v34, %v3603_v27  ;;  %v2296_v48 = vadd.f32 %v5943_v34, %v3795_v13  ;;  %v6796_v59 = vld [vmem:[#allocation28_spill] sm:$0xff]  ;;  %v6798_v14 = vld [vmem:[#allocation30_spill] sm:$0xff]  ;;  %v1651_v5 = vadd.f32 %v5943_v34, %v1650_v17  ;;  %v6801_v27 = vld [vmem:[#allocation75_spill] sm:$0xff] }
 0x1c7   :  { %v2696_v20 = vmax.f32 %v6794_v46, %v2504_v60  ;;  %v2760_v39 = vmax.f32 %v6795_v6, %v2632_v32  ;;  %v6797_v4 = vmax.f32 %v6796_v59, 0.0  ;;  %v6799_v7 = vmax.f32 %v6798_v14, 0.0  ;;  %v3606_v6 = vpop.f32.mrb[108].mxu0  ;;  %v6802_v17 = vld [vmem:[#allocation31_spill] sm:$0xff] }
 0x1c8   :  { %2886 = vst.msk [vmem:[%s6434_s3 + $0x130] sm:$0xff] %vm2847_vm4, %v2821_v22  ;;  %v2291_v29 = vadd.f32 %v5943_v34, %v2290_v62  ;;  %v6171_v37 = vadd.f32 %v5943_v34, %v6800_v55  ;;  %v2506_v32 = vmax.f32 %v1656_v12, 0.0  ;;  %v2634_v21 = vmax.f32 %v2296_v48, 0.0 }
 0x1c9   :  { %v2695_v15 = vmax.f32 %v6797_v4, %v2503_v25  ;;  %v2759_v26 = vmax.f32 %v6799_v7, %v2631_v61  ;;  %v2824_v60 = vmax.f32 %v2696_v20, %v2760_v39  ;;  %v6175_v22 = vadd.f32 %v5943_v34, %v6801_v27  ;;  %v3798_v61 = vpop.f32.mrb[108].mxu1  ;;  %v6804_v20 = vld [vmem:[#allocation35_spill] sm:$0xff]  ;;  %v6806_v7 = vld [vmem:[#allocation36_spill] sm:$0xff] }
 0x1ca   :  { %v2505_v25 = vmax.f32 %v1651_v5, 0.0  ;;  %v2633_v46 = vmax.f32 %v2291_v29, 0.0  ;;  %v6803_v62 = vmax.f32 %v6802_v17, 0.0  ;;  %v6805_v39 = vmax.f32 %v6804_v20, 0.0  ;;  %v2300_v14 = vpop.f32.mrb[109].mxu1  ;;  %v6808_v29 = vld [vmem:[#allocation76_spill] sm:$0xff] }
 0x1cb   :  { %v2823_v13 = vmax.f32 %v2695_v15, %v2759_v26  ;;  %2889 = vst.msk [vmem:[%s6434_s3 + $0x148] sm:$0xff] %vm2847_vm4, %v2824_v60  ;;  %v1666_v48 = vadd.f32 %v5943_v34, %v3606_v6  ;;  %v2306_v4 = vadd.f32 %v5943_v34, %v3798_v61  ;;  %v1660_v15 = vpop.f32.mrb[109].mxu0  ;;  %v6807_v26 = vmax.f32 %v6806_v7, 0.0  ;;  %v3801_v7 = vpop.f32.mrb[110].mxu1 }
 0x1cc   :  { %v2698_v59 = vmax.f32 %v6803_v62, %v2506_v32  ;;  %v2762_v12 = vmax.f32 %v6805_v39, %v2634_v21  ;;  %v6809_v55 = vmax.f32 %v6808_v29, 0.0  ;;  %v1661_v32 = vadd.f32 %v5943_v34, %v1660_v15  ;;  %v3609_v10 = vpop.f32.mrb[110].mxu0  ;;  %v6814_v29 = vld [vmem:[#allocation81_spill] sm:$0xff] }
 0x1cd   :  { %2888 = vst.msk [vmem:[%s6434_s3 + $0x140] sm:$0xff] %vm2847_vm4, %v2823_v13  ;;  %v2697_v5 = vmax.f32 %v6807_v26, %v2505_v25  ;;  %v2301_v21 = vadd.f32 %v5943_v34, %v2300_v14  ;;  %v2508_v61 = vmax.f32 %v1666_v48, 0.0  ;;  %v2636_v17 = vmax.f32 %v2306_v4, 0.0  ;;  %v6810_v25 = vld [vmem:[#allocation77_spill] sm:$0xff]  ;;  %v6812_v14 = vld [vmem:[#allocation78_spill] sm:$0xff]  ;;  %v1670_v4 = vpop.f32.mrb[111].mxu0 }
 0x1ce   :  { %v2761_v60 = vmax.f32 %v6809_v55, %v2633_v46  ;;  %v2826_v6 = vmax.f32 %v2698_v59, %v2762_v12  ;;  %v2507_v39 = vmax.f32 %v1661_v32, 0.0  ;;  %v6811_v46 = vmax.f32 %v6810_v25, 0.0  ;;  %v6816_v32 = vld [vmem:[#allocation82_spill] sm:$0xff]  ;;  %v3612_v27 = vpop.f32.mrb[112].mxu0 }
 0x1cf   :  { %v2635_v13 = vmax.f32 %v2301_v21, 0.0  ;;  %v6813_v26 = vmax.f32 %v6812_v14, 0.0  ;;  %v1676_v12 = vadd.f32 %v5943_v34, %v3609_v10  ;;  %v2316_v48 = vadd.f32 %v5943_v34, %v3801_v7 }
 0x1d0   :  { %v2825_v20 = vmax.f32 %v2697_v5, %v2761_v60  ;;  %2891 = vst.msk [vmem:[%s6434_s3 + $0x158] sm:$0xff] %vm2847_vm4, %v2826_v6  ;;  %v2700_v15 = vmax.f32 %v6811_v46, %v2508_v61  ;;  %v2310_v5 = vpop.f32.mrb[111].mxu1  ;;  %v6815_v55 = vmax.f32 %v6814_v29, 0.0  ;;  %v6817_v21 = vmax.f32 %v6816_v32, 0.0  ;;  %v6822_v32 = vld [vmem:[#allocation87_spill] sm:$0xff] }
 0x1d1   :  { %v2764_v59 = vmax.f32 %v6813_v26, %v2636_v17  ;;  %v1671_v61 = vadd.f32 %v5943_v34, %v1670_v4  ;;  %v2311_v17 = vadd.f32 %v5943_v34, %v2310_v5  ;;  %v2457_v10 = vmax.f32 %v6171_v37, 0.0  ;;  %v3804_v29 = vpop.f32.mrb[112].mxu1  ;;  %v6820_v5 = vld [vmem:[#allocation86_spill] sm:$0xff] }
 0x1d2   :  { %2890 = vst.msk [vmem:[%s6434_s3 + $0x150] sm:$0xff] %vm2847_vm4, %v2825_v20  ;;  %v2699_v60 = vmax.f32 %v6815_v55, %v2507_v39  ;;  %v2763_v6 = vmax.f32 %v6817_v21, %v2635_v13  ;;  %v2510_v25 = vmax.f32 %v1676_v12, 0.0  ;;  %v2638_v46 = vmax.f32 %v2316_v48, 0.0  ;;  %v6818_v39 = vld [vmem:[#allocation85_spill] sm:$0xff]  ;;  %v1680_v48 = vpop.f32.mrb[113].mxu0 }
 0x1d3   :  { %v2828_v7 = vmax.f32 %v2700_v15, %v2764_v59  ;;  %v2585_v14 = vmax.f32 %v6175_v22, 0.0  ;;  %v2509_v62 = vmax.f32 %v1671_v61, 0.0  ;;  %v2637_v20 = vmax.f32 %v2311_v17, 0.0  ;;  %v6824_v61 = vld [vmem:[#allocation88_spill] sm:$0xff] }
 0x1d4   :  { %v2827_v26 = vmax.f32 %v2699_v60, %v2763_v6  ;;  %v6819_v13 = vmax.f32 %v6818_v39, 0.0  ;;  %v6821_v55 = vmax.f32 %v6820_v5, 0.0  ;;  %v1686_v59 = vadd.f32 %v5943_v34, %v3612_v27  ;;  %v2320_v60 = vpop.f32.mrb[113].mxu1  ;;  %v6826_v27 = vld [vmem:[#allocation24_spill] sm:$0xff] }
 0x1d5   :  { %2893 = vst.msk [vmem:[%s6434_s3 + $0x168] sm:$0xff] %vm2847_vm4, %v2828_v7  ;;  %v2326_v12 = vadd.f32 %v5943_v34, %v3804_v29  ;;  %v6823_v21 = vmax.f32 %v6822_v32, 0.0  ;;  %v6825_v17 = vmax.f32 %v6824_v61, 0.0  ;;  %v6243_v29 = vadd.f32 %v5943_v34, %v6826_v27  ;;  %v3615_v61 = vpop.f32.mrb[114].mxu0  ;;  %v6829_v27 = vld [vmem:[#allocation27_spill] sm:$0xff] }
 0x1d6   :  { %v2702_v4 = vmax.f32 %v6819_v13, %v2510_v25  ;;  %v2766_v15 = vmax.f32 %v6821_v55, %v2638_v46  ;;  %2892 = vst.msk [vmem:[%s6434_s3 + $0x160] sm:$0xff] %vm2847_vm4, %v2827_v26  ;;  %v1681_v25 = vadd.f32 %v5943_v34, %v1680_v48  ;;  %v2321_v46 = vadd.f32 %v5943_v34, %v2320_v60  ;;  %v6827_v55 = vld [vmem:[#allocation25_spill] sm:$0xff] }
 0x1d7   :  { %v2701_v6 = vmax.f32 %v6823_v21, %v2509_v62  ;;  %v2765_v7 = vmax.f32 %v6825_v17, %v2637_v20  ;;  %v2512_v13 = vmax.f32 %v1686_v59, 0.0  ;;  %v2640_v5 = vmax.f32 %v2326_v12, 0.0  ;;  %v3807_v20 = vpop.f32.mrb[114].mxu1  ;;  %v1690_v12 = vpop.f32.mrb[115].mxu0 }
 0x1d8   :  { %v2830_v39 = vmax.f32 %v2702_v4, %v2766_v15  ;;  %v6247_v26 = vadd.f32 %v5943_v34, %v6827_v55  ;;  %v2511_v62 = vmax.f32 %v1681_v25, 0.0  ;;  %v2639_v21 = vmax.f32 %v2321_v46, 0.0  ;;  %v2330_v60 = vpop.f32.mrb[115].mxu1  ;;  %v3618_v56 = vpop.f32.mrb[116].mxu0 }
 0x1d9   :  { %v2829_v32 = vmax.f32 %v2701_v6, %v2765_v7  ;;  %v2704_v48 = vmax.f32 %v2448_v9, %v2512_v13  ;;  %v2768_v4 = vmax.f32 %v2576_v49, %v2640_v5  ;;  %v1696_v15 = vadd.f32 %v5943_v34, %v3615_v61  ;;  %v6828_v49 = vld [vmem:[#allocation26_spill] sm:$0xff] }
 0x1da   :  { %2895 = vst.msk [vmem:[%s6434_s3 + $0x178] sm:$0xff] %vm2847_vm4, %v2830_v39  ;;  %v2336_v59 = vadd.f32 %v5943_v34, %v3807_v20  ;;  %v2703_v6 = vmax.f32 %v2447_v33, %v2511_v62  ;;  %v2767_v52 = vmax.f32 %v2575_v8, %v2639_v21  ;;  %v1691_v47 = vadd.f32 %v5943_v34, %v1690_v12  ;;  %v3810_v8 = vpop.f32.mrb[116].mxu1  ;;  %v1700_v21 = vpop.f32.mrb[117].mxu0 }
 0x1db   :  { %2894 = vst.msk [vmem:[%s6434_s3 + $0x170] sm:$0xff] %vm2847_vm4, %v2829_v32  ;;  %v2331_v9 = vadd.f32 %v5943_v34, %v2330_v60  ;;  %v6271_v17 = vadd.f32 %v5943_v34, %v6828_v49  ;;  %v2832_v7 = vmax.f32 %v2704_v48, %v2768_v4  ;;  %v2514_v25 = vmax.f32 %v1696_v15, 0.0  ;;  %v2340_v61 = vpop.f32.mrb[117].mxu1 }
 0x1dc   :  { %v2642_v46 = vmax.f32 %v2336_v59, 0.0  ;;  %v6275_v39 = vadd.f32 %v5943_v34, %v6829_v27  ;;  %v2831_v38 = vmax.f32 %v2703_v6, %v2767_v52  ;;  %v2513_v33 = vmax.f32 %v1691_v47, 0.0  ;;  %v3621_v52 = vpop.f32.mrb[118].mxu0  ;;  %v3813_v31 = vpop.f32.mrb[118].mxu1 }
 0x1dd   :  { %v2641_v13 = vmax.f32 %v2331_v9, 0.0  ;;  %2897 = vst.msk [vmem:[%s6434_s3 + $0x188] sm:$0xff] %vm2847_vm4, %v2832_v7  ;;  %v2706_v5 = vmax.f32 %v2450_v0, %v2514_v25  ;;  %v1706_v32 = vadd.f32 %v5943_v34, %v3618_v56  ;;  %v2346_v62 = vadd.f32 %v5943_v34, %v3810_v8  ;;  %v1710_v9 = vpop.f32.mrb[119].mxu0  ;;  %v2350_v49 = vpop.f32.mrb[119].mxu1 }
 0x1de   :  { %v2770_v55 = vmax.f32 %v2578_v18, %v2642_v46  ;;  %2896 = vst.msk [vmem:[%s6434_s3 + $0x180] sm:$0xff] %vm2847_vm4, %v2831_v38  ;;  %v2705_v20 = vmax.f32 %v2449_v53, %v2513_v33  ;;  %v1701_v44 = vadd.f32 %v5943_v34, %v1700_v21  ;;  %v2341_v0 = vadd.f32 %v5943_v34, %v2340_v61  ;;  %v3816_v43 = vpop.f32.mrb[120].mxu1 }
 0x1df   :  { %v2769_v51 = vmax.f32 %v2577_v57, %v2641_v13  ;;  %v2460_v18 = vmax.f32 %v6243_v29, 0.0  ;;  %v2516_v4 = vmax.f32 %v1706_v32, 0.0  ;;  %v2644_v15 = vmax.f32 %v2346_v62, 0.0 }
 0x1e0   :  { %v2834_v48 = vmax.f32 %v2706_v5, %v2770_v55  ;;  %v2588_v59 = vmax.f32 %v6247_v26, 0.0  ;;  %v2515_v60 = vmax.f32 %v1701_v44, 0.0  ;;  %v2643_v6 = vmax.f32 %v2341_v0, 0.0  ;;  %v3624_v5 = vpop.f32.mrb[120].mxu0 }
 0x1e1   :  { %v2833_v12 = vmax.f32 %v2705_v20, %v2769_v51  ;;  %v2708_v23 = vmax.f32 %v2452_v3, %v2516_v4  ;;  %v2772_v53 = vmax.f32 %v2580_v30, %v2644_v15  ;;  %v1716_v57 = vadd.f32 %v5943_v34, %v3621_v52  ;;  %v1720_v61 = vpop.f32.mrb[121].mxu0  ;;  %v2360_v20 = vpop.f32.mrb[121].mxu1  ;;  %v6835_v4 = vld [vmem:[#allocation79_spill] sm:$0xff]  ;;  %v6836_v52 = vld [vmem:[#allocation80_spill] sm:$0xff] }
 0x1e2   :  { %2899 = vst.msk [vmem:[%s6434_s3 + $0x198] sm:$0xff] %vm2847_vm4, %v2834_v48  ;;  %v2356_v47 = vadd.f32 %v5943_v34, %v3813_v31  ;;  %v2707_v7 = vmax.f32 %v2451_v16, %v2515_v60  ;;  %v6830_v24 = vmax.f32 %v5870_v1, 0.0  ;;  %v1711_v45 = vadd.f32 %v5943_v34, %v1710_v9 }
 0x1e3   :  { %2898 = vst.msk [vmem:[%s6434_s3 + $0x190] sm:$0xff] %vm2847_vm4, %v2833_v12  ;;  %v2351_v30 = vadd.f32 %v5943_v34, %v2350_v49  ;;  %v2459_v25 = vmax.f32 %v6271_v17, 0.0  ;;  %v2836_v46 = vmax.f32 %v2708_v23, %v2772_v53  ;;  %v2518_v27 = vmax.f32 %v1716_v57, 0.0  ;;  %v3819_v57 = vpop.f32.mrb[122].mxu1 }
 0x1e4   :  { %v2771_v3 = vmax.f32 %v6830_v24, %v2643_v6  ;;  %v2646_v38 = vmax.f32 %v2356_v47, 0.0  ;;  %v2587_v33 = vmax.f32 %v6275_v39, 0.0  ;;  %v2517_v56 = vmax.f32 %v1711_v45, 0.0 }
 0x1e5   :  { %v2645_v8 = vmax.f32 %v2351_v30, 0.0  ;;  %2901 = vst.msk [vmem:[%s6434_s3 + $0x1a8] sm:$0xff] %vm2847_vm4, %v2836_v46  ;;  %v6831_v1 = vmax.f32 %v5938_v54, 0.0  ;;  %v6832_v55 = vmax.f32 %v5947_v40, 0.0  ;;  %v1726_v62 = vadd.f32 %v5943_v34, %v3624_v5  ;;  %v6838_v30 = vld [vmem:[#allocation83_spill] sm:$0xff] }
 0x1e6   :  { %v2835_v13 = vmax.f32 %v2707_v7, %v2771_v3  ;;  %v2366_v21 = vadd.f32 %v5943_v34, %v3816_v43  ;;  %v6833_v51 = vmax.f32 %v5971_v2, 0.0  ;;  %v6834_v54 = vmax.f32 %v5975_v50, 0.0  ;;  %v3627_v50 = vpop.f32.mrb[122].mxu0  ;;  %v2370_v3 = vpop.f32.mrb[123].mxu1 }
 0x1e7   :  { %v2710_v16 = vmax.f32 %v6831_v1, %v2518_v27  ;;  %v2774_v32 = vmax.f32 %v6832_v55, %v2646_v38  ;;  %v1721_v40 = vadd.f32 %v5943_v34, %v1720_v61  ;;  %v2361_v48 = vadd.f32 %v5943_v34, %v2360_v20  ;;  %v1730_v24 = vpop.f32.mrb[123].mxu0  ;;  %v3822_v1 = vpop.f32.mrb[124].mxu1 }
 0x1e8   :  { %2900 = vst.msk [vmem:[%s6434_s3 + $0x1a0] sm:$0xff] %vm2847_vm4, %v2835_v13  ;;  %v2709_v44 = vmax.f32 %v6833_v51, %v2517_v56  ;;  %v2773_v0 = vmax.f32 %v6834_v54, %v2645_v8  ;;  %v6343_v15 = vadd.f32 %v5943_v34, %v6835_v4  ;;  %v2520_v60 = vmax.f32 %v1726_v62, 0.0  ;;  %v6839_v56 = vld [vmem:[#allocation84_spill] sm:$0xff]  ;;  %v2380_v20 = vpop.f32.mrb[125].mxu1 }
 0x1e9   :  { %v2838_v12 = vmax.f32 %v2710_v16, %v2774_v32  ;;  %v2648_v6 = vmax.f32 %v2366_v21, 0.0  ;;  %v6347_v31 = vadd.f32 %v5943_v34, %v6836_v52  ;;  %v2519_v23 = vmax.f32 %v1721_v40, 0.0  ;;  %v3825_v37 = vpop.f32.mrb[126].mxu1 }
 0x1ea   :  { %v2837_v2 = vmax.f32 %v2709_v44, %v2773_v0  ;;  %v2647_v53 = vmax.f32 %v2361_v48, 0.0  ;;  %v2712_v47 = vmax.f32 %v2456_v63, %v2520_v60  ;;  %v1736_v49 = vadd.f32 %v5943_v34, %v3627_v50 }
 0x1eb   :  { %2903 = vst.msk [vmem:[%s6434_s3 + $0x1b8] sm:$0xff] %vm2847_vm4, %v2838_v12  ;;  %v2776_v9 = vmax.f32 %v2584_v58, %v2648_v6  ;;  %v2376_v7 = vadd.f32 %v5943_v34, %v3819_v57  ;;  %v2711_v45 = vmax.f32 %v2455_v41, %v2519_v23  ;;  %v6837_v11 = vmax.f32 %v6075_v35, 0.0  ;;  %v3630_v41 = vpop.f32.mrb[124].mxu0 }
 0x1ec   :  { %2902 = vst.msk [vmem:[%s6434_s3 + $0x1b0] sm:$0xff] %vm2847_vm4, %v2837_v2  ;;  %v1731_v36 = vadd.f32 %v5943_v34, %v1730_v24  ;;  %v2371_v58 = vadd.f32 %v5943_v34, %v2370_v3  ;;  %v1431_v46 = vadd.f32 %v5943_v34, %v6838_v30  ;;  %v2522_v38 = vmax.f32 %v1736_v49, 0.0  ;;  %v1740_v61 = vpop.f32.mrb[125].mxu0  ;;  %v2390_v2 = vpop.f32.mrb[127].mxu1 }
 0x1ed   :  { %v2775_v63 = vmax.f32 %v6837_v11, %v2647_v53  ;;  %v2840_v27 = vmax.f32 %v2712_v47, %v2776_v9  ;;  %v2650_v13 = vmax.f32 %v2376_v7, 0.0  ;;  %v2071_v8 = vadd.f32 %v5943_v34, %v6839_v56  ;;  %v3633_v52 = vpop.f32.mrb[126].mxu0 }
 0x1ee   :  { %v2521_v43 = vmax.f32 %v1731_v36, 0.0  ;;  %v2649_v42 = vmax.f32 %v2371_v58, 0.0  ;;  %v6840_v35 = vmax.f32 %v6143_v19, 0.0  ;;  %v6841_v55 = vmax.f32 %v6147_v28, 0.0 }
 0x1ef   :  { %v2839_v5 = vmax.f32 %v2711_v45, %v2775_v63  ;;  %2905 = vst.msk [vmem:[%s6434_s3 + $0x1c8] sm:$0xff] %vm2847_vm4, %v2840_v27  ;;  %v1746_v62 = vadd.f32 %v5943_v34, %v3630_v41  ;;  %v2386_v21 = vadd.f32 %v5943_v34, %v3822_v1  ;;  %v1741_v28 = vadd.f32 %v5943_v34, %v1740_v61 }
 0x1f0   :  { %v2714_v16 = vmax.f32 %v6840_v35, %v2522_v38  ;;  %v2778_v32 = vmax.f32 %v6841_v55, %v2650_v13  ;;  %v2713_v51 = vmax.f32 %v2457_v10, %v2521_v43  ;;  %v2777_v19 = vmax.f32 %v2585_v14, %v2649_v42 }
 0x1f1   :  { %2904 = vst.msk [vmem:[%s6434_s3 + $0x1c0] sm:$0xff] %vm2847_vm4, %v2839_v5  ;;  %v2381_v44 = vadd.f32 %v5943_v34, %v2380_v20  ;;  %v2462_v54 = vmax.f32 %v6343_v15, 0.0  ;;  %v2524_v40 = vmax.f32 %v1746_v62, 0.0  ;;  %v2652_v48 = vmax.f32 %v2386_v21, 0.0 }
 0x1f2   :  { %v2842_v0 = vmax.f32 %v2714_v16, %v2778_v32  ;;  %v2590_v4 = vmax.f32 %v6347_v31, 0.0  ;;  %v2841_v12 = vmax.f32 %v2713_v51, %v2777_v19  ;;  %v2523_v60 = vmax.f32 %v1741_v28, 0.0  ;;  %v1750_v31 = vpop.f32.mrb[127].mxu0 }
 0x1f3   :  { %v2651_v6 = vmax.f32 %v2381_v44, 0.0  ;;  %v2716_v22 = vmax.f32 %v2460_v18, %v2524_v40  ;;  %v2780_v10 = vmax.f32 %v2588_v59, %v2652_v48  ;;  %v1756_v14 = vadd.f32 %v5943_v34, %v3633_v52 }
 0x1f4   :  { %2907 = vst.msk [vmem:[%s6434_s3 + $0x1d8] sm:$0xff] %vm2847_vm4, %v2842_v0  ;;  %v2396_v15 = vadd.f32 %v5943_v34, %v3825_v37  ;;  %2906 = vst.msk [vmem:[%s6434_s3 + $0x1d0] sm:$0xff] %vm2847_vm4, %v2841_v12  ;;  %v2715_v23 = vmax.f32 %v2459_v25, %v2523_v60  ;;  %v1751_v26 = vadd.f32 %v5943_v34, %v1750_v31  ;;  %v2461_v59 = vmax.f32 %v1431_v46, 0.0 }
 0x1f5   :  { %v2779_v29 = vmax.f32 %v2587_v33, %v2651_v6  ;;  %v2391_v18 = vadd.f32 %v5943_v34, %v2390_v2  ;;  %v2844_v53 = vmax.f32 %v2716_v22, %v2780_v10  ;;  %v2526_v50 = vmax.f32 %v1756_v14, 0.0 }
 0x1f6   :  { %v2654_v57 = vmax.f32 %v2396_v15, 0.0  ;;  %v2589_v47 = vmax.f32 %v2071_v8, 0.0  ;;  %v2525_v49 = vmax.f32 %v1751_v26, 0.0 }
 0x1f7   :  { %v2843_v9 = vmax.f32 %v2715_v23, %v2779_v29  ;;  %v2653_v7 = vmax.f32 %v2391_v18, 0.0  ;;  %2909 = vst.msk [vmem:[%s6434_s3 + $0x1e8] sm:$0xff] %vm2847_vm4, %v2844_v53  ;;  %v2718_v17 = vmax.f32 %v2462_v54, %v2526_v50 }
 0x1f8   :  { %v2782_v39 = vmax.f32 %v2590_v4, %v2654_v57  ;;  %v2717_v34 = vmax.f32 %v2461_v59, %v2525_v49 }
 0x1f9   :  { %2908 = vst.msk [vmem:[%s6434_s3 + $0x1e0] sm:$0xff] %vm2847_vm4, %v2843_v9  ;;  %v2781_v25 = vmax.f32 %v2589_v47, %v2653_v7 }
 0x1fa   :  { %v2846_v33 = vmax.f32 %v2718_v17, %v2782_v39 }
 0x1fb   :  { %v2845_v24 = vmax.f32 %v2717_v34, %v2781_v25 }
 0x1fc   :  { %2911 = vst.msk [vmem:[%s6434_s3 + $0x1f8] sm:$0xff] %vm2847_vm4, %v2846_v33 }
 0x1fd   :  { %2910 = vst.msk [vmem:[%s6434_s3 + $0x1f0] sm:$0xff] %vm2847_vm4, %v2845_v24 }

// kernel: smallcnn_forward.5
= control target key start
LH: loop header
LB: loop body
LE: loop exit
PB: predicated region body
PF: predicated region fallthrough
CT: control target
= control target key end

     0   :  { %v989_v0 = vmov 0.0|0.0   ;;  %vm167_vm0 = vcmask 130048   ;;  %vm857_vm1 = vcmask 261120   ;;  %s1759_s1 = inlined_call_operand.vmem [shape: f32[144,32], index: 1, kind: input, shape index: {}]   ;;  %s1760_s0 = inlined_call_operand.vmem [shape: f32[512,144], index: 0, kind: input, shape index: {}]   ;;  %s1761_s2 = inlined_call_operand.vmem [shape: f32[1,32], index: 2, kind: input, shape index: {}]   ;;  %s1762_s3 = inlined_call_operand.vmem [shape: f32[128,32], index: 3, kind: output, shape index: {}]  }
   0x1   :  { %943 = vmatprep.subr.bf16.mxu0 %v989_v0  ;;  %970 = vmatprep.subr.bf16.mxu1 %v989_v0  ;;  %v142_v1 = vld [vmem:[%s1759_s1] sm:$0xff]  ;;  %v143_v2 = vld [vmem:[%s1759_s1 + $0x8] sm:$0xff]  ;;  %v144_v3 = vld [vmem:[%s1759_s1 + $0x10] sm:$0xff] }
   0x2   :  { %v944_v4 = vpack.c.bf16 %v143_v2, %v142_v1  ;;  %v145_v5 = vld [vmem:[%s1759_s1 + $0x18] sm:$0xff]  ;;  %v146_v7 = vld [vmem:[%s1759_s1 + $0x20] sm:$0xff]  ;;  %v147_v8 = vld [vmem:[%s1759_s1 + $0x28] sm:$0xff] }
   0x3   :  { %v947_v6 = vpack.c.bf16 %v145_v5, %v144_v3  ;;  %v15_v9 = vld [vmem:[%s1760_s0 + $0x8] sm:$0xff]  ;;  %v950_v11 = vpack.c.bf16 %v147_v8, %v146_v7  ;;  %v148_v12 = vld [vmem:[%s1759_s1 + $0x30] sm:$0xff]  ;;  %v149_v13 = vld [vmem:[%s1759_s1 + $0x38] sm:$0xff] }
   0x4   :  { %945 = vmatpush1.bf16.msra.mxu0 %v944_v4  ;;  %979 = vmatpush1.bf16.msra.mxu1 %v944_v4  ;;  %v79_v10 = vld [vmem:[%s1760_s0 + $0x208] sm:$0xff]  ;;  %v953_v14 = vpack.c.bf16 %v149_v13, %v148_v12  ;;  %v150_v15 = vld [vmem:[%s1759_s1 + $0x40] sm:$0xff]  ;;  %v152_v18 = vld [vmem:[%s1759_s1 + $0x50] sm:$0xff] }
   0x5   :  { %946 = vmatprep.subr.bf16.mxu0 %v989_v0  ;;  %971 = vmatprep.subr.bf16.mxu1 %v989_v0  ;;  %v151_v16 = vld [vmem:[%s1759_s1 + $0x48] sm:$0xff]  ;;  %v153_v19 = vld [vmem:[%s1759_s1 + $0x58] sm:$0xff]  ;;  %v154_v21 = vld [vmem:[%s1759_s1 + $0x60] sm:$0xff] }
   0x6   :  { %879 = vmatprep.mubr.msk.f32.mxu0 %vm167_vm0, %v15_v9  ;;  %911 = vmatprep.mubr.msk.f32.mxu1 %vm167_vm0, %v79_v10  ;;  %v956_v17 = vpack.c.bf16 %v151_v16, %v150_v15  ;;  %v959_v20 = vpack.c.bf16 %v153_v19, %v152_v18  ;;  %v155_v22 = vld [vmem:[%s1759_s1 + $0x68] sm:$0xff]  ;;  %v156_v24 = vld [vmem:[%s1759_s1 + $0x70] sm:$0xff]  ;;  %v157_v25 = vld [vmem:[%s1759_s1 + $0x78] sm:$0xff] }
   0x7   :  { %v962_v23 = vpack.c.bf16 %v155_v22, %v154_v21  ;;  %v965_v26 = vpack.c.bf16 %v157_v25, %v156_v24  ;;  %v158_v27 = vld [vmem:[%s1759_s1 + $0x80] sm:$0xff]  ;;  %v159_v28 = vld [vmem:[%s1759_s1 + $0x88] sm:$0xff]  ;;  %v17_v32 = vld [vmem:[%s1760_s0 + $0x18] sm:$0xff] }
   0x8   :  { %948 = vmatpush1.bf16.msra.mxu0 %v947_v6  ;;  %980 = vmatpush1.bf16.msra.mxu1 %v947_v6  ;;  %v968_v29 = vpack.c.bf16 %v159_v28, %v158_v27  ;;  %v14_v30 = vld [vmem:[%s1760_s0] sm:$0xff]  ;;  %v81_v33 = vld [vmem:[%s1760_s0 + $0x218] sm:$0xff]  ;;  %v16_v34 = vld [vmem:[%s1760_s0 + $0x10] sm:$0xff] }
   0x9   :  { %949 = vmatprep.subr.bf16.mxu0 %v989_v0  ;;  %972 = vmatprep.subr.bf16.mxu1 %v989_v0  ;;  %v78_v31 = vld [vmem:[%s1760_s0 + $0x200] sm:$0xff]  ;;  %v80_v35 = vld [vmem:[%s1760_s0 + $0x210] sm:$0xff]  ;;  %v19_v36 = vld [vmem:[%s1760_s0 + $0x28] sm:$0xff] }
   0xa   :  { %v83_v37 = vld [vmem:[%s1760_s0 + $0x228] sm:$0xff]  ;;  %v18_v38 = vld [vmem:[%s1760_s0 + $0x20] sm:$0xff]  ;;  %v21_v40 = vld [vmem:[%s1760_s0 + $0x38] sm:$0xff] }
   0xb   :  { %v82_v39 = vld [vmem:[%s1760_s0 + $0x220] sm:$0xff]  ;;  %v85_v41 = vld [vmem:[%s1760_s0 + $0x238] sm:$0xff]  ;;  %v20_v42 = vld [vmem:[%s1760_s0 + $0x30] sm:$0xff] }
   0xc   :  { %951 = vmatpush1.bf16.msra.mxu0 %v950_v11  ;;  %981 = vmatpush1.bf16.msra.mxu1 %v950_v11  ;;  %v84_v43 = vld [vmem:[%s1760_s0 + $0x230] sm:$0xff]  ;;  %v23_v44 = vld [vmem:[%s1760_s0 + $0x48] sm:$0xff]  ;;  %v22_v46 = vld [vmem:[%s1760_s0 + $0x40] sm:$0xff] }
   0xd   :  { %952 = vmatprep.subr.bf16.mxu0 %v989_v0  ;;  %973 = vmatprep.subr.bf16.mxu1 %v989_v0  ;;  %v87_v45 = vld [vmem:[%s1760_s0 + $0x248] sm:$0xff]  ;;  %v86_v47 = vld [vmem:[%s1760_s0 + $0x240] sm:$0xff]  ;;  %v25_v48 = vld [vmem:[%s1760_s0 + $0x58] sm:$0xff] }
   0xe   :  { %v89_v49 = vld [vmem:[%s1760_s0 + $0x258] sm:$0xff]  ;;  %v24_v50 = vld [vmem:[%s1760_s0 + $0x50] sm:$0xff]  ;;  %v27_v52 = vld [vmem:[%s1760_s0 + $0x68] sm:$0xff] }
   0xf   :  { %v88_v51 = vld [vmem:[%s1760_s0 + $0x250] sm:$0xff]  ;;  %v91_v53 = vld [vmem:[%s1760_s0 + $0x268] sm:$0xff]  ;;  %v26_v54 = vld [vmem:[%s1760_s0 + $0x60] sm:$0xff] }
  0x10   :  { %954 = vmatpush1.bf16.msra.mxu0 %v953_v14  ;;  %982 = vmatpush1.bf16.msra.mxu1 %v953_v14  ;;  %v90_v55 = vld [vmem:[%s1760_s0 + $0x260] sm:$0xff]  ;;  %v29_v56 = vld [vmem:[%s1760_s0 + $0x78] sm:$0xff]  ;;  %v28_v58 = vld [vmem:[%s1760_s0 + $0x70] sm:$0xff] }
  0x11   :  { %955 = vmatprep.subr.bf16.mxu0 %v989_v0  ;;  %974 = vmatprep.subr.bf16.mxu1 %v989_v0  ;;  %v93_v57 = vld [vmem:[%s1760_s0 + $0x278] sm:$0xff]  ;;  %v92_v59 = vld [vmem:[%s1760_s0 + $0x270] sm:$0xff]  ;;  %v31_v60 = vld [vmem:[%s1760_s0 + $0x88] sm:$0xff] }
  0x12   :  { %v95_v61 = vld [vmem:[%s1760_s0 + $0x288] sm:$0xff]  ;;  %v30_v62 = vld [vmem:[%s1760_s0 + $0x80] sm:$0xff]  ;;  %v97_v1 = vld [vmem:[%s1760_s0 + $0x298] sm:$0xff] }
  0x13   :  { %v94_v63 = vld [vmem:[%s1760_s0 + $0x280] sm:$0xff]  ;;  %v32_v2 = vld [vmem:[%s1760_s0 + $0x90] sm:$0xff]  ;;  %v35_v4 = vld [vmem:[%s1760_s0 + $0xa8] sm:$0xff] }
  0x14   :  { %957 = vmatpush1.bf16.msra.mxu0 %v956_v17  ;;  %983 = vmatpush1.bf16.msra.mxu1 %v956_v17  ;;  %v96_v3 = vld [vmem:[%s1760_s0 + $0x290] sm:$0xff]  ;;  %v99_v5 = vld [vmem:[%s1760_s0 + $0x2a8] sm:$0xff]  ;;  %v34_v6 = vld [vmem:[%s1760_s0 + $0xa0] sm:$0xff] }
  0x15   :  { %958 = vmatprep.subr.bf16.mxu0 %v989_v0  ;;  %975 = vmatprep.subr.bf16.mxu1 %v989_v0  ;;  %v98_v7 = vld [vmem:[%s1760_s0 + $0x2a0] sm:$0xff]  ;;  %v37_v8 = vld [vmem:[%s1760_s0 + $0xb8] sm:$0xff]  ;;  %v36_v10 = vld [vmem:[%s1760_s0 + $0xb0] sm:$0xff] }
  0x16   :  { %v101_v9 = vld [vmem:[%s1760_s0 + $0x2b8] sm:$0xff]  ;;  %v100_v11 = vld [vmem:[%s1760_s0 + $0x2b0] sm:$0xff]  ;;  %v39_v12 = vld [vmem:[%s1760_s0 + $0xc8] sm:$0xff] }
  0x17   :  { %v103_v13 = vld [vmem:[%s1760_s0 + $0x2c8] sm:$0xff]  ;;  %v38_v14 = vld [vmem:[%s1760_s0 + $0xc0] sm:$0xff]  ;;  %v41_v16 = vld [vmem:[%s1760_s0 + $0xd8] sm:$0xff] }
  0x18   :  { %960 = vmatpush1.bf16.msra.mxu0 %v959_v20  ;;  %984 = vmatpush1.bf16.msra.mxu1 %v959_v20  ;;  %v102_v15 = vld [vmem:[%s1760_s0 + $0x2c0] sm:$0xff]  ;;  %v105_v17 = vld [vmem:[%s1760_s0 + $0x2d8] sm:$0xff]  ;;  %v40_v18 = vld [vmem:[%s1760_s0 + $0xd0] sm:$0xff] }
  0x19   :  { %961 = vmatprep.subr.bf16.mxu0 %v989_v0  ;;  %976 = vmatprep.subr.bf16.mxu1 %v989_v0  ;;  %v104_v19 = vld [vmem:[%s1760_s0 + $0x2d0] sm:$0xff]  ;;  %v43_v20 = vld [vmem:[%s1760_s0 + $0xe8] sm:$0xff]  ;;  %v42_v22 = vld [vmem:[%s1760_s0 + $0xe0] sm:$0xff] }
  0x1a   :  { %v107_v21 = vld [vmem:[%s1760_s0 + $0x2e8] sm:$0xff]  ;;  %v45_v24 = vld [vmem:[%s1760_s0 + $0xf8] sm:$0xff]  ;;  %v108_v27 = vld [vmem:[%s1760_s0 + $0x2f0] sm:$0xff] }
  0x1b   :  { %v109_v25 = vld [vmem:[%s1760_s0 + $0x2f8] sm:$0xff]  ;;  %v47_v28 = vld [vmem:[%s1760_s0 + $0x108] sm:$0xff] }
  0x1c   :  { %963 = vmatpush1.bf16.msra.mxu0 %v962_v23  ;;  %985 = vmatpush1.bf16.msra.mxu1 %v962_v23  ;;  %v106_v23 = vld [vmem:[%s1760_s0 + $0x2e0] sm:$0xff] }
  0x1d   :  { %964 = vmatprep.subr.bf16.mxu0 %v989_v0  ;;  %977 = vmatprep.subr.bf16.mxu1 %v989_v0 }
  0x20   :  { %966 = vmatpush1.bf16.msra.mxu0 %v965_v26  ;;  %986 = vmatpush1.bf16.msra.mxu1 %v965_v26  ;;  %v44_v26 = vld [vmem:[%s1760_s0 + $0xf0] sm:$0xff] }
  0x21   :  { %967 = vmatprep.subr.bf16.mxu0 %v989_v0  ;;  %978 = vmatprep.subr.bf16.mxu1 %v989_v0  ;;  %v33_v0 = vld [vmem:[%s1760_s0 + $0x98] sm:$0xff] }
  0x24   :  { %969 = vmatpush1.bf16.msra.mxu0 %v968_v29  ;;  %987 = vmatpush1.bf16.msra.mxu1 %v968_v29  ;;  %v111_v29 = vld [vmem:[%s1760_s0 + $0x308] sm:$0xff] }
  0x27   :  { %425 = vmatmul.mubr.f32.vlgmr.msra.gmra.mrb[0].mxu0 %v14_v30  ;;  %585 = vmatmul.mubr.f32.vlgmr.msra.gmra.mrb[0].mxu1 %v78_v31  ;;  %v46_v30 = vld [vmem:[%s1760_s0 + $0x100] sm:$0xff] }
  0x28   :  { %880 = vmatprep.mubr.msk.f32.mxu0 %vm167_vm0, %v17_v32  ;;  %912 = vmatprep.mubr.msk.f32.mxu1 %vm167_vm0, %v81_v33  ;;  %v110_v31 = vld [vmem:[%s1760_s0 + $0x300] sm:$0xff]  ;;  %v49_v32 = vld [vmem:[%s1760_s0 + $0x118] sm:$0xff] }
  0x29   :  { %v113_v33 = vld [vmem:[%s1760_s0 + $0x318] sm:$0xff] }
  0x2b   :  { %430 = vmatmul.mubr.f32.gmra.mrb[2].mxu0 %v16_v34  ;;  %590 = vmatmul.mubr.f32.gmra.mrb[2].mxu1 %v80_v35  ;;  %v48_v34 = vld [vmem:[%s1760_s0 + $0x110] sm:$0xff] }
  0x2c   :  { %881 = vmatprep.mubr.msk.f32.mxu0 %vm167_vm0, %v19_v36  ;;  %913 = vmatprep.mubr.msk.f32.mxu1 %vm167_vm0, %v83_v37  ;;  %v112_v35 = vld [vmem:[%s1760_s0 + $0x310] sm:$0xff]  ;;  %v51_v36 = vld [vmem:[%s1760_s0 + $0x128] sm:$0xff] }
  0x2d   :  { %v115_v37 = vld [vmem:[%s1760_s0 + $0x328] sm:$0xff] }
  0x2f   :  { %435 = vmatmul.mubr.f32.gmra.mrb[4].mxu0 %v18_v38  ;;  %595 = vmatmul.mubr.f32.gmra.mrb[4].mxu1 %v82_v39  ;;  %v50_v38 = vld [vmem:[%s1760_s0 + $0x120] sm:$0xff] }
  0x30   :  { %882 = vmatprep.mubr.msk.f32.mxu0 %vm167_vm0, %v21_v40  ;;  %914 = vmatprep.mubr.msk.f32.mxu1 %vm167_vm0, %v85_v41  ;;  %v114_v39 = vld [vmem:[%s1760_s0 + $0x320] sm:$0xff]  ;;  %v53_v40 = vld [vmem:[%s1760_s0 + $0x138] sm:$0xff] }
  0x31   :  { %v117_v41 = vld [vmem:[%s1760_s0 + $0x338] sm:$0xff] }
  0x33   :  { %440 = vmatmul.mubr.f32.gmra.mrb[6].mxu0 %v20_v42  ;;  %600 = vmatmul.mubr.f32.gmra.mrb[6].mxu1 %v84_v43  ;;  %v52_v42 = vld [vmem:[%s1760_s0 + $0x130] sm:$0xff] }
  0x34   :  { %883 = vmatprep.mubr.msk.f32.mxu0 %vm167_vm0, %v23_v44  ;;  %915 = vmatprep.mubr.msk.f32.mxu1 %vm167_vm0, %v87_v45  ;;  %v116_v43 = vld [vmem:[%s1760_s0 + $0x330] sm:$0xff]  ;;  %v55_v44 = vld [vmem:[%s1760_s0 + $0x148] sm:$0xff] }
  0x35   :  { %v119_v45 = vld [vmem:[%s1760_s0 + $0x348] sm:$0xff] }
  0x37   :  { %445 = vmatmul.mubr.f32.gmra.mrb[8].mxu0 %v22_v46  ;;  %605 = vmatmul.mubr.f32.gmra.mrb[8].mxu1 %v86_v47  ;;  %v54_v46 = vld [vmem:[%s1760_s0 + $0x140] sm:$0xff] }
  0x38   :  { %884 = vmatprep.mubr.msk.f32.mxu0 %vm167_vm0, %v25_v48  ;;  %916 = vmatprep.mubr.msk.f32.mxu1 %vm167_vm0, %v89_v49  ;;  %v118_v47 = vld [vmem:[%s1760_s0 + $0x340] sm:$0xff]  ;;  %v57_v48 = vld [vmem:[%s1760_s0 + $0x158] sm:$0xff] }
  0x39   :  { %v121_v49 = vld [vmem:[%s1760_s0 + $0x358] sm:$0xff] }
  0x3b   :  { %450 = vmatmul.mubr.f32.gmra.mrb[10].mxu0 %v24_v50  ;;  %610 = vmatmul.mubr.f32.gmra.mrb[10].mxu1 %v88_v51  ;;  %v56_v50 = vld [vmem:[%s1760_s0 + $0x150] sm:$0xff] }
  0x3c   :  { %885 = vmatprep.mubr.msk.f32.mxu0 %vm167_vm0, %v27_v52  ;;  %917 = vmatprep.mubr.msk.f32.mxu1 %vm167_vm0, %v91_v53  ;;  %v120_v51 = vld [vmem:[%s1760_s0 + $0x350] sm:$0xff]  ;;  %v59_v52 = vld [vmem:[%s1760_s0 + $0x168] sm:$0xff] }
  0x3d   :  { %v123_v53 = vld [vmem:[%s1760_s0 + $0x368] sm:$0xff] }
  0x3f   :  { %455 = vmatmul.mubr.f32.gmra.mrb[12].mxu0 %v26_v54  ;;  %615 = vmatmul.mubr.f32.gmra.mrb[12].mxu1 %v90_v55  ;;  %v58_v54 = vld [vmem:[%s1760_s0 + $0x160] sm:$0xff] }
  0x40   :  { %886 = vmatprep.mubr.msk.f32.mxu0 %vm167_vm0, %v29_v56  ;;  %918 = vmatprep.mubr.msk.f32.mxu1 %vm167_vm0, %v93_v57  ;;  %v122_v55 = vld [vmem:[%s1760_s0 + $0x360] sm:$0xff]  ;;  %v61_v56 = vld [vmem:[%s1760_s0 + $0x178] sm:$0xff] }
  0x41   :  { %v125_v57 = vld [vmem:[%s1760_s0 + $0x378] sm:$0xff] }
  0x43   :  { %460 = vmatmul.mubr.f32.gmra.mrb[14].mxu0 %v28_v58  ;;  %620 = vmatmul.mubr.f32.gmra.mrb[14].mxu1 %v92_v59  ;;  %v60_v58 = vld [vmem:[%s1760_s0 + $0x170] sm:$0xff] }
  0x44   :  { %887 = vmatprep.mubr.msk.f32.mxu0 %vm167_vm0, %v31_v60  ;;  %919 = vmatprep.mubr.msk.f32.mxu1 %vm167_vm0, %v95_v61  ;;  %v124_v59 = vld [vmem:[%s1760_s0 + $0x370] sm:$0xff]  ;;  %v63_v60 = vld [vmem:[%s1760_s0 + $0x188] sm:$0xff] }
  0x45   :  { %v127_v61 = vld [vmem:[%s1760_s0 + $0x388] sm:$0xff] }
  0x47   :  { %465 = vmatmul.mubr.f32.gmra.mrb[16].mxu0 %v30_v62  ;;  %625 = vmatmul.mubr.f32.gmra.mrb[16].mxu1 %v94_v63  ;;  %v62_v62 = vld [vmem:[%s1760_s0 + $0x180] sm:$0xff] }
  0x48   :  { %888 = vmatprep.mubr.msk.f32.mxu0 %vm167_vm0, %v33_v0  ;;  %920 = vmatprep.mubr.msk.f32.mxu1 %vm167_vm0, %v97_v1  ;;  %v126_v63 = vld [vmem:[%s1760_s0 + $0x380] sm:$0xff]  ;;  %v65_v0 = vld [vmem:[%s1760_s0 + $0x198] sm:$0xff] }
  0x49   :  { %v129_v1 = vld [vmem:[%s1760_s0 + $0x398] sm:$0xff] }
  0x4b   :  { %470 = vmatmul.mubr.f32.gmra.mrb[18].mxu0 %v32_v2  ;;  %630 = vmatmul.mubr.f32.gmra.mrb[18].mxu1 %v96_v3  ;;  %v64_v2 = vld [vmem:[%s1760_s0 + $0x190] sm:$0xff] }
  0x4c   :  { %889 = vmatprep.mubr.msk.f32.mxu0 %vm167_vm0, %v35_v4  ;;  %921 = vmatprep.mubr.msk.f32.mxu1 %vm167_vm0, %v99_v5  ;;  %v128_v3 = vld [vmem:[%s1760_s0 + $0x390] sm:$0xff]  ;;  %v67_v4 = vld [vmem:[%s1760_s0 + $0x1a8] sm:$0xff] }
  0x4d   :  { %v131_v5 = vld [vmem:[%s1760_s0 + $0x3a8] sm:$0xff] }
  0x4f   :  { %475 = vmatmul.mubr.f32.gmra.mrb[20].mxu0 %v34_v6  ;;  %635 = vmatmul.mubr.f32.gmra.mrb[20].mxu1 %v98_v7  ;;  %v66_v6 = vld [vmem:[%s1760_s0 + $0x1a0] sm:$0xff] }
  0x50   :  { %890 = vmatprep.mubr.msk.f32.mxu0 %vm167_vm0, %v37_v8  ;;  %922 = vmatprep.mubr.msk.f32.mxu1 %vm167_vm0, %v101_v9  ;;  %v130_v7 = vld [vmem:[%s1760_s0 + $0x3a0] sm:$0xff]  ;;  %v69_v8 = vld [vmem:[%s1760_s0 + $0x1b8] sm:$0xff] }
  0x51   :  { %v133_v9 = vld [vmem:[%s1760_s0 + $0x3b8] sm:$0xff] }
  0x53   :  { %480 = vmatmul.mubr.f32.gmra.mrb[22].mxu0 %v36_v10  ;;  %640 = vmatmul.mubr.f32.gmra.mrb[22].mxu1 %v100_v11  ;;  %v68_v10 = vld [vmem:[%s1760_s0 + $0x1b0] sm:$0xff] }
  0x54   :  { %891 = vmatprep.mubr.msk.f32.mxu0 %vm167_vm0, %v39_v12  ;;  %923 = vmatprep.mubr.msk.f32.mxu1 %vm167_vm0, %v103_v13  ;;  %v132_v11 = vld [vmem:[%s1760_s0 + $0x3b0] sm:$0xff]  ;;  %v71_v12 = vld [vmem:[%s1760_s0 + $0x1c8] sm:$0xff] }
  0x55   :  { %v135_v13 = vld [vmem:[%s1760_s0 + $0x3c8] sm:$0xff] }
  0x57   :  { %485 = vmatmul.mubr.f32.gmra.mrb[24].mxu0 %v38_v14  ;;  %645 = vmatmul.mubr.f32.gmra.mrb[24].mxu1 %v102_v15  ;;  %v70_v14 = vld [vmem:[%s1760_s0 + $0x1c0] sm:$0xff] }
  0x58   :  { %892 = vmatprep.mubr.msk.f32.mxu0 %vm167_vm0, %v41_v16  ;;  %924 = vmatprep.mubr.msk.f32.mxu1 %vm167_vm0, %v105_v17  ;;  %v134_v15 = vld [vmem:[%s1760_s0 + $0x3c0] sm:$0xff]  ;;  %v73_v16 = vld [vmem:[%s1760_s0 + $0x1d8] sm:$0xff] }
  0x59   :  { %v137_v17 = vld [vmem:[%s1760_s0 + $0x3d8] sm:$0xff] }
  0x5b   :  { %490 = vmatmul.mubr.f32.gmra.mrb[26].mxu0 %v40_v18  ;;  %650 = vmatmul.mubr.f32.gmra.mrb[26].mxu1 %v104_v19  ;;  %v72_v18 = vld [vmem:[%s1760_s0 + $0x1d0] sm:$0xff] }
  0x5c   :  { %893 = vmatprep.mubr.msk.f32.mxu0 %vm167_vm0, %v43_v20  ;;  %925 = vmatprep.mubr.msk.f32.mxu1 %vm167_vm0, %v107_v21  ;;  %v136_v19 = vld [vmem:[%s1760_s0 + $0x3d0] sm:$0xff]  ;;  %v75_v20 = vld [vmem:[%s1760_s0 + $0x1e8] sm:$0xff] }
  0x5d   :  { %v139_v21 = vld [vmem:[%s1760_s0 + $0x3e8] sm:$0xff] }
  0x5f   :  { %495 = vmatmul.mubr.f32.gmra.mrb[28].mxu0 %v42_v22  ;;  %655 = vmatmul.mubr.f32.gmra.mrb[28].mxu1 %v106_v23  ;;  %v74_v22 = vld [vmem:[%s1760_s0 + $0x1e0] sm:$0xff] }
  0x60   :  { %894 = vmatprep.mubr.msk.f32.mxu0 %vm167_vm0, %v45_v24  ;;  %926 = vmatprep.mubr.msk.f32.mxu1 %vm167_vm0, %v109_v25  ;;  %v138_v23 = vld [vmem:[%s1760_s0 + $0x3e0] sm:$0xff]  ;;  %v77_v24 = vld [vmem:[%s1760_s0 + $0x1f8] sm:$0xff] }
  0x61   :  { %v141_v25 = vld [vmem:[%s1760_s0 + $0x3f8] sm:$0xff] }
  0x63   :  { %500 = vmatmul.mubr.f32.gmra.mrb[30].mxu0 %v44_v26  ;;  %660 = vmatmul.mubr.f32.gmra.mrb[30].mxu1 %v108_v27  ;;  %v76_v26 = vld [vmem:[%s1760_s0 + $0x1f0] sm:$0xff] }
  0x64   :  { %895 = vmatprep.mubr.msk.f32.mxu0 %vm167_vm0, %v47_v28  ;;  %927 = vmatprep.mubr.msk.f32.mxu1 %vm167_vm0, %v111_v29  ;;  %v140_v27 = vld [vmem:[%s1760_s0 + $0x3f0] sm:$0xff] }
  0x67   :  { %505 = vmatmul.mubr.f32.gmra.mrb[32].mxu0 %v46_v30  ;;  %665 = vmatmul.mubr.f32.gmra.mrb[32].mxu1 %v110_v31 }
  0x68   :  { %896 = vmatprep.mubr.msk.f32.mxu0 %vm167_vm0, %v49_v32  ;;  %928 = vmatprep.mubr.msk.f32.mxu1 %vm167_vm0, %v113_v33 }
  0x6b   :  { %510 = vmatmul.mubr.f32.gmra.mrb[34].mxu0 %v48_v34  ;;  %670 = vmatmul.mubr.f32.gmra.mrb[34].mxu1 %v112_v35 }
  0x6c   :  { %897 = vmatprep.mubr.msk.f32.mxu0 %vm167_vm0, %v51_v36  ;;  %929 = vmatprep.mubr.msk.f32.mxu1 %vm167_vm0, %v115_v37 }
  0x6f   :  { %515 = vmatmul.mubr.f32.gmra.mrb[36].mxu0 %v50_v38  ;;  %675 = vmatmul.mubr.f32.gmra.mrb[36].mxu1 %v114_v39 }
  0x70   :  { %898 = vmatprep.mubr.msk.f32.mxu0 %vm167_vm0, %v53_v40  ;;  %930 = vmatprep.mubr.msk.f32.mxu1 %vm167_vm0, %v117_v41 }
  0x73   :  { %520 = vmatmul.mubr.f32.gmra.mrb[38].mxu0 %v52_v42  ;;  %680 = vmatmul.mubr.f32.gmra.mrb[38].mxu1 %v116_v43 }
  0x74   :  { %899 = vmatprep.mubr.msk.f32.mxu0 %vm167_vm0, %v55_v44  ;;  %931 = vmatprep.mubr.msk.f32.mxu1 %vm167_vm0, %v119_v45 }
  0x77   :  { %525 = vmatmul.mubr.f32.gmra.mrb[40].mxu0 %v54_v46  ;;  %685 = vmatmul.mubr.f32.gmra.mrb[40].mxu1 %v118_v47 }
  0x78   :  { %900 = vmatprep.mubr.msk.f32.mxu0 %vm167_vm0, %v57_v48  ;;  %932 = vmatprep.mubr.msk.f32.mxu1 %vm167_vm0, %v121_v49 }
  0x7b   :  { %530 = vmatmul.mubr.f32.gmra.mrb[42].mxu0 %v56_v50  ;;  %690 = vmatmul.mubr.f32.gmra.mrb[42].mxu1 %v120_v51 }
  0x7c   :  { %901 = vmatprep.mubr.msk.f32.mxu0 %vm167_vm0, %v59_v52  ;;  %933 = vmatprep.mubr.msk.f32.mxu1 %vm167_vm0, %v123_v53 }
  0x7f   :  { %535 = vmatmul.mubr.f32.gmra.mrb[44].mxu0 %v58_v54  ;;  %695 = vmatmul.mubr.f32.gmra.mrb[44].mxu1 %v122_v55 }
  0x80   :  { %902 = vmatprep.mubr.msk.f32.mxu0 %vm167_vm0, %v61_v56  ;;  %934 = vmatprep.mubr.msk.f32.mxu1 %vm167_vm0, %v125_v57 }
  0x83   :  { %540 = vmatmul.mubr.f32.gmra.mrb[46].mxu0 %v60_v58  ;;  %700 = vmatmul.mubr.f32.gmra.mrb[46].mxu1 %v124_v59 }
  0x84   :  { %903 = vmatprep.mubr.msk.f32.mxu0 %vm167_vm0, %v63_v60  ;;  %935 = vmatprep.mubr.msk.f32.mxu1 %vm167_vm0, %v127_v61 }
  0x87   :  { %545 = vmatmul.mubr.f32.gmra.mrb[48].mxu0 %v62_v62  ;;  %705 = vmatmul.mubr.f32.gmra.mrb[48].mxu1 %v126_v63 }
  0x88   :  { %904 = vmatprep.mubr.msk.f32.mxu0 %vm167_vm0, %v65_v0  ;;  %936 = vmatprep.mubr.msk.f32.mxu1 %vm167_vm0, %v129_v1 }
  0x8b   :  { %550 = vmatmul.mubr.f32.gmra.mrb[50].mxu0 %v64_v2  ;;  %710 = vmatmul.mubr.f32.gmra.mrb[50].mxu1 %v128_v3 }
  0x8c   :  { %905 = vmatprep.mubr.msk.f32.mxu0 %vm167_vm0, %v67_v4  ;;  %937 = vmatprep.mubr.msk.f32.mxu1 %vm167_vm0, %v131_v5 }
  0x8f   :  { %555 = vmatmul.mubr.f32.gmra.mrb[52].mxu0 %v66_v6  ;;  %715 = vmatmul.mubr.f32.gmra.mrb[52].mxu1 %v130_v7 }
  0x90   :  { %906 = vmatprep.mubr.msk.f32.mxu0 %vm167_vm0, %v69_v8  ;;  %938 = vmatprep.mubr.msk.f32.mxu1 %vm167_vm0, %v133_v9 }
  0x93   :  { %560 = vmatmul.mubr.f32.gmra.mrb[54].mxu0 %v68_v10  ;;  %720 = vmatmul.mubr.f32.gmra.mrb[54].mxu1 %v132_v11 }
  0x94   :  { %907 = vmatprep.mubr.msk.f32.mxu0 %vm167_vm0, %v71_v12  ;;  %939 = vmatprep.mubr.msk.f32.mxu1 %vm167_vm0, %v135_v13 }
  0x97   :  { %565 = vmatmul.mubr.f32.gmra.mrb[56].mxu0 %v70_v14  ;;  %725 = vmatmul.mubr.f32.gmra.mrb[56].mxu1 %v134_v15 }
  0x98   :  { %908 = vmatprep.mubr.msk.f32.mxu0 %vm167_vm0, %v73_v16  ;;  %940 = vmatprep.mubr.msk.f32.mxu1 %vm167_vm0, %v137_v17 }
  0x9b   :  { %570 = vmatmul.mubr.f32.gmra.mrb[58].mxu0 %v72_v18  ;;  %730 = vmatmul.mubr.f32.gmra.mrb[58].mxu1 %v136_v19 }
  0x9c   :  { %909 = vmatprep.mubr.msk.f32.mxu0 %vm167_vm0, %v75_v20  ;;  %941 = vmatprep.mubr.msk.f32.mxu1 %vm167_vm0, %v139_v21 }
  0x9f   :  { %575 = vmatmul.mubr.f32.gmra.mrb[60].mxu0 %v74_v22  ;;  %735 = vmatmul.mubr.f32.gmra.mrb[60].mxu1 %v138_v23 }
  0xa0   :  { %910 = vmatprep.mubr.msk.f32.mxu0 %vm167_vm0, %v77_v24  ;;  %942 = vmatprep.mubr.msk.f32.mxu1 %vm167_vm0, %v141_v25  ;;  %v1593_v24 = vld [vmem:[%s1761_s2] ss:$0 sm:$0xff] }
  0xa3   :  { %580 = vmatmul.mubr.f32.gmra.mrb[62].mxu0 %v76_v26  ;;  %740 = vmatmul.mubr.f32.gmra.mrb[62].mxu1 %v140_v27 }
  0xfa   :  { %v1530_v28 = vpop.f32.mrb[0].mxu0  ;;  %v1532_v29 = vpop.f32.mrb[0].mxu1 }
  0xfb   :  { %v428_v30 = vpop.f32.mrb[1].mxu0  ;;  %v588_v31 = vpop.f32.mrb[1].mxu1 }
  0xfc   :  { %v427_v31 = vadd.f32 %v1593_v24, %v1530_v28 }
  0xfe   :  { %v1534_v32 = vpop.f32.mrb[2].mxu0  ;;  %v1536_v33 = vpop.f32.mrb[2].mxu1 }
  0xff   :  { %v433_v34 = vpop.f32.mrb[3].mxu0  ;;  %v593_v35 = vpop.f32.mrb[3].mxu1 }
 0x100   :  { %v587_v34 = vadd.f32 %v1593_v24, %v1532_v29 }
 0x102   :  { %v1538_v36 = vpop.f32.mrb[4].mxu0  ;;  %v1540_v37 = vpop.f32.mrb[4].mxu1 }
 0x103   :  { %v438_v38 = vpop.f32.mrb[5].mxu0  ;;  %v598_v39 = vpop.f32.mrb[5].mxu1 }
 0x106   :  { %v1542_v40 = vpop.f32.mrb[6].mxu0  ;;  %v1544_v41 = vpop.f32.mrb[6].mxu1 }
 0x107   :  { %v443_v42 = vpop.f32.mrb[7].mxu0  ;;  %v603_v43 = vpop.f32.mrb[7].mxu1 }
 0x10a   :  { %v1546_v44 = vpop.f32.mrb[8].mxu0  ;;  %v1548_v45 = vpop.f32.mrb[8].mxu1 }
 0x10b   :  { %v448_v46 = vpop.f32.mrb[9].mxu0  ;;  %v608_v47 = vpop.f32.mrb[9].mxu1 }
 0x10c   :  { %v745_v47 = vmax.f32 %v427_v31, 0.0 }
 0x10e   :  { %v1550_v48 = vpop.f32.mrb[10].mxu0  ;;  %v1552_v49 = vpop.f32.mrb[10].mxu1 }
 0x10f   :  { %v453_v50 = vpop.f32.mrb[11].mxu0  ;;  %v613_v51 = vpop.f32.mrb[11].mxu1 }
 0x110   :  { %v432_v50 = vadd.f32 %v1593_v24, %v1534_v32  ;;  %v777_v51 = vmax.f32 %v587_v34, 0.0  ;;  %v437_v32 = vadd.f32 %v1593_v24, %v1538_v36 }
 0x112   :  { %v1554_v52 = vpop.f32.mrb[12].mxu0  ;;  %v1556_v53 = vpop.f32.mrb[12].mxu1  ;;  %v747_v31 = vmax.f32 %v437_v32, 0.0 }
 0x113   :  { %v458_v54 = vpop.f32.mrb[13].mxu0  ;;  %v618_v55 = vpop.f32.mrb[13].mxu1 }
 0x114   :  { %v592_v54 = vadd.f32 %v1593_v24, %v1536_v33 }
 0x116   :  { %v1558_v56 = vpop.f32.mrb[14].mxu0  ;;  %v1560_v57 = vpop.f32.mrb[14].mxu1  ;;  %v778_v33 = vmax.f32 %v592_v54, 0.0 }
 0x117   :  { %v463_v58 = vpop.f32.mrb[15].mxu0  ;;  %v623_v59 = vpop.f32.mrb[15].mxu1 }
 0x11a   :  { %v1562_v60 = vpop.f32.mrb[16].mxu0  ;;  %v1564_v61 = vpop.f32.mrb[16].mxu1 }
 0x11b   :  { %v468_v62 = vpop.f32.mrb[17].mxu0  ;;  %v628_v63 = vpop.f32.mrb[17].mxu1 }
 0x11e   :  { %v1566_v0 = vpop.f32.mrb[18].mxu0  ;;  %v1568_v1 = vpop.f32.mrb[18].mxu1 }
 0x11f   :  { %v473_v2 = vpop.f32.mrb[19].mxu0  ;;  %v633_v3 = vpop.f32.mrb[19].mxu1 }
 0x122   :  { %v1570_v4 = vpop.f32.mrb[20].mxu0  ;;  %v1572_v5 = vpop.f32.mrb[20].mxu1 }
 0x123   :  { %v478_v6 = vpop.f32.mrb[21].mxu0  ;;  %v638_v7 = vpop.f32.mrb[21].mxu1 }
 0x124   :  { %v746_v7 = vmax.f32 %v432_v50, 0.0 }
 0x126   :  { %v1574_v8 = vpop.f32.mrb[22].mxu0  ;;  %v1576_v9 = vpop.f32.mrb[22].mxu1 }
 0x127   :  { %v483_v10 = vpop.f32.mrb[23].mxu0  ;;  %v643_v11 = vpop.f32.mrb[23].mxu1 }
 0x128   :  { %v597_v10 = vadd.f32 %v1593_v24, %v1540_v37 }
 0x12a   :  { %v1578_v12 = vpop.f32.mrb[24].mxu0  ;;  %v1580_v13 = vpop.f32.mrb[24].mxu1  ;;  %v779_v34 = vmax.f32 %v597_v10, 0.0 }
 0x12b   :  { %v488_v14 = vpop.f32.mrb[25].mxu0  ;;  %v648_v15 = vpop.f32.mrb[25].mxu1 }
 0x12e   :  { %v1582_v16 = vpop.f32.mrb[26].mxu0  ;;  %v1584_v17 = vpop.f32.mrb[26].mxu1 }
 0x12f   :  { %v493_v18 = vpop.f32.mrb[27].mxu0  ;;  %v653_v19 = vpop.f32.mrb[27].mxu1 }
 0x132   :  { %v1586_v20 = vpop.f32.mrb[28].mxu0  ;;  %v1588_v21 = vpop.f32.mrb[28].mxu1 }
 0x133   :  { %v498_v22 = vpop.f32.mrb[29].mxu0  ;;  %v658_v23 = vpop.f32.mrb[29].mxu1 }
 0x136   :  { %v1595_v25 = vpop.f32.mrb[30].mxu0  ;;  %v1597_v26 = vpop.f32.mrb[30].mxu1 }
 0x137   :  { %v503_v27 = vpop.f32.mrb[31].mxu0  ;;  %v663_v30 = vpop.f32.mrb[31].mxu1 }
 0x13a   :  { %v506_v35 = vpop.f32.mrb[32].mxu0  ;;  %v666_v38 = vpop.f32.mrb[32].mxu1 }
 0x13b   :  { %v507_v39 = vadd.f32 %v1593_v24, %v506_v35  ;;  %v667_v42 = vadd.f32 %v1593_v24, %v666_v38  ;;  %v508_v43 = vpop.f32.mrb[33].mxu0  ;;  %v668_v46 = vpop.f32.mrb[33].mxu1  ;;  %v442_v35 = vadd.f32 %v1593_v24, %v1542_v40  ;;  %v602_v38 = vadd.f32 %v1593_v24, %v1544_v41 }
 0x13c   :  { %v447_v41 = vadd.f32 %v1593_v24, %v1546_v44 }
 0x13d   :  { %v761_v28 = vmax.f32 %v507_v39, 0.0  ;;  %v793_v55 = vmax.f32 %v667_v42, 0.0 }
 0x13e   :  { %v511_v58 = vpop.f32.mrb[34].mxu0  ;;  %v671_v29 = vpop.f32.mrb[34].mxu1 }
 0x13f   :  { %v809_v59 = vmax.f32 %v745_v47, %v761_v28  ;;  %v825_v62 = vmax.f32 %v777_v51, %v793_v55  ;;  %v512_v63 = vadd.f32 %v1593_v24, %v511_v58  ;;  %v672_v2 = vadd.f32 %v1593_v24, %v671_v29  ;;  %v513_v3 = vpop.f32.mrb[35].mxu0  ;;  %v673_v6 = vpop.f32.mrb[35].mxu1 }
 0x140   :  { %v748_v58 = vmax.f32 %v442_v35, 0.0  ;;  %v607_v29 = vadd.f32 %v1593_v24, %v1548_v45  ;;  %v749_v45 = vmax.f32 %v447_v41, 0.0 }
 0x141   :  { %v841_v11 = vmax.f32 %v809_v59, %v825_v62  ;;  %v762_v14 = vmax.f32 %v512_v63, 0.0  ;;  %v794_v15 = vmax.f32 %v672_v2, 0.0  ;;  %v780_v59 = vmax.f32 %v602_v38, 0.0 }
 0x142   :  { %v516_v18 = vpop.f32.mrb[36].mxu0  ;;  %v676_v19 = vpop.f32.mrb[36].mxu1 }
 0x143   :  { %858 = vst.msk [vmem:[%s1762_s3] sm:$0xff] %vm857_vm1, %v841_v11  ;;  %v810_v22 = vmax.f32 %v746_v7, %v762_v14  ;;  %v826_v23 = vmax.f32 %v778_v33, %v794_v15  ;;  %v517_v27 = vadd.f32 %v1593_v24, %v516_v18  ;;  %v677_v36 = vadd.f32 %v1593_v24, %v676_v19  ;;  %v518_v30 = vpop.f32.mrb[37].mxu0  ;;  %v678_v37 = vpop.f32.mrb[37].mxu1 }
 0x144   :  { %v781_v14 = vmax.f32 %v607_v29, 0.0  ;;  %v452_v15 = vadd.f32 %v1593_v24, %v1550_v48  ;;  %v612_v18 = vadd.f32 %v1593_v24, %v1552_v49  ;;  %v457_v49 = vadd.f32 %v1593_v24, %v1554_v52 }
 0x145   :  { %v842_v39 = vmax.f32 %v810_v22, %v826_v23  ;;  %v763_v42 = vmax.f32 %v517_v27, 0.0  ;;  %v795_v43 = vmax.f32 %v677_v36, 0.0  ;;  %v462_v29 = vadd.f32 %v1593_v24, %v1558_v56 }
 0x146   :  { %v521_v46 = vpop.f32.mrb[38].mxu0  ;;  %v681_v47 = vpop.f32.mrb[38].mxu1  ;;  %v750_v38 = vmax.f32 %v452_v15, 0.0 }
 0x147   :  { %859 = vst.msk [vmem:[%s1762_s3 + $0x8] sm:$0xff] %vm857_vm1, %v842_v39  ;;  %v811_v50 = vmax.f32 %v747_v31, %v763_v42  ;;  %v827_v51 = vmax.f32 %v779_v34, %v795_v43  ;;  %v522_v54 = vadd.f32 %v1593_v24, %v521_v46  ;;  %v682_v28 = vadd.f32 %v1593_v24, %v681_v47  ;;  %v523_v40 = vpop.f32.mrb[39].mxu0  ;;  %v683_v55 = vpop.f32.mrb[39].mxu1 }
 0x148   :  { %v617_v39 = vadd.f32 %v1593_v24, %v1556_v53  ;;  %v782_v42 = vmax.f32 %v612_v18, 0.0  ;;  %v751_v53 = vmax.f32 %v457_v49, 0.0 }
 0x149   :  { %v843_v62 = vmax.f32 %v811_v50, %v827_v51  ;;  %v764_v63 = vmax.f32 %v522_v54, 0.0  ;;  %v796_v2 = vmax.f32 %v682_v28, 0.0 }
 0x14a   :  { %v526_v3 = vpop.f32.mrb[40].mxu0  ;;  %v686_v6 = vpop.f32.mrb[40].mxu1  ;;  %v783_v41 = vmax.f32 %v617_v39, 0.0 }
 0x14b   :  { %860 = vst.msk [vmem:[%s1762_s3 + $0x10] sm:$0xff] %vm857_vm1, %v843_v62  ;;  %v812_v7 = vmax.f32 %v748_v58, %v764_v63  ;;  %v828_v32 = vmax.f32 %v780_v59, %v796_v2  ;;  %v527_v10 = vadd.f32 %v1593_v24, %v526_v3  ;;  %v687_v44 = vadd.f32 %v1593_v24, %v686_v6  ;;  %v528_v33 = vpop.f32.mrb[41].mxu0  ;;  %v688_v11 = vpop.f32.mrb[41].mxu1 }
 0x14c   :  { %v622_v59 = vadd.f32 %v1593_v24, %v1560_v57  ;;  %v752_v11 = vmax.f32 %v462_v29, 0.0  ;;  %v467_v57 = vadd.f32 %v1593_v24, %v1562_v60 }
 0x14d   :  { %v844_v19 = vmax.f32 %v812_v7, %v828_v32  ;;  %v765_v22 = vmax.f32 %v527_v10, 0.0  ;;  %v797_v23 = vmax.f32 %v687_v44, 0.0 }
 0x14e   :  { %v531_v27 = vpop.f32.mrb[42].mxu0  ;;  %v691_v36 = vpop.f32.mrb[42].mxu1 }
 0x14f   :  { %861 = vst.msk [vmem:[%s1762_s3 + $0x18] sm:$0xff] %vm857_vm1, %v844_v19  ;;  %v813_v30 = vmax.f32 %v749_v45, %v765_v22  ;;  %v829_v37 = vmax.f32 %v781_v14, %v797_v23  ;;  %v532_v31 = vadd.f32 %v1593_v24, %v531_v27  ;;  %v692_v34 = vadd.f32 %v1593_v24, %v691_v36  ;;  %v533_v48 = vpop.f32.mrb[43].mxu0  ;;  %v693_v35 = vpop.f32.mrb[43].mxu1 }
 0x150   :  { %v627_v45 = vadd.f32 %v1593_v24, %v1564_v61  ;;  %v784_v14 = vmax.f32 %v622_v59, 0.0  ;;  %v753_v61 = vmax.f32 %v467_v57, 0.0  ;;  %v472_v48 = vadd.f32 %v1593_v24, %v1566_v0 }
 0x151   :  { %v845_v43 = vmax.f32 %v813_v30, %v829_v37  ;;  %v766_v46 = vmax.f32 %v532_v31, 0.0  ;;  %v798_v47 = vmax.f32 %v692_v34, 0.0  ;;  %v632_v35 = vadd.f32 %v1593_v24, %v1568_v1 }
 0x152   :  { %v536_v50 = vpop.f32.mrb[44].mxu0  ;;  %v696_v51 = vpop.f32.mrb[44].mxu1  ;;  %v785_v34 = vmax.f32 %v627_v45, 0.0  ;;  %v477_v1 = vadd.f32 %v1593_v24, %v1570_v4 }
 0x153   :  { %862 = vst.msk [vmem:[%s1762_s3 + $0x20] sm:$0xff] %vm857_vm1, %v845_v43  ;;  %v814_v54 = vmax.f32 %v750_v38, %v766_v46  ;;  %v830_v28 = vmax.f32 %v782_v42, %v798_v47  ;;  %v537_v40 = vadd.f32 %v1593_v24, %v536_v50  ;;  %v697_v52 = vadd.f32 %v1593_v24, %v696_v51  ;;  %v538_v55 = vpop.f32.mrb[45].mxu0  ;;  %v698_v58 = vpop.f32.mrb[45].mxu1 }
 0x155   :  { %v846_v62 = vmax.f32 %v814_v54, %v830_v28  ;;  %v767_v63 = vmax.f32 %v537_v40, 0.0  ;;  %v799_v2 = vmax.f32 %v697_v52, 0.0  ;;  %v754_v28 = vmax.f32 %v472_v48, 0.0 }
 0x156   :  { %v541_v3 = vpop.f32.mrb[46].mxu0  ;;  %v701_v6 = vpop.f32.mrb[46].mxu1  ;;  %v637_v40 = vadd.f32 %v1593_v24, %v1572_v5  ;;  %v786_v52 = vmax.f32 %v632_v35, 0.0  ;;  %v755_v5 = vmax.f32 %v477_v1, 0.0 }
 0x157   :  { %863 = vst.msk [vmem:[%s1762_s3 + $0x28] sm:$0xff] %vm857_vm1, %v846_v62  ;;  %v815_v7 = vmax.f32 %v751_v53, %v767_v63  ;;  %v831_v32 = vmax.f32 %v783_v41, %v799_v2  ;;  %v542_v10 = vadd.f32 %v1593_v24, %v541_v3  ;;  %v702_v44 = vadd.f32 %v1593_v24, %v701_v6  ;;  %v543_v56 = vpop.f32.mrb[47].mxu0  ;;  %v703_v33 = vpop.f32.mrb[47].mxu1 }
 0x158   :  { %v787_v6 = vmax.f32 %v637_v40, 0.0 }
 0x159   :  { %v847_v15 = vmax.f32 %v815_v7, %v831_v32  ;;  %v768_v18 = vmax.f32 %v542_v10, 0.0  ;;  %v800_v19 = vmax.f32 %v702_v44, 0.0  ;;  %v482_v7 = vadd.f32 %v1593_v24, %v1574_v8 }
 0x15a   :  { %v546_v22 = vpop.f32.mrb[48].mxu0  ;;  %v706_v23 = vpop.f32.mrb[48].mxu1  ;;  %v642_v32 = vadd.f32 %v1593_v24, %v1576_v9  ;;  %v487_v9 = vadd.f32 %v1593_v24, %v1578_v12 }
 0x15b   :  { %864 = vst.msk [vmem:[%s1762_s3 + $0x30] sm:$0xff] %vm857_vm1, %v847_v15  ;;  %v816_v27 = vmax.f32 %v752_v11, %v768_v18  ;;  %v832_v36 = vmax.f32 %v784_v14, %v800_v19  ;;  %v547_v30 = vadd.f32 %v1593_v24, %v546_v22  ;;  %v707_v60 = vadd.f32 %v1593_v24, %v706_v23  ;;  %v548_v37 = vpop.f32.mrb[49].mxu0  ;;  %v708_v31 = vpop.f32.mrb[49].mxu1 }
 0x15c   :  { %v756_v19 = vmax.f32 %v482_v7, 0.0  ;;  %v647_v22 = vadd.f32 %v1593_v24, %v1580_v13  ;;  %v788_v23 = vmax.f32 %v642_v32, 0.0  ;;  %v757_v13 = vmax.f32 %v487_v9, 0.0 }
 0x15d   :  { %v848_v38 = vmax.f32 %v816_v27, %v832_v36  ;;  %v769_v49 = vmax.f32 %v547_v30, 0.0  ;;  %v801_v39 = vmax.f32 %v707_v60, 0.0  ;;  %v662_v7 = vadd.f32 %v1593_v24, %v1597_v26 }
 0x15e   :  { %v551_v42 = vpop.f32.mrb[50].mxu0  ;;  %v711_v43 = vpop.f32.mrb[50].mxu1 }
 0x15f   :  { %865 = vst.msk [vmem:[%s1762_s3 + $0x38] sm:$0xff] %vm857_vm1, %v848_v38  ;;  %v817_v46 = vmax.f32 %v753_v61, %v769_v49  ;;  %v833_v47 = vmax.f32 %v785_v34, %v801_v39  ;;  %v552_v50 = vadd.f32 %v1593_v24, %v551_v42  ;;  %v712_v51 = vadd.f32 %v1593_v24, %v711_v43  ;;  %v553_v0 = vpop.f32.mrb[51].mxu0  ;;  %v713_v54 = vpop.f32.mrb[51].mxu1 }
 0x160   :  { %v789_v38 = vmax.f32 %v647_v22, 0.0  ;;  %v492_v49 = vadd.f32 %v1593_v24, %v1582_v16  ;;  %v652_v39 = vadd.f32 %v1593_v24, %v1584_v17  ;;  %v497_v17 = vadd.f32 %v1593_v24, %v1586_v20 }
 0x161   :  { %v849_v55 = vmax.f32 %v817_v46, %v833_v47  ;;  %v770_v58 = vmax.f32 %v552_v50, 0.0  ;;  %v802_v53 = vmax.f32 %v712_v51, 0.0  ;;  %v792_v26 = vmax.f32 %v662_v7, 0.0 }
 0x162   :  { %v556_v41 = vpop.f32.mrb[52].mxu0  ;;  %v716_v29 = vpop.f32.mrb[52].mxu1  ;;  %v758_v40 = vmax.f32 %v492_v49, 0.0 }
 0x163   :  { %866 = vst.msk [vmem:[%s1762_s3 + $0x40] sm:$0xff] %vm857_vm1, %v849_v55  ;;  %v818_v59 = vmax.f32 %v754_v28, %v770_v58  ;;  %v834_v62 = vmax.f32 %v786_v52, %v802_v53  ;;  %v557_v63 = vadd.f32 %v1593_v24, %v556_v41  ;;  %v717_v4 = vadd.f32 %v1593_v24, %v716_v29  ;;  %v558_v2 = vpop.f32.mrb[53].mxu0  ;;  %v718_v3 = vpop.f32.mrb[53].mxu1 }
 0x164   :  { %v657_v52 = vadd.f32 %v1593_v24, %v1588_v21  ;;  %v790_v55 = vmax.f32 %v652_v39, 0.0  ;;  %v759_v21 = vmax.f32 %v497_v17, 0.0 }
 0x165   :  { %v850_v10 = vmax.f32 %v818_v59, %v834_v62  ;;  %v771_v44 = vmax.f32 %v557_v63, 0.0  ;;  %v803_v56 = vmax.f32 %v717_v4, 0.0 }
 0x166   :  { %v561_v33 = vpop.f32.mrb[54].mxu0  ;;  %v721_v11 = vpop.f32.mrb[54].mxu1 }
 0x167   :  { %867 = vst.msk [vmem:[%s1762_s3 + $0x48] sm:$0xff] %vm857_vm1, %v850_v10  ;;  %v819_v57 = vmax.f32 %v755_v5, %v771_v44  ;;  %v835_v45 = vmax.f32 %v787_v6, %v803_v56  ;;  %v562_v14 = vadd.f32 %v1593_v24, %v561_v33  ;;  %v722_v15 = vadd.f32 %v1593_v24, %v721_v11  ;;  %v563_v8 = vpop.f32.mrb[55].mxu0  ;;  %v723_v18 = vpop.f32.mrb[55].mxu1 }
 0x168   :  { %v791_v5 = vmax.f32 %v657_v52, 0.0  ;;  %v502_v6 = vadd.f32 %v1593_v24, %v1595_v25 }
 0x169   :  { %v851_v27 = vmax.f32 %v819_v57, %v835_v45  ;;  %v772_v36 = vmax.f32 %v562_v14, 0.0  ;;  %v804_v30 = vmax.f32 %v722_v15, 0.0 }
 0x16a   :  { %v566_v60 = vpop.f32.mrb[56].mxu0  ;;  %v726_v37 = vpop.f32.mrb[56].mxu1  ;;  %v760_v8 = vmax.f32 %v502_v6, 0.0 }
 0x16b   :  { %868 = vst.msk [vmem:[%s1762_s3 + $0x50] sm:$0xff] %vm857_vm1, %v851_v27  ;;  %v820_v31 = vmax.f32 %v756_v19, %v772_v36  ;;  %v836_v61 = vmax.f32 %v788_v23, %v804_v30  ;;  %v567_v34 = vadd.f32 %v1593_v24, %v566_v60  ;;  %v727_v12 = vadd.f32 %v1593_v24, %v726_v37  ;;  %v568_v48 = vpop.f32.mrb[57].mxu0  ;;  %v728_v35 = vpop.f32.mrb[57].mxu1 }
 0x16d   :  { %v852_v42 = vmax.f32 %v820_v31, %v836_v61  ;;  %v773_v43 = vmax.f32 %v567_v34, 0.0  ;;  %v805_v46 = vmax.f32 %v727_v12, 0.0 }
 0x16e   :  { %v571_v47 = vpop.f32.mrb[58].mxu0  ;;  %v731_v50 = vpop.f32.mrb[58].mxu1 }
 0x16f   :  { %869 = vst.msk [vmem:[%s1762_s3 + $0x58] sm:$0xff] %vm857_vm1, %v852_v42  ;;  %v821_v51 = vmax.f32 %v757_v13, %v773_v43  ;;  %v837_v0 = vmax.f32 %v789_v38, %v805_v46  ;;  %v572_v54 = vadd.f32 %v1593_v24, %v571_v47  ;;  %v732_v28 = vadd.f32 %v1593_v24, %v731_v50  ;;  %v573_v16 = vpop.f32.mrb[59].mxu0  ;;  %v733_v1 = vpop.f32.mrb[59].mxu1 }
 0x171   :  { %v853_v58 = vmax.f32 %v821_v51, %v837_v0  ;;  %v774_v53 = vmax.f32 %v572_v54, 0.0  ;;  %v806_v41 = vmax.f32 %v732_v28, 0.0 }
 0x172   :  { %v576_v29 = vpop.f32.mrb[60].mxu0  ;;  %v736_v59 = vpop.f32.mrb[60].mxu1 }
 0x173   :  { %870 = vst.msk [vmem:[%s1762_s3 + $0x60] sm:$0xff] %vm857_vm1, %v853_v58  ;;  %v822_v62 = vmax.f32 %v758_v40, %v774_v53  ;;  %v838_v63 = vmax.f32 %v790_v55, %v806_v41  ;;  %v577_v4 = vadd.f32 %v1593_v24, %v576_v29  ;;  %v737_v20 = vadd.f32 %v1593_v24, %v736_v59  ;;  %v578_v2 = vpop.f32.mrb[61].mxu0  ;;  %v738_v3 = vpop.f32.mrb[61].mxu1 }
 0x175   :  { %v854_v32 = vmax.f32 %v822_v62, %v838_v63  ;;  %v775_v10 = vmax.f32 %v577_v4, 0.0  ;;  %v807_v44 = vmax.f32 %v737_v20, 0.0 }
 0x176   :  { %v581_v56 = vpop.f32.mrb[62].mxu0  ;;  %v741_v33 = vpop.f32.mrb[62].mxu1 }
 0x177   :  { %871 = vst.msk [vmem:[%s1762_s3 + $0x68] sm:$0xff] %vm857_vm1, %v854_v32  ;;  %v823_v11 = vmax.f32 %v759_v21, %v775_v10  ;;  %v839_v57 = vmax.f32 %v791_v5, %v807_v44  ;;  %v582_v45 = vadd.f32 %v1593_v24, %v581_v56  ;;  %v742_v14 = vadd.f32 %v1593_v24, %v741_v33  ;;  %v583_v25 = vpop.f32.mrb[63].mxu0  ;;  %v743_v15 = vpop.f32.mrb[63].mxu1 }
 0x179   :  { %v855_v18 = vmax.f32 %v823_v11, %v839_v57  ;;  %v776_v19 = vmax.f32 %v582_v45, 0.0  ;;  %v808_v9 = vmax.f32 %v742_v14, 0.0 }
 0x17b   :  { %872 = vst.msk [vmem:[%s1762_s3 + $0x70] sm:$0xff] %vm857_vm1, %v855_v18  ;;  %v824_v22 = vmax.f32 %v760_v8, %v776_v19  ;;  %v840_v23 = vmax.f32 %v792_v26, %v808_v9 }
 0x17d   :  { %v856_v27 = vmax.f32 %v824_v22, %v840_v23 }
 0x17f   :  { %873 = vst.msk [vmem:[%s1762_s3 + $0x78] sm:$0xff] %vm857_vm1, %v856_v27 }

// kernel: smallcnn_forward.6
= control target key start
LH: loop header
LB: loop body
LE: loop exit
PB: predicated region body
PF: predicated region fallthrough
CT: control target
= control target key end

     0   :  { %vm105_vm0 = vcmask 261120   ;;  %vm472_vm1 = vcmask 523264   ;;  %s1023_s1 = inlined_call_operand.vmem [shape: f32[288,64], index: 1, kind: input, shape index: {}]   ;;  %s1024_s0 = inlined_call_operand.vmem [shape: f32[128,288], index: 0, kind: input, shape index: {}]   ;;  %s1025_s2 = inlined_call_operand.vmem [shape: f32[1,64], index: 2, kind: input, shape index: {}]   ;;  %s1026_s3 = inlined_call_operand.vmem [shape: f32[32,64], index: 3, kind: output, shape index: {}]  }
   0x1   :  { %v78_v0 = vld [vmem:[%s1023_s1 + $0x80] sm:$0xff]  ;;  %v79_v1 = vld [vmem:[%s1023_s1 + $0x88] sm:$0xff]  ;;  %v80_v5 = vld [vmem:[%s1023_s1 + $0x90] sm:$0xff] }
   0x2   :  { %v62_v2 = vld [vmem:[%s1023_s1] sm:$0xff]  ;;  %v630_v3 = vpack.c.bf16 %v79_v1, %v78_v0  ;;  %v63_v4 = vld [vmem:[%s1023_s1 + $0x8] sm:$0xff]  ;;  %v81_v6 = vld [vmem:[%s1023_s1 + $0x98] sm:$0xff] }
   0x3   :  { %v632_v7 = vpack.c.bf16 %v63_v4, %v62_v2  ;;  %v634_v8 = vpack.c.bf16 %v81_v6, %v80_v5  ;;  %v64_v9 = vld [vmem:[%s1023_s1 + $0x10] sm:$0xff]  ;;  %v65_v10 = vld [vmem:[%s1023_s1 + $0x18] sm:$0xff]  ;;  %v82_v11 = vld [vmem:[%s1023_s1 + $0xa0] sm:$0xff] }
   0x4   :  { %631 = vmatprep.subr.bf16.mxu0 %v630_v3  ;;  %670 = vmatprep.subr.bf16.mxu1 %v630_v3  ;;  %v83_v12 = vld [vmem:[%s1023_s1 + $0xa8] sm:$0xff]  ;;  %v636_v13 = vpack.c.bf16 %v65_v10, %v64_v9  ;;  %v66_v15 = vld [vmem:[%s1023_s1 + $0x20] sm:$0xff]  ;;  %v84_v17 = vld [vmem:[%s1023_s1 + $0xb0] sm:$0xff] }
   0x5   :  { %633 = vmatpush3.bf16.msra.mxu0 %v632_v7  ;;  %678 = vmatpush3.bf16.msra.mxu1 %v632_v7  ;;  %v638_v14 = vpack.c.bf16 %v83_v12, %v82_v11  ;;  %v67_v16 = vld [vmem:[%s1023_s1 + $0x28] sm:$0xff]  ;;  %v85_v18 = vld [vmem:[%s1023_s1 + $0xb8] sm:$0xff]  ;;  %v68_v21 = vld [vmem:[%s1023_s1 + $0x30] sm:$0xff] }
   0x6   :  { %635 = vmatprep.subr.bf16.mxu0 %v634_v8  ;;  %671 = vmatprep.subr.bf16.mxu1 %v634_v8  ;;  %v640_v19 = vpack.c.bf16 %v67_v16, %v66_v15  ;;  %v642_v20 = vpack.c.bf16 %v85_v18, %v84_v17  ;;  %v69_v22 = vld [vmem:[%s1023_s1 + $0x38] sm:$0xff]  ;;  %v86_v23 = vld [vmem:[%s1023_s1 + $0xc0] sm:$0xff]  ;;  %v87_v24 = vld [vmem:[%s1023_s1 + $0xc8] sm:$0xff] }
   0x7   :  { %v15_v25 = vld [vmem:[%s1024_s0 + $0x8] sm:$0xff]  ;;  %v644_v27 = vpack.c.bf16 %v69_v22, %v68_v21  ;;  %v646_v28 = vpack.c.bf16 %v87_v24, %v86_v23  ;;  %v70_v29 = vld [vmem:[%s1023_s1 + $0x40] sm:$0xff]  ;;  %v88_v31 = vld [vmem:[%s1023_s1 + $0xd0] sm:$0xff] }
   0x8   :  { %218 = vmatprep.mubr.f32.mxu0 %v15_v25  ;;  %v51_v26 = vld [vmem:[%s1024_s0 + $0x128] sm:$0xff]  ;;  %v89_v32 = vld [vmem:[%s1023_s1 + $0xd8] sm:$0xff]  ;;  %v72_v35 = vld [vmem:[%s1023_s1 + $0x50] sm:$0xff] }
   0x9   :  { %637 = vmatpush3.bf16.msra.mxu0 %v636_v13  ;;  %679 = vmatpush3.bf16.msra.mxu1 %v636_v13  ;;  %v71_v30 = vld [vmem:[%s1023_s1 + $0x48] sm:$0xff]  ;;  %v650_v34 = vpack.c.bf16 %v89_v32, %v88_v31  ;;  %v73_v36 = vld [vmem:[%s1023_s1 + $0x58] sm:$0xff]  ;;  %v90_v37 = vld [vmem:[%s1023_s1 + $0xe0] sm:$0xff] }
   0xa   :  { %639 = vmatprep.subr.bf16.mxu0 %v638_v14  ;;  %672 = vmatprep.subr.bf16.mxu1 %v638_v14  ;;  %v648_v33 = vpack.c.bf16 %v71_v30, %v70_v29  ;;  %v91_v38 = vld [vmem:[%s1023_s1 + $0xe8] sm:$0xff]  ;;  %v652_v39 = vpack.c.bf16 %v73_v36, %v72_v35  ;;  %v74_v41 = vld [vmem:[%s1023_s1 + $0x60] sm:$0xff]  ;;  %v92_v43 = vld [vmem:[%s1023_s1 + $0xf0] sm:$0xff] }
   0xb   :  { %278 = vmatprep.mubr.f32.mxu1 %v51_v26  ;;  %v654_v40 = vpack.c.bf16 %v91_v38, %v90_v37  ;;  %v75_v42 = vld [vmem:[%s1023_s1 + $0x68] sm:$0xff]  ;;  %v93_v44 = vld [vmem:[%s1023_s1 + $0xf8] sm:$0xff]  ;;  %v76_v47 = vld [vmem:[%s1023_s1 + $0x70] sm:$0xff] }
   0xc   :  { %v656_v45 = vpack.c.bf16 %v75_v42, %v74_v41  ;;  %v658_v46 = vpack.c.bf16 %v93_v44, %v92_v43  ;;  %v77_v48 = vld [vmem:[%s1023_s1 + $0x78] sm:$0xff]  ;;  %v94_v49 = vld [vmem:[%s1023_s1 + $0x100] sm:$0xff]  ;;  %v95_v50 = vld [vmem:[%s1023_s1 + $0x108] sm:$0xff] }
   0xd   :  { %641 = vmatpush3.bf16.msra.mxu0 %v640_v19  ;;  %680 = vmatpush3.bf16.msra.mxu1 %v640_v19  ;;  %v660_v51 = vpack.c.bf16 %v77_v48, %v76_v47  ;;  %v662_v52 = vpack.c.bf16 %v95_v50, %v94_v49  ;;  %v96_v53 = vld [vmem:[%s1023_s1 + $0x110] sm:$0xff]  ;;  %v97_v54 = vld [vmem:[%s1023_s1 + $0x118] sm:$0xff]  ;;  %v14_v55 = vld [vmem:[%s1024_s0] sm:$0xff] }
   0xe   :  { %643 = vmatprep.subr.bf16.mxu0 %v642_v20  ;;  %673 = vmatprep.subr.bf16.mxu1 %v642_v20  ;;  %v50_v56 = vld [vmem:[%s1024_s0 + $0x120] sm:$0xff]  ;;  %v666_v59 = vpack.c.bf16 %v97_v54, %v96_v53  ;;  %v17_v60 = vld [vmem:[%s1024_s0 + $0x18] sm:$0xff]  ;;  %v20_v0 = vld [vmem:[%s1024_s0 + $0x30] sm:$0xff] }
   0xf   :  { %v18_v57 = vld [vmem:[%s1024_s0 + $0x20] sm:$0xff]  ;;  %v53_v61 = vld [vmem:[%s1024_s0 + $0x138] sm:$0xff]  ;;  %v56_v1 = vld [vmem:[%s1024_s0 + $0x150] sm:$0xff] }
  0x10   :  { %v54_v58 = vld [vmem:[%s1024_s0 + $0x140] sm:$0xff]  ;;  %v21_v62 = vld [vmem:[%s1024_s0 + $0x38] sm:$0xff]  ;;  %v24_v2 = vld [vmem:[%s1024_s0 + $0x50] sm:$0xff] }
  0x11   :  { %645 = vmatpush3.bf16.msra.mxu0 %v644_v27  ;;  %681 = vmatpush3.bf16.msra.mxu1 %v644_v27  ;;  %v57_v63 = vld [vmem:[%s1024_s0 + $0x158] sm:$0xff]  ;;  %v60_v3 = vld [vmem:[%s1024_s0 + $0x170] sm:$0xff]  ;;  %v23_v4 = vld [vmem:[%s1024_s0 + $0x48] sm:$0xff] }
  0x12   :  { %647 = vmatprep.subr.bf16.mxu0 %v646_v28  ;;  %674 = vmatprep.subr.bf16.mxu1 %v646_v28  ;;  %v59_v5 = vld [vmem:[%s1024_s0 + $0x168] sm:$0xff]  ;;  %v16_v7 = vld [vmem:[%s1024_s0 + $0x10] sm:$0xff]  ;;  %v26_v8 = vld [vmem:[%s1024_s0 + $0x60] sm:$0xff] }
  0x13   :  { %v27_v6 = vld [vmem:[%s1024_s0 + $0x68] sm:$0xff]  ;;  %v30_v10 = vld [vmem:[%s1024_s0 + $0x80] sm:$0xff]  ;;  %v29_v12 = vld [vmem:[%s1024_s0 + $0x78] sm:$0xff] }
  0x14   :  { %v19_v9 = vld [vmem:[%s1024_s0 + $0x28] sm:$0xff]  ;;  %v22_v11 = vld [vmem:[%s1024_s0 + $0x40] sm:$0xff]  ;;  %v25_v13 = vld [vmem:[%s1024_s0 + $0x58] sm:$0xff] }
  0x15   :  { %649 = vmatpush3.bf16.msra.mxu0 %v648_v33  ;;  %682 = vmatpush3.bf16.msra.mxu1 %v648_v33  ;;  %v33_v14 = vld [vmem:[%s1024_s0 + $0x98] sm:$0xff]  ;;  %v28_v15 = vld [vmem:[%s1024_s0 + $0x70] sm:$0xff]  ;;  %v31_v17 = vld [vmem:[%s1024_s0 + $0x88] sm:$0xff] }
  0x16   :  { %651 = vmatprep.subr.bf16.mxu0 %v650_v34  ;;  %675 = vmatprep.subr.bf16.mxu1 %v650_v34  ;;  %v32_v16 = vld [vmem:[%s1024_s0 + $0x90] sm:$0xff]  ;;  %v34_v19 = vld [vmem:[%s1024_s0 + $0xa0] sm:$0xff]  ;;  %v35_v20 = vld [vmem:[%s1024_s0 + $0xa8] sm:$0xff] }
  0x17   :  { %v36_v18 = vld [vmem:[%s1024_s0 + $0xb0] sm:$0xff]  ;;  %v37_v21 = vld [vmem:[%s1024_s0 + $0xb8] sm:$0xff]  ;;  %v39_v22 = vld [vmem:[%s1024_s0 + $0xc8] sm:$0xff] }
  0x18   :  { %v40_v23 = vld [vmem:[%s1024_s0 + $0xd0] sm:$0xff]  ;;  %v38_v24 = vld [vmem:[%s1024_s0 + $0xc0] sm:$0xff]  ;;  %v43_v25 = vld [vmem:[%s1024_s0 + $0xe8] sm:$0xff] }
  0x19   :  { %653 = vmatpush3.bf16.msra.mxu0 %v652_v39  ;;  %683 = vmatpush3.bf16.msra.mxu1 %v652_v39  ;;  %v42_v26 = vld [vmem:[%s1024_s0 + $0xe0] sm:$0xff]  ;;  %v41_v28 = vld [vmem:[%s1024_s0 + $0xd8] sm:$0xff]  ;;  %v52_v31 = vld [vmem:[%s1024_s0 + $0x130] sm:$0xff] }
  0x1a   :  { %655 = vmatprep.subr.bf16.mxu0 %v654_v40  ;;  %676 = vmatprep.subr.bf16.mxu1 %v654_v40  ;;  %v46_v27 = vld [vmem:[%s1024_s0 + $0x100] sm:$0xff]  ;;  %v49_v29 = vld [vmem:[%s1024_s0 + $0x118] sm:$0xff]  ;;  %v44_v32 = vld [vmem:[%s1024_s0 + $0xf0] sm:$0xff] }
  0x1b   :  { %v45_v30 = vld [vmem:[%s1024_s0 + $0xf8] sm:$0xff]  ;;  %v55_v33 = vld [vmem:[%s1024_s0 + $0x148] sm:$0xff]  ;;  %v48_v34 = vld [vmem:[%s1024_s0 + $0x110] sm:$0xff] }
  0x1c   :  { %v58_v35 = vld [vmem:[%s1024_s0 + $0x160] sm:$0xff]  ;;  %v47_v36 = vld [vmem:[%s1024_s0 + $0x108] sm:$0xff]  ;;  %v61_v37 = vld [vmem:[%s1024_s0 + $0x178] sm:$0xff] }
  0x1d   :  { %657 = vmatpush3.bf16.msra.mxu0 %v656_v45  ;;  %684 = vmatpush3.bf16.msra.mxu1 %v656_v45 }
  0x1e   :  { %659 = vmatprep.subr.bf16.mxu0 %v658_v46  ;;  %677 = vmatprep.subr.bf16.mxu1 %v658_v46 }
  0x21   :  { %661 = vmatpush3.bf16.msra.mxu0 %v660_v51  ;;  %685 = vmatpush3.bf16.msra.mxu1 %v660_v51 }
  0x22   :  { %663 = vmatprep.subr.bf16.mxu1 %v662_v52 }
  0x24   :  { %219 = vmatmul.mubr.f32.vlgmr.msra.gmra.mrb[0].mxu0 %v14_v55  ;;  %279 = vmatmul.mubr.f32.vlgmr.msra.gmra.mrb[0].mxu1 %v50_v56 }
  0x25   :  { %223 = vmatprep.mubr.f32.mxu0 %v18_v57  ;;  %283 = vmatprep.mubr.f32.mxu1 %v54_v58 }
  0x26   :  { %665 = vmatpush3.bf16.msra.mxu1 %v662_v52 }
  0x27   :  { %667 = vmatprep.subr.bf16.mxu1 %v666_v59 }
  0x28   :  { %224 = vmatmul.mubr.f32.gmra.mrb[2].mxu0 %v17_v60  ;;  %284 = vmatmul.mubr.f32.gmra.mrb[2].mxu1 %v53_v61  ;;  %v983_v60 = vld [vmem:[%s1025_s2] ss:$0 sm:$0xff] }
  0x29   :  { %228 = vmatprep.mubr.f32.mxu0 %v21_v62  ;;  %288 = vmatprep.mubr.f32.mxu1 %v57_v63 }
  0x2a   :  { %669 = vmatpush3.bf16.msra.mxu1 %v666_v59 }
  0x2c   :  { %229 = vmatmul.mubr.f32.gmra.mrb[4].mxu0 %v20_v0  ;;  %289 = vmatmul.mubr.f32.gmra.mrb[4].mxu1 %v56_v1 }
  0x2d   :  { %233 = vmatprep.mubr.f32.mxu0 %v24_v2  ;;  %293 = vmatprep.mubr.f32.mxu1 %v60_v3 }
  0x30   :  { %234 = vmatmul.mubr.f32.gmra.mrb[6].mxu0 %v23_v4  ;;  %294 = vmatmul.mubr.f32.gmra.mrb[6].mxu1 %v59_v5 }
  0x31   :  { %238 = vmatprep.mubr.f32.mxu0 %v27_v6  ;;  %606 = vmatprep.mubr.msk.f32.mxu1 %vm105_vm0, %v16_v7 }
  0x34   :  { %239 = vmatmul.mubr.f32.gmra.mrb[8].mxu0 %v26_v8  ;;  %607 = vmatmul.mubr.msk.f32.vlgmr.msra.gmra.mrb[8].mxu1 %vm105_vm0, %v19_v9 }
  0x35   :  { %243 = vmatprep.mubr.f32.mxu0 %v30_v10  ;;  %609 = vmatprep.mubr.msk.f32.mxu1 %vm105_vm0, %v22_v11 }
  0x38   :  { %244 = vmatmul.mubr.f32.gmra.mrb[10].mxu0 %v29_v12  ;;  %610 = vmatmul.mubr.msk.f32.gmra.mrb[10].mxu1 %vm105_vm0, %v25_v13 }
  0x39   :  { %248 = vmatprep.mubr.f32.mxu0 %v33_v14  ;;  %612 = vmatprep.mubr.msk.f32.mxu1 %vm105_vm0, %v28_v15 }
  0x3c   :  { %249 = vmatmul.mubr.f32.gmra.mrb[12].mxu0 %v32_v16  ;;  %613 = vmatmul.mubr.msk.f32.gmra.mrb[12].mxu1 %vm105_vm0, %v31_v17 }
  0x3d   :  { %253 = vmatprep.mubr.f32.mxu0 %v36_v18  ;;  %615 = vmatprep.mubr.msk.f32.mxu1 %vm105_vm0, %v34_v19 }
  0x40   :  { %254 = vmatmul.mubr.f32.gmra.mrb[14].mxu0 %v35_v20  ;;  %616 = vmatmul.mubr.msk.f32.gmra.mrb[14].mxu1 %vm105_vm0, %v37_v21 }
  0x41   :  { %258 = vmatprep.mubr.f32.mxu0 %v39_v22  ;;  %618 = vmatprep.mubr.msk.f32.mxu1 %vm105_vm0, %v40_v23 }
  0x44   :  { %259 = vmatmul.mubr.f32.gmra.mrb[16].mxu0 %v38_v24  ;;  %619 = vmatmul.mubr.msk.f32.gmra.mrb[16].mxu1 %vm105_vm0, %v43_v25 }
  0x45   :  { %263 = vmatprep.mubr.f32.mxu0 %v42_v26  ;;  %621 = vmatprep.mubr.msk.f32.mxu1 %vm105_vm0, %v46_v27 }
  0x48   :  { %264 = vmatmul.mubr.f32.gmra.mrb[18].mxu0 %v41_v28  ;;  %622 = vmatmul.mubr.msk.f32.gmra.mrb[18].mxu1 %vm105_vm0, %v49_v29 }
  0x49   :  { %268 = vmatprep.mubr.f32.mxu0 %v45_v30  ;;  %624 = vmatprep.mubr.msk.f32.mxu1 %vm105_vm0, %v52_v31 }
  0x4c   :  { %269 = vmatmul.mubr.f32.gmra.mrb[20].mxu0 %v44_v32  ;;  %625 = vmatmul.mubr.msk.f32.gmra.mrb[20].mxu1 %vm105_vm0, %v55_v33 }
  0x4d   :  { %273 = vmatprep.mubr.f32.mxu0 %v48_v34  ;;  %627 = vmatprep.mubr.msk.f32.mxu1 %vm105_vm0, %v58_v35 }
  0x50   :  { %274 = vmatmul.mubr.f32.gmra.mrb[22].mxu0 %v47_v36  ;;  %628 = vmatmul.mubr.msk.f32.gmra.mrb[22].mxu1 %vm105_vm0, %v61_v37 }
  0xf7   :  { %v530_v38 = vpop.f32.mrb[0].mxu0  ;;  %v566_v39 = vpop.f32.mrb[0].mxu1 }
  0xf8   :  { %v531_v40 = vpop.f32.mrb[1].mxu0  ;;  %v567_v41 = vpop.f32.mrb[1].mxu1 }
  0xf9   :  { %v532_v42 = vadd.f32 %v531_v40, %v530_v38  ;;  %v974_v43 = vadd.f32 %v567_v41, %v566_v39 }
  0xfb   :  { %v533_v44 = vpop.f32.mrb[2].mxu0  ;;  %v569_v45 = vpop.f32.mrb[2].mxu1  ;;  %v221_v2 = vadd.f32 %v532_v42, %v983_v60 }
  0xfc   :  { %v534_v46 = vpop.f32.mrb[3].mxu0  ;;  %v570_v47 = vpop.f32.mrb[3].mxu1 }
  0xfd   :  { %v535_v48 = vadd.f32 %v534_v46, %v533_v44  ;;  %v976_v49 = vadd.f32 %v570_v47, %v569_v45 }
  0xff   :  { %v536_v50 = vpop.f32.mrb[4].mxu0  ;;  %v572_v51 = vpop.f32.mrb[4].mxu1  ;;  %v226_v63 = vadd.f32 %v535_v48, %v983_v60 }
 0x100   :  { %v537_v52 = vpop.f32.mrb[5].mxu0  ;;  %v573_v53 = vpop.f32.mrb[5].mxu1 }
 0x101   :  { %v538_v54 = vadd.f32 %v537_v52, %v536_v50  ;;  %v978_v55 = vadd.f32 %v573_v53, %v572_v51 }
 0x103   :  { %v539_v56 = vpop.f32.mrb[6].mxu0  ;;  %v575_v57 = vpop.f32.mrb[6].mxu1  ;;  %v231_v11 = vadd.f32 %v538_v54, %v983_v60 }
 0x104   :  { %v540_v58 = vpop.f32.mrb[7].mxu0  ;;  %v576_v59 = vpop.f32.mrb[7].mxu1 }
 0x105   :  { %v541_v61 = vadd.f32 %v540_v58, %v539_v56  ;;  %v985_v62 = vadd.f32 %v576_v59, %v575_v57 }
 0x107   :  { %v542_v0 = vpop.f32.mrb[8].mxu0  ;;  %v608_v1 = vpop.f32.mrb[8].mxu1  ;;  %v236_v8 = vadd.f32 %v541_v61, %v983_v60 }
 0x108   :  { %v371_v3 = vadd.f32 %v608_v1, %v226_v63  ;;  %v543_v4 = vpop.f32.mrb[9].mxu0  ;;  %v365_v5 = vpop.f32.mrb[9].mxu1 }
 0x109   :  { %v544_v6 = vadd.f32 %v543_v4, %v542_v0  ;;  %v366_v7 = vadd.f32 %v365_v5, %v221_v2  ;;  %v286_v0 = vadd.f32 %v976_v49, %v983_v60  ;;  %v281_v4 = vadd.f32 %v974_v43, %v983_v60 }
 0x10a   :  { %v445_v26 = vmax.f32 %v371_v3, 0.0  ;;  %v291_v43 = vadd.f32 %v978_v55, %v983_v60 }
 0x10b   :  { %v545_v9 = vpop.f32.mrb[10].mxu0  ;;  %v611_v10 = vpop.f32.mrb[10].mxu1  ;;  %v241_v20 = vadd.f32 %v544_v6, %v983_v60  ;;  %v444_v27 = vmax.f32 %v366_v7, 0.0 }
 0x10c   :  { %v381_v12 = vadd.f32 %v611_v10, %v236_v8  ;;  %v546_v13 = vpop.f32.mrb[11].mxu0  ;;  %v375_v14 = vpop.f32.mrb[11].mxu1 }
 0x10d   :  { %v547_v15 = vadd.f32 %v546_v13, %v545_v9  ;;  %v376_v16 = vadd.f32 %v375_v14, %v231_v11 }
 0x10e   :  { %v447_v51 = vmax.f32 %v381_v12, 0.0  ;;  %v296_v12 = vadd.f32 %v985_v62, %v983_v60 }
 0x10f   :  { %v548_v17 = vpop.f32.mrb[12].mxu0  ;;  %v246_v18 = vadd.f32 %v547_v15, %v983_v60  ;;  %v614_v19 = vpop.f32.mrb[12].mxu1  ;;  %v446_v39 = vmax.f32 %v376_v16, 0.0 }
 0x110   :  { %v549_v21 = vpop.f32.mrb[13].mxu0  ;;  %v385_v22 = vpop.f32.mrb[13].mxu1 }
 0x111   :  { %v391_v23 = vadd.f32 %v614_v19, %v246_v18  ;;  %v550_v24 = vadd.f32 %v549_v21, %v548_v17  ;;  %v386_v25 = vadd.f32 %v385_v22, %v241_v20 }
 0x113   :  { %v449_v28 = vmax.f32 %v391_v23, 0.0  ;;  %v448_v29 = vmax.f32 %v386_v25, 0.0  ;;  %v551_v30 = vpop.f32.mrb[14].mxu0  ;;  %v617_v31 = vpop.f32.mrb[14].mxu1  ;;  %v251_v32 = vadd.f32 %v550_v24, %v983_v60 }
 0x114   :  { %v552_v33 = vpop.f32.mrb[15].mxu0  ;;  %v395_v34 = vpop.f32.mrb[15].mxu1 }
 0x115   :  { %v461_v35 = vmax.f32 %v445_v26, %v449_v28  ;;  %v460_v36 = vmax.f32 %v444_v27, %v448_v29  ;;  %v553_v37 = vadd.f32 %v552_v33, %v551_v30  ;;  %v396_v38 = vadd.f32 %v395_v34, %v251_v32 }
 0x117   :  { %v256_v40 = vadd.f32 %v553_v37, %v983_v60  ;;  %v450_v41 = vmax.f32 %v396_v38, 0.0  ;;  %v554_v42 = vpop.f32.mrb[16].mxu0  ;;  %v620_v44 = vpop.f32.mrb[16].mxu1 }
 0x118   :  { %v555_v45 = vpop.f32.mrb[17].mxu0  ;;  %v405_v46 = vpop.f32.mrb[17].mxu1 }
 0x119   :  { %v401_v47 = vadd.f32 %v617_v31, %v256_v40  ;;  %v462_v48 = vmax.f32 %v446_v39, %v450_v41  ;;  %v556_v50 = vadd.f32 %v555_v45, %v554_v42 }
 0x11b   :  { %v451_v52 = vmax.f32 %v401_v47, 0.0  ;;  %v557_v53 = vpop.f32.mrb[18].mxu0  ;;  %v261_v54 = vadd.f32 %v556_v50, %v983_v60  ;;  %v623_v56 = vpop.f32.mrb[18].mxu1 }
 0x11c   :  { %v558_v57 = vpop.f32.mrb[19].mxu0  ;;  %v415_v58 = vpop.f32.mrb[19].mxu1 }
 0x11d   :  { %v463_v59 = vmax.f32 %v447_v51, %v451_v52  ;;  %v406_v61 = vadd.f32 %v405_v46, %v261_v54  ;;  %v559_v63 = vadd.f32 %v558_v57, %v557_v53 }
 0x11f   :  { %v266_v1 = vadd.f32 %v559_v63, %v983_v60  ;;  %v560_v2 = vpop.f32.mrb[20].mxu0  ;;  %v626_v3 = vpop.f32.mrb[20].mxu1  ;;  %v452_v13 = vmax.f32 %v406_v61, 0.0 }
 0x120   :  { %v431_v5 = vadd.f32 %v626_v3, %v286_v0  ;;  %v561_v6 = vpop.f32.mrb[21].mxu0  ;;  %v425_v7 = vpop.f32.mrb[21].mxu1 }
 0x121   :  { %v411_v8 = vadd.f32 %v620_v44, %v266_v1  ;;  %v562_v9 = vadd.f32 %v561_v6, %v560_v2  ;;  %v426_v10 = vadd.f32 %v425_v7, %v281_v4 }
 0x122   :  { %v457_v11 = vmax.f32 %v431_v5, 0.0 }
 0x123   :  { %v453_v14 = vmax.f32 %v411_v8, 0.0  ;;  %v271_v49 = vadd.f32 %v562_v9, %v983_v60  ;;  %v456_v15 = vmax.f32 %v426_v10, 0.0  ;;  %v563_v16 = vpop.f32.mrb[22].mxu0  ;;  %v629_v17 = vpop.f32.mrb[22].mxu1 }
 0x124   :  { %v441_v18 = vadd.f32 %v629_v17, %v296_v12  ;;  %v564_v19 = vpop.f32.mrb[23].mxu0  ;;  %v435_v20 = vpop.f32.mrb[23].mxu1 }
 0x125   :  { %v465_v21 = vmax.f32 %v453_v14, %v457_v11  ;;  %v416_v22 = vadd.f32 %v415_v58, %v271_v49  ;;  %v464_v23 = vmax.f32 %v452_v13, %v456_v15  ;;  %v565_v24 = vadd.f32 %v564_v19, %v563_v16 }
 0x126   :  { %v436_v25 = vadd.f32 %v435_v20, %v291_v43  ;;  %v459_v31 = vmax.f32 %v441_v18, 0.0 }
 0x127   :  { %v469_v62 = vmax.f32 %v461_v35, %v465_v21  ;;  %v468_v26 = vmax.f32 %v460_v36, %v464_v23  ;;  %v276_v27 = vadd.f32 %v565_v24, %v983_v60  ;;  %v454_v28 = vmax.f32 %v416_v22, 0.0 }
 0x128   :  { %v458_v29 = vmax.f32 %v436_v25, 0.0 }
 0x129   :  { %474 = vst.msk [vmem:[%s1026_s3 + $0x8] sm:$0xff] %vm472_vm1, %v469_v62  ;;  %473 = vst.msk [vmem:[%s1026_s3] sm:$0xff] %vm472_vm1, %v468_v26  ;;  %v421_v55 = vadd.f32 %v623_v56, %v276_v27 }
 0x12a   :  { %v466_v30 = vmax.f32 %v454_v28, %v458_v29 }
 0x12b   :  { %v455_v32 = vmax.f32 %v421_v55, 0.0 }
 0x12c   :  { %v470_v33 = vmax.f32 %v462_v48, %v466_v30 }
 0x12d   :  { %v467_v34 = vmax.f32 %v455_v32, %v459_v31 }
 0x12e   :  { %475 = vst.msk [vmem:[%s1026_s3 + $0x10] sm:$0xff] %vm472_vm1, %v470_v33 }
 0x12f   :  { %v471_v60 = vmax.f32 %v463_v59, %v467_v34 }
 0x131   :  { %476 = vst.msk [vmem:[%s1026_s3 + $0x18] sm:$0xff] %vm472_vm1, %v471_v60 }

// kernel: smallcnn_forward.7
= control target key start
LH: loop header
LB: loop body
LE: loop exit
PB: predicated region body
PF: predicated region fallthrough
CT: control target
= control target key end

     0   :  { %v789_v47 = vmov 1983009808   ;;  %v158_v49 = vlaneseq  ;;  %s1227_s0 = inlined_call_operand.vmem [shape: f32[2,1024], index: 0, kind: input, shape index: {}]   ;;  %s1228_s1 = inlined_call_operand.vmem [shape: f32[1024,10], index: 1, kind: input, shape index: {}]   ;;  %s1229_s2 = inlined_call_operand.vmem [shape: f32[1,10], index: 2, kind: input, shape index: {}]   ;;  %s1230_s3 = inlined_call_operand.hbm [shape: f32[2,10], index: 3, kind: output, shape index: {}]  }
   0x1   :  { %v33_v0 = vld [vmem:[%s1228_s1 + $0x80] sm:$0xff]  ;;  %v34_v1 = vld [vmem:[%s1228_s1 + $0x88] sm:$0xff]  ;;  %v35_v11 = vld [vmem:[%s1228_s1 + $0x90] sm:$0xff]  ;;  %v156_v48 = vunpack.c.l.s4 %v789_v47 }
   0x2   :  { %v17_v2 = vld [vmem:[%s1228_s1] sm:$0xff]  ;;  %v633_v3 = vpack.c.bf16 %v34_v1, %v33_v0  ;;  %v18_v4 = vld [vmem:[%s1228_s1 + $0x8] sm:$0xff]  ;;  %v36_v13 = vld [vmem:[%s1228_s1 + $0x98] sm:$0xff]  ;;  %v159_v0 = vshrl.u32 %v158_v49, 7 }
   0x3   :  { %v65_v5 = vld [vmem:[%s1228_s1 + $0x180] sm:$0xff]  ;;  %v66_v6 = vld [vmem:[%s1228_s1 + $0x188] sm:$0xff]  ;;  %v635_v7 = vpack.c.bf16 %v18_v4, %v17_v2  ;;  %v19_v14 = vld [vmem:[%s1228_s1 + $0x10] sm:$0xff]  ;;  %v637_v16 = vpack.c.bf16 %v36_v13, %v35_v11  ;;  %v157_v63 = vunpack.c.0.s8 %v156_v48 }
   0x4   :  { %v665_v8 = vpack.c.bf16 %v66_v6, %v65_v5  ;;  %v49_v9 = vld [vmem:[%s1228_s1 + $0x100] sm:$0xff]  ;;  %v50_v10 = vld [vmem:[%s1228_s1 + $0x108] sm:$0xff]  ;;  %634 = vmatprep.subr.bf16.mxu0 %v633_v3  ;;  %v20_v15 = vld [vmem:[%s1228_s1 + $0x18] sm:$0xff] }
   0x5   :  { %v667_v12 = vpack.c.bf16 %v50_v10, %v49_v9  ;;  %636 = vmatpush3.bf16.msra.mxu0 %v635_v7  ;;  %v639_v17 = vpack.c.bf16 %v20_v15, %v19_v14  ;;  %v67_v18 = vld [vmem:[%s1228_s1 + $0x190] sm:$0xff]  ;;  %v68_v19 = vld [vmem:[%s1228_s1 + $0x198] sm:$0xff]  ;;  %v37_v23 = vld [vmem:[%s1228_s1 + $0xa0] sm:$0xff]  ;;  %v961_v13 = vsub.s32 %v157_v63, %v159_v0 }
   0x6   :  { %666 = vmatprep.subr.bf16.mxu1 %v665_v8  ;;  %v51_v20 = vld [vmem:[%s1228_s1 + $0x110] sm:$0xff]  ;;  %v669_v21 = vpack.c.bf16 %v68_v19, %v67_v18  ;;  %v52_v22 = vld [vmem:[%s1228_s1 + $0x118] sm:$0xff]  ;;  %v38_v24 = vld [vmem:[%s1228_s1 + $0xa8] sm:$0xff]  ;;  %638 = vmatprep.subr.bf16.mxu0 %v637_v16 }
   0x7   :  { %668 = vmatpush3.bf16.msra.mxu1 %v667_v12  ;;  %v671_v25 = vpack.c.bf16 %v52_v22, %v51_v20  ;;  %v641_v26 = vpack.c.bf16 %v38_v24, %v37_v23  ;;  %v21_v27 = vld [vmem:[%s1228_s1 + $0x20] sm:$0xff]  ;;  %v22_v28 = vld [vmem:[%s1228_s1 + $0x28] sm:$0xff]  ;;  %v39_v35 = vld [vmem:[%s1228_s1 + $0xb0] sm:$0xff] }
   0x8   :  { %v69_v29 = vld [vmem:[%s1228_s1 + $0x1a0] sm:$0xff]  ;;  %670 = vmatprep.subr.bf16.mxu1 %v669_v21  ;;  %v70_v30 = vld [vmem:[%s1228_s1 + $0x1a8] sm:$0xff]  ;;  %v643_v33 = vpack.c.bf16 %v22_v28, %v21_v27  ;;  %v40_v36 = vld [vmem:[%s1228_s1 + $0xb8] sm:$0xff] }
   0x9   :  { %v53_v31 = vld [vmem:[%s1228_s1 + $0x120] sm:$0xff]  ;;  %v54_v32 = vld [vmem:[%s1228_s1 + $0x128] sm:$0xff]  ;;  %640 = vmatpush3.bf16.msra.mxu0 %v639_v17  ;;  %v673_v34 = vpack.c.bf16 %v70_v30, %v69_v29  ;;  %v23_v37 = vld [vmem:[%s1228_s1 + $0x30] sm:$0xff]  ;;  %v645_v39 = vpack.c.bf16 %v40_v36, %v39_v35 }
   0xa   :  { %642 = vmatprep.subr.bf16.mxu0 %v641_v26  ;;  %v675_v38 = vpack.c.bf16 %v54_v32, %v53_v31  ;;  %v24_v40 = vld [vmem:[%s1228_s1 + $0x38] sm:$0xff]  ;;  %v71_v41 = vld [vmem:[%s1228_s1 + $0x1b0] sm:$0xff]  ;;  %v41_v46 = vld [vmem:[%s1228_s1 + $0xc0] sm:$0xff] }
   0xb   :  { %672 = vmatpush3.bf16.msra.mxu1 %v671_v25  ;;  %v72_v42 = vld [vmem:[%s1228_s1 + $0x1b8] sm:$0xff]  ;;  %v55_v44 = vld [vmem:[%s1228_s1 + $0x130] sm:$0xff]  ;;  %v42_v50 = vld [vmem:[%s1228_s1 + $0xc8] sm:$0xff]  ;;  %v647_v51 = vpack.c.bf16 %v24_v40, %v23_v37 }
   0xc   :  { %674 = vmatprep.subr.bf16.mxu1 %v673_v34  ;;  %v677_v43 = vpack.c.bf16 %v72_v42, %v71_v41  ;;  %v56_v45 = vld [vmem:[%s1228_s1 + $0x138] sm:$0xff]  ;;  %v73_v52 = vld [vmem:[%s1228_s1 + $0x1c0] sm:$0xff]  ;;  %v74_v53 = vld [vmem:[%s1228_s1 + $0x1c8] sm:$0xff]  ;;  %v649_v55 = vpack.c.bf16 %v42_v50, %v41_v46 }
   0xd   :  { %644 = vmatpush3.bf16.msra.mxu0 %v643_v33  ;;  %v679_v54 = vpack.c.bf16 %v56_v45, %v55_v44  ;;  %v25_v56 = vld [vmem:[%s1228_s1 + $0x40] sm:$0xff]  ;;  %v26_v57 = vld [vmem:[%s1228_s1 + $0x48] sm:$0xff]  ;;  %v681_v59 = vpack.c.bf16 %v74_v53, %v73_v52  ;;  %v43_v61 = vld [vmem:[%s1228_s1 + $0xd0] sm:$0xff] }
   0xe   :  { %646 = vmatprep.subr.bf16.mxu0 %v645_v39  ;;  %v57_v58 = vld [vmem:[%s1228_s1 + $0x140] sm:$0xff]  ;;  %v58_v60 = vld [vmem:[%s1228_s1 + $0x148] sm:$0xff]  ;;  %v44_v62 = vld [vmem:[%s1228_s1 + $0xd8] sm:$0xff]  ;;  %v651_v3 = vpack.c.bf16 %v26_v57, %v25_v56 }
   0xf   :  { %676 = vmatpush3.bf16.msra.mxu1 %v675_v38  ;;  %v75_v1 = vld [vmem:[%s1228_s1 + $0x1d0] sm:$0xff]  ;;  %v76_v2 = vld [vmem:[%s1228_s1 + $0x1d8] sm:$0xff]  ;;  %v683_v4 = vpack.c.bf16 %v58_v60, %v57_v58  ;;  %v653_v5 = vpack.c.bf16 %v44_v62, %v43_v61  ;;  %v45_v11 = vld [vmem:[%s1228_s1 + $0xe0] sm:$0xff] }
  0x10   :  { %678 = vmatprep.subr.bf16.mxu1 %v677_v43  ;;  %v27_v6 = vld [vmem:[%s1228_s1 + $0x50] sm:$0xff]  ;;  %v28_v7 = vld [vmem:[%s1228_s1 + $0x58] sm:$0xff]  ;;  %v685_v9 = vpack.c.bf16 %v76_v2, %v75_v1  ;;  %v46_v12 = vld [vmem:[%s1228_s1 + $0xe8] sm:$0xff] }
  0x11   :  { %648 = vmatpush3.bf16.msra.mxu0 %v647_v51  ;;  %v59_v8 = vld [vmem:[%s1228_s1 + $0x150] sm:$0xff]  ;;  %v60_v10 = vld [vmem:[%s1228_s1 + $0x158] sm:$0xff]  ;;  %v77_v14 = vld [vmem:[%s1228_s1 + $0x1e0] sm:$0xff]  ;;  %v655_v16 = vpack.c.bf16 %v28_v7, %v27_v6  ;;  %v657_v19 = vpack.c.bf16 %v46_v12, %v45_v11 }
  0x12   :  { %650 = vmatprep.subr.bf16.mxu0 %v649_v55  ;;  %v78_v15 = vld [vmem:[%s1228_s1 + $0x1e8] sm:$0xff]  ;;  %v29_v17 = vld [vmem:[%s1228_s1 + $0x60] sm:$0xff]  ;;  %v687_v18 = vpack.c.bf16 %v60_v10, %v59_v8  ;;  %v47_v25 = vld [vmem:[%s1228_s1 + $0xf0] sm:$0xff] }
  0x13   :  { %680 = vmatpush3.bf16.msra.mxu1 %v679_v54  ;;  %v30_v20 = vld [vmem:[%s1228_s1 + $0x68] sm:$0xff]  ;;  %v61_v21 = vld [vmem:[%s1228_s1 + $0x160] sm:$0xff]  ;;  %v689_v23 = vpack.c.bf16 %v78_v15, %v77_v14  ;;  %v48_v26 = vld [vmem:[%s1228_s1 + $0xf8] sm:$0xff] }
  0x14   :  { %682 = vmatprep.subr.bf16.mxu1 %v681_v59  ;;  %v15_v22 = vld [vmem:[%s1227_s0] sm:$0xff]  ;;  %v62_v24 = vld [vmem:[%s1228_s1 + $0x168] sm:$0xff]  ;;  %v79_v29 = vld [vmem:[%s1228_s1 + $0x1f0] sm:$0xff]  ;;  %v659_v31 = vpack.c.bf16 %v30_v20, %v29_v17  ;;  %v661_v35 = vpack.c.bf16 %v48_v26, %v47_v25 }
  0x15   :  { %652 = vmatpush3.bf16.msra.mxu0 %v651_v3  ;;  %v161_v27 = vrot.slane %v15_v22, %v961_v13  ;;  %v154_v28 = vcombine.high %v15_v22, %v15_v22  ;;  %v80_v30 = vld [vmem:[%s1228_s1 + $0x1f8] sm:$0xff]  ;;  %v691_v34 = vpack.c.bf16 %v62_v24, %v61_v21  ;;  %v31_v36 = vld [vmem:[%s1228_s1 + $0x70] sm:$0xff]  ;;  %v97_v41 = vld [vmem:[%s1228_s1 + $0x280] sm:$0xff] }
  0x16   :  { %654 = vmatprep.subr.bf16.mxu0 %v653_v5  ;;  %v32_v37 = vld [vmem:[%s1228_s1 + $0x78] sm:$0xff]  ;;  %v63_v38 = vld [vmem:[%s1228_s1 + $0x170] sm:$0xff]  ;;  %v693_v39 = vpack.c.bf16 %v80_v30, %v79_v29  ;;  %v98_v42 = vld [vmem:[%s1228_s1 + $0x288] sm:$0xff] }
  0x17   :  { %684 = vmatpush3.bf16.msra.mxu1 %v683_v4  ;;  %v169_v32 = vcombine.high %v161_v27, %v161_v27  ;;  %v168_v33 = vrot.slane %v154_v28, %v961_v13  ;;  %v64_v40 = vld [vmem:[%s1228_s1 + $0x178] sm:$0xff]  ;;  %v129_v44 = vld [vmem:[%s1228_s1 + $0x380] sm:$0xff]  ;;  %v130_v45 = vld [vmem:[%s1228_s1 + $0x388] sm:$0xff]  ;;  %v663_v46 = vpack.c.bf16 %v32_v37, %v31_v36  ;;  %v697_v48 = vpack.c.bf16 %v98_v42, %v97_v41 }
  0x18   :  { %686 = vmatprep.subr.bf16.mxu1 %v685_v9  ;;  %v695_v47 = vpack.c.bf16 %v64_v40, %v63_v38  ;;  %v81_v49 = vld [vmem:[%s1228_s1 + $0x200] sm:$0xff]  ;;  %v82_v50 = vld [vmem:[%s1228_s1 + $0x208] sm:$0xff]  ;;  %v729_v52 = vpack.c.bf16 %v130_v45, %v129_v44  ;;  %v99_v54 = vld [vmem:[%s1228_s1 + $0x290] sm:$0xff] }
  0x19   :  { %656 = vmatpush3.bf16.msra.mxu0 %v655_v16  ;;  %260 = vmatprep.mubr.f32.mxu0 %v169_v32  ;;  %v170_v43 = vcombine.high %v168_v33, %v168_v33  ;;  %v113_v51 = vld [vmem:[%s1228_s1 + $0x300] sm:$0xff]  ;;  %v114_v53 = vld [vmem:[%s1228_s1 + $0x308] sm:$0xff]  ;;  %v100_v55 = vld [vmem:[%s1228_s1 + $0x298] sm:$0xff]  ;;  %v699_v58 = vpack.c.bf16 %v82_v50, %v81_v49 }
  0x1a   :  { %658 = vmatprep.subr.bf16.mxu0 %v657_v19  ;;  %v131_v56 = vld [vmem:[%s1228_s1 + $0x390] sm:$0xff]  ;;  %v132_v57 = vld [vmem:[%s1228_s1 + $0x398] sm:$0xff]  ;;  %v731_v59 = vpack.c.bf16 %v114_v53, %v113_v51  ;;  %v701_v60 = vpack.c.bf16 %v100_v55, %v99_v54  ;;  %v101_v2 = vld [vmem:[%s1228_s1 + $0x2a0] sm:$0xff] }
  0x1b   :  { %688 = vmatpush3.bf16.msra.mxu1 %v687_v18  ;;  %330 = vmatprep.mubr.f32.mxu1 %v170_v43  ;;  %v83_v61 = vld [vmem:[%s1228_s1 + $0x210] sm:$0xff]  ;;  %v84_v62 = vld [vmem:[%s1228_s1 + $0x218] sm:$0xff]  ;;  %v733_v0 = vpack.c.bf16 %v132_v57, %v131_v56  ;;  %v102_v3 = vld [vmem:[%s1228_s1 + $0x2a8] sm:$0xff] }
  0x1c   :  { %690 = vmatprep.subr.bf16.mxu1 %v689_v23  ;;  %v115_v63 = vld [vmem:[%s1228_s1 + $0x310] sm:$0xff]  ;;  %v116_v1 = vld [vmem:[%s1228_s1 + $0x318] sm:$0xff]  ;;  %v133_v4 = vld [vmem:[%s1228_s1 + $0x3a0] sm:$0xff]  ;;  %v703_v6 = vpack.c.bf16 %v84_v62, %v83_v61  ;;  %v705_v8 = vpack.c.bf16 %v102_v3, %v101_v2 }
  0x1d   :  { %660 = vmatpush3.bf16.msra.mxu0 %v659_v31  ;;  %v134_v5 = vld [vmem:[%s1228_s1 + $0x3a8] sm:$0xff]  ;;  %v735_v7 = vpack.c.bf16 %v116_v1, %v115_v63  ;;  %v85_v9 = vld [vmem:[%s1228_s1 + $0x220] sm:$0xff]  ;;  %v103_v15 = vld [vmem:[%s1228_s1 + $0x2b0] sm:$0xff] }
  0x1e   :  { %662 = vmatprep.subr.bf16.mxu0 %v661_v35  ;;  %v86_v10 = vld [vmem:[%s1228_s1 + $0x228] sm:$0xff]  ;;  %v117_v11 = vld [vmem:[%s1228_s1 + $0x320] sm:$0xff]  ;;  %v737_v12 = vpack.c.bf16 %v134_v5, %v133_v4  ;;  %v104_v16 = vld [vmem:[%s1228_s1 + $0x2b8] sm:$0xff] }
  0x1f   :  { %692 = vmatpush3.bf16.msra.mxu1 %v691_v34  ;;  %v118_v14 = vld [vmem:[%s1228_s1 + $0x328] sm:$0xff]  ;;  %v135_v17 = vld [vmem:[%s1228_s1 + $0x3b0] sm:$0xff]  ;;  %v136_v18 = vld [vmem:[%s1228_s1 + $0x3b8] sm:$0xff]  ;;  %v707_v19 = vpack.c.bf16 %v86_v10, %v85_v9  ;;  %v709_v22 = vpack.c.bf16 %v104_v16, %v103_v15 }
  0x20   :  { %694 = vmatprep.subr.bf16.mxu1 %v693_v39  ;;  %v87_v20 = vld [vmem:[%s1228_s1 + $0x230] sm:$0xff]  ;;  %v739_v21 = vpack.c.bf16 %v118_v14, %v117_v11  ;;  %v88_v23 = vld [vmem:[%s1228_s1 + $0x238] sm:$0xff]  ;;  %v741_v26 = vpack.c.bf16 %v136_v18, %v135_v17  ;;  %v106_v28 = vld [vmem:[%s1228_s1 + $0x2c8] sm:$0xff] }
  0x21   :  { %664 = vmatpush3.bf16.msra.mxu0 %v663_v46  ;;  %v119_v24 = vld [vmem:[%s1228_s1 + $0x330] sm:$0xff]  ;;  %v120_v25 = vld [vmem:[%s1228_s1 + $0x338] sm:$0xff]  ;;  %v137_v29 = vld [vmem:[%s1228_s1 + $0x3c0] sm:$0xff] }
  0x22   :  { %698 = vmatprep.subr.bf16.mxu0 %v697_v48  ;;  %v138_v30 = vld [vmem:[%s1228_s1 + $0x3c8] sm:$0xff] }
  0x23   :  { %696 = vmatpush3.bf16.msra.mxu1 %v695_v47  ;;  %v16_v31 = vld [vmem:[%s1227_s0 + $0x8] sm:$0xff] }
  0x24   :  { %730 = vmatprep.subr.bf16.mxu1 %v729_v52  ;;  %261 = vmatmul.mubr.f32.vlgmr.msra.gmra.mrb[0].mxu0 %v161_v27  ;;  %v105_v27 = vld [vmem:[%s1228_s1 + $0x2c0] sm:$0xff] }
  0x25   :  { %700 = vmatpush3.bf16.msra.mxu0 %v699_v58 }
  0x26   :  { %331 = vmatmul.mubr.f32.vlgmr.msra.gmra.mrb[0].mxu1 %v168_v33  ;;  %702 = vmatprep.subr.bf16.mxu0 %v701_v60 }
  0x27   :  { %732 = vmatpush3.bf16.msra.mxu1 %v731_v59 }
  0x28   :  { %734 = vmatprep.subr.bf16.mxu1 %v733_v0 }
  0x29   :  { %704 = vmatpush3.bf16.msra.mxu0 %v703_v6 }
  0x2a   :  { %706 = vmatprep.subr.bf16.mxu0 %v705_v8 }
  0x2b   :  { %736 = vmatpush3.bf16.msra.mxu1 %v735_v7 }
  0x2c   :  { %738 = vmatprep.subr.bf16.mxu1 %v737_v12 }
  0x2d   :  { %8 = vsyncpa [#allocation3], 0  ;;  %708 = vmatpush3.bf16.msra.mxu0 %v707_v19  ;;  %v711_v32 = vpack.c.bf16 %v88_v23, %v87_v20  ;;  %v1122_v33 = vrot.slane %v16_v31, %v961_v13  ;;  %v171_v34 = vcombine.high %v16_v31, %v16_v31  ;;  %v743_v35 = vpack.c.bf16 %v120_v25, %v119_v24  ;;  %v89_v37 = vld [vmem:[%s1228_s1 + $0x240] sm:$0xff]  ;;  %v90_v38 = vld [vmem:[%s1228_s1 + $0x248] sm:$0xff] }
  0x2e   :  { %710 = vmatprep.subr.bf16.mxu0 %v709_v22  ;;  %v713_v36 = vpack.c.bf16 %v106_v28, %v105_v27  ;;  %v121_v39 = vld [vmem:[%s1228_s1 + $0x340] sm:$0xff]  ;;  %v745_v40 = vpack.c.bf16 %v138_v30, %v137_v29  ;;  %v122_v41 = vld [vmem:[%s1228_s1 + $0x348] sm:$0xff]  ;;  %v107_v42 = vld [vmem:[%s1228_s1 + $0x2d0] sm:$0xff]  ;;  %v715_v48 = vpack.c.bf16 %v90_v38, %v89_v37  ;;  %vm476_vm0 = vcmask 74752  }
  0x2f   :  { %740 = vmatpush3.bf16.msra.mxu1 %v739_v21  ;;  %v108_v43 = vld [vmem:[%s1228_s1 + $0x2d8] sm:$0xff]  ;;  %v186_v44 = vcombine.high %v1122_v33, %v1122_v33  ;;  %v185_v45 = vrot.slane %v171_v34, %v961_v13  ;;  %v139_v46 = vld [vmem:[%s1228_s1 + $0x3d0] sm:$0xff]  ;;  %v747_v50 = vpack.c.bf16 %v122_v41, %v121_v39  ;;  %v109_v56 = vld [vmem:[%s1228_s1 + $0x2e0] sm:$0xff] }
  0x30   :  { %742 = vmatprep.subr.bf16.mxu1 %v741_v26  ;;  %v140_v47 = vld [vmem:[%s1228_s1 + $0x3d8] sm:$0xff]  ;;  %v717_v51 = vpack.c.bf16 %v108_v43, %v107_v42  ;;  %v91_v13 = vld [vmem:[%s1228_s1 + $0x250] sm:$0xff]  ;;  %v110_v57 = vld [vmem:[%s1228_s1 + $0x2e8] sm:$0xff] }
  0x31   :  { %712 = vmatpush3.bf16.msra.mxu0 %v711_v32  ;;  %400 = vmatprep.mubr.f32.mxu0 %v186_v44  ;;  %v187_v49 = vcombine.high %v185_v45, %v185_v45  ;;  %v92_v52 = vld [vmem:[%s1228_s1 + $0x258] sm:$0xff]  ;;  %v123_v53 = vld [vmem:[%s1228_s1 + $0x350] sm:$0xff]  ;;  %v749_v54 = vpack.c.bf16 %v140_v47, %v139_v46  ;;  %v141_v58 = vld [vmem:[%s1228_s1 + $0x3e0] sm:$0xff]  ;;  %v721_v62 = vpack.c.bf16 %v110_v57, %v109_v56 }
  0x32   :  { %714 = vmatprep.subr.bf16.mxu0 %v713_v36  ;;  %v124_v55 = vld [vmem:[%s1228_s1 + $0x358] sm:$0xff]  ;;  %v142_v59 = vld [vmem:[%s1228_s1 + $0x3e8] sm:$0xff]  ;;  %v719_v60 = vpack.c.bf16 %v92_v52, %v91_v13  ;;  %v93_v63 = vld [vmem:[%s1228_s1 + $0x260] sm:$0xff] }
  0x33   :  { %744 = vmatpush3.bf16.msra.mxu1 %v743_v35  ;;  %470 = vmatprep.mubr.f32.mxu1 %v187_v49  ;;  %v751_v61 = vpack.c.bf16 %v124_v55, %v123_v53  ;;  %v94_v0 = vld [vmem:[%s1228_s1 + $0x268] sm:$0xff]  ;;  %v125_v1 = vld [vmem:[%s1228_s1 + $0x360] sm:$0xff]  ;;  %v753_v2 = vpack.c.bf16 %v142_v59, %v141_v58  ;;  %v111_v4 = vld [vmem:[%s1228_s1 + $0x2f0] sm:$0xff] }
  0x34   :  { %746 = vmatprep.subr.bf16.mxu1 %v745_v40  ;;  %v126_v3 = vld [vmem:[%s1228_s1 + $0x368] sm:$0xff]  ;;  %v112_v5 = vld [vmem:[%s1228_s1 + $0x2f8] sm:$0xff]  ;;  %v143_v6 = vld [vmem:[%s1228_s1 + $0x3f0] sm:$0xff]  ;;  %v723_v8 = vpack.c.bf16 %v94_v0, %v93_v63 }
  0x35   :  { %716 = vmatpush3.bf16.msra.mxu0 %v715_v48  ;;  %v144_v7 = vld [vmem:[%s1228_s1 + $0x3f8] sm:$0xff]  ;;  %v755_v9 = vpack.c.bf16 %v126_v3, %v125_v1  ;;  %v725_v10 = vpack.c.bf16 %v112_v5, %v111_v4  ;;  %v95_v11 = vld [vmem:[%s1228_s1 + $0x270] sm:$0xff]  ;;  %v492_v20 = vld [vmem:[%s1229_s2] ss:$0 sm:$0xff] }
  0x36   :  { %718 = vmatprep.subr.bf16.mxu0 %v717_v51  ;;  %v96_v12 = vld [vmem:[%s1228_s1 + $0x278] sm:$0xff]  ;;  %v757_v14 = vpack.c.bf16 %v144_v7, %v143_v6  ;;  %v127_v15 = vld [vmem:[%s1228_s1 + $0x370] sm:$0xff] }
  0x37   :  { %748 = vmatpush3.bf16.msra.mxu1 %v747_v50  ;;  %v128_v16 = vld [vmem:[%s1228_s1 + $0x378] sm:$0xff]  ;;  %v727_v17 = vpack.c.bf16 %v96_v12, %v95_v11  ;;  %s790_s1 = smov [#allocation2]  }
  0x38   :  { %750 = vmatprep.subr.bf16.mxu1 %v749_v54  ;;  %v759_v18 = vpack.c.bf16 %v128_v16, %v127_v15  ;;  %s484_s29 = sshll.u32 %s790_s1, 4  ;;  %s485_s29 = int_to_ptr.vmem [resolvable:$true] %s484_s29 }
  0x39   :  { %720 = vmatpush3.bf16.msra.mxu0 %v719_v60  ;;  %s765_s2 = scalar_lea.vmem %s485_s29, 32  ;;  %p770_p1 = scmp.lt.s32.totalorder %s485_s29, %s485_s29 }
  0x3a   :  { %722 = vmatprep.subr.bf16.mxu0 %v721_v62  ;;  %p766_p0 = scmp.ne.s32.totalorder %s485_s29, %s765_s2  ;;  %p771_p2 = scmp.lt.s32.totalorder %s765_s2, %s765_s2 }
  0x3b   :  { %752 = vmatpush3.bf16.msra.mxu1 %v751_v61 }
  0x3c   :  { %754 = vmatprep.subr.bf16.mxu1 %v753_v2  ;;  %p772_p3 = por %p771_p2, %p770_p1 }
  0x3d   :  { %724 = vmatpush3.bf16.msra.mxu0 %v723_v8 }
  0x3e   :  { %726 = vmatprep.subr.bf16.mxu0 %v725_v10  ;;  %p773_p4 = pnand %p772_p3, %p766_p0 }
  0x3f   :  { %756 = vmatpush3.bf16.msra.mxu1 %v755_v9 }
  0x40   :  { %758 = vmatprep.subr.bf16.mxu1 %v757_v14 }
  0x41   :  { %728 = vmatpush3.bf16.msra.mxu0 %v727_v17 }
  0x43   :  { %760 = vmatpush3.bf16.msra.mxu1 %v759_v18 }
  0x44   :  { %401 = vmatmul.mubr.f32.vlgmr.msra.gmra.mrb[2].mxu0 %v1122_v33 }
  0x46   :  { %471 = vmatmul.mubr.f32.vlgmr.msra.gmra.mrb[2].mxu1 %v185_v45 }
  0xf7   :  { %v525_v19 = vpop.f32.mrb[0].mxu0 }
  0xf8   :  { %v526_v21 = vpop.f32.mrb[1].mxu0 }
  0xf9   :  { %v560_v22 = vpop.f32.mrb[0].mxu1  ;;  %v527_v23 = vadd.f32 %v526_v21, %v525_v19 }
  0xfa   :  { %v561_v24 = vpop.f32.mrb[1].mxu1 }
  0xfb   :  { %v562_v25 = vadd.f32 %v561_v24, %v560_v22  ;;  %v263_v26 = vadd.f32 %v527_v23, %v492_v20 }
  0xfd   :  { %v333_v27 = vadd.f32 %v562_v25, %v263_v26 }
 0x117   :  { %v595_v28 = vpop.f32.mrb[2].mxu0 }
 0x118   :  { %v596_v29 = vpop.f32.mrb[3].mxu0 }
 0x119   :  { %v630_v30 = vpop.f32.mrb[2].mxu1  ;;  %v597_v31 = vadd.f32 %v596_v29, %v595_v28 }
 0x11a   :  { %v631_v32 = vpop.f32.mrb[3].mxu1 }
 0x11b   :  { %v632_v34 = vadd.f32 %v631_v32, %v630_v30  ;;  %v403_v33 = vadd.f32 %v597_v31, %v333_v27 }
 0x11d   :  { %v473_v35 = vadd.f32 %v632_v34, %v403_v33 }
 0x11f   :  { %477 = vst.msk [vmem:[#allocation2] sm:$0x3] %vm476_vm0, %v473_v35 }
 0x120   :  { %776 = shalt.err (!%p773_p4)
}
 0x121   :  { %s777_s4 = scalar_lea.hbm %s1230_s3, 32 }
 0x122   :  { %p778_p5 = scmp.ne.s32.totalorder %s1230_s3, %s777_s4  ;;  %p781_p6 = scmp.lt.u32.totalorder %s777_s4, %s1230_s3 }
 0x124   :  { %p783_p7 = pnand %p781_p6, %p778_p5 }
 0x126   :  { %786 = shalt.err (!%p783_p7)
}
 0x127   :  { %487 = dma.vmem_to_hbm [thread:$0]  %s485_s29, 32, %s1230_s3, [#allocation3]  }
 0x128   :  { %787 = dma.done.wait [#allocation3], 32  }
 0x129   :  { %788 = vsyncadd [#allocation3], 4294967264 }
 0x12a   :  { %491 = vsyncpa [#allocation3], 1 }

</bundles_post_ra>
